<compile_context>
chip_gen: v5e
topology: v5e:2x2
jax: 0.10.0
libtpu: 0.0.40
codegen_flags: <defaults>
</compile_context>

<pallas_src>
import functools

import jax
import jax.numpy as jnp
from jax import lax
from jax.experimental import pallas as pl
from jax.experimental.pallas import tpu as pltpu

TM_MAX = 512                   # row tile for the flat (M, C) 1x1-conv kernels
MXU_DTYPE = jnp.bfloat16       # matmul operand dtype (f32 accumulation on the MXU)
ACT_DTYPE = jnp.float32        # inter-stage activation dtype in HBM
                               # (set to jnp.bfloat16 in production to halve HBM traffic)
VMEM_LIMIT = 48 * 1024 * 1024  # scoped VMEM budget (fits v7x's 64 MiB physical VMEM)


def _compiler_params():
    return pltpu.CompilerParams(
        dimension_semantics=("parallel",),   # lets v7x shard the grid over both TCs
        vmem_limit_bytes=VMEM_LIMIT)


# ------------------------- Pallas kernels -------------------------

def _bn_relu_matmul_kernel(x_ref, scale_ref, shift_ref, w_ref, o_ref):
    # BN/ReLU in f32 on the VPU (v5e has no bf16 VPU); bf16 operands for the MXU.
    a = jnp.maximum(x_ref[...].astype(jnp.float32) * scale_ref[...] + shift_ref[...], 0.0)
    o_ref[...] = jnp.dot(a.astype(MXU_DTYPE), w_ref[...],
                         preferred_element_type=jnp.float32).astype(o_ref.dtype)


def _bn_relu_matmul_add_kernel(x_ref, scale_ref, shift_ref, w_ref, res_ref, o_ref):
    a = jnp.maximum(x_ref[...].astype(jnp.float32) * scale_ref[...] + shift_ref[...], 0.0)
    o_ref[...] = (jnp.dot(a.astype(MXU_DTYPE), w_ref[...],
                          preferred_element_type=jnp.float32)
                  + res_ref[...].astype(jnp.float32)).astype(o_ref.dtype)


def _conv3x3_bn_relu_kernel(x_ref, mask_ref, scale_ref, shift_ref, w_ref, o_ref,
                            *, stride, hq, ho, wo):
    """Fused BN + ReLU + 3x3 conv for one image.

    x_ref   : (s*s*hq, wq, C)   phase-split, zero-padded, *pre-BN* activation
    mask_ref: (s*s*hq, wq, 1)   1.0 inside the original image, 0.0 on the padding ring
    w_ref   : (9, C, Cout)      tap-major weights (ky*3+kx, Cin, Cout), MXU_DTYPE
    o_ref   : (ho*wo, Cout)
    """
    s = stride
    c = x_ref.shape[-1]
    cout = w_ref.shape[-1]

    xv = x_ref[...].astype(jnp.float32)
    a = jnp.maximum(xv * scale_ref[...] + shift_ref[...], 0.0)
    # the reference zero-pads *after* BN+ReLU, so zero the padding ring post-activation
    a = (a * mask_ref[...]).astype(MXU_DTYPE)

    acc = jnp.zeros((ho * wo, cout), jnp.float32)
    for ky in range(3):                      # 9 taps, statically unrolled
        for kx in range(3):
            p = (ky % s) * s + (kx % s)      # phase index
            iy, ix = ky // s, kx // s        # offset inside the phase
            win = a[p * hq + iy: p * hq + iy + ho, ix: ix + wo, :]   # (ho, wo, C)
            acc = acc + jnp.dot(win.reshape(ho * wo, c), w_ref[ky * 3 + kx],
                                preferred_element_type=jnp.float32)
    o_ref[...] = acc.astype(o_ref.dtype)


# ------------------------- kernel wrappers -------------------------

def _round_up(x, m):
    return ((x + m - 1) // m) * m


def bn_relu_matmul(x2d, scale, shift, w, residual=None, *, tm_max=TM_MAX):
    """relu(x2d * scale + shift) @ w (+ residual).  x2d: (M, Cin), w: (Cin, Cout)."""
    m, cin = x2d.shape
    cout = w.shape[1]
    tm = min(tm_max, _round_up(m, 8))        # big row tiles; no jnp.pad copy - cdiv grid
    grid = (pl.cdiv(m, tm),)

    in_specs = [
        pl.BlockSpec((tm, cin), lambda i: (i, 0)),
        pl.BlockSpec((1, cin), lambda i: (0, 0)),
        pl.BlockSpec((1, cin), lambda i: (0, 0)),
        pl.BlockSpec((cin, cout), lambda i: (0, 0)),
    ]
    args = [x2d.astype(ACT_DTYPE),
            scale.reshape(1, cin).astype(jnp.float32),
            shift.reshape(1, cin).astype(jnp.float32),
            w.astype(MXU_DTYPE)]
    kernel = _bn_relu_matmul_kernel
    if residual is not None:
        kernel = _bn_relu_matmul_add_kernel
        in_specs.append(pl.BlockSpec((tm, cout), lambda i: (i, 0)))
        args.append(residual.astype(ACT_DTYPE))

    return pl.pallas_call(
        kernel,
        out_shape=jax.ShapeDtypeStruct((m, cout), ACT_DTYPE),
        grid=grid,
        in_specs=in_specs,
        out_specs=pl.BlockSpec((tm, cout), lambda i: (i, 0)),
        compiler_params=_compiler_params(),
    )(*args)


def _phase_split(x, s):
    # (N, Hp, Wp, C) -> (N, s*s*Hq, Wq, C); phase p = py*s + px holds rows py::s, cols px::s.
    n, hp, wp, c = x.shape
    hq, wq = hp // s, wp // s
    x = x.reshape(n, hq, s, wq, s, c)
    x = jnp.transpose(x, (0, 2, 4, 1, 3, 5))
    return x.reshape(n, s * s * hq, wq, c)


def conv3x3_bn_relu(x_nhwc, scale, shift, w_oihw, stride):
    """Fused BN + ReLU + 3x3 conv (padding=1).  x_nhwc: (N,H,W,C) pre-BN activation."""
    n, h, w, c = x_nhwc.shape
    cout = w_oihw.shape[0]
    s = stride
    ho = (h - 1) // s + 1
    wo = (w - 1) // s + 1

    # zero-pad by 1 (plus alignment so every phase has the same size)
    hp = h + 2 + ((-(h + 2)) % s)
    wp = w + 2 + ((-(w + 2)) % s)
    hq, wq = hp // s, wp // s
    # TODO(synk): padding + phase-split layout prep kept as cheap one-pass JAX glue
    # (a fully fused producer would have Block1 write this layout directly).
    xp = jnp.pad(x_nhwc.astype(ACT_DTYPE),
                 ((0, 0), (1, hp - h - 1), (1, wp - w - 1), (0, 0)))
    phases = _phase_split(xp, s)                                  # (N, s*s*hq, wq, C)

    vm = jnp.pad(jnp.ones((1, h, w, 1), jnp.float32),
                 ((0, 0), (1, hp - h - 1), (1, wp - w - 1), (0, 0)))
    vmask = _phase_split(vm, s)[0]                                # (s*s*hq, wq, 1)

    # OIHW -> (ky*3+kx, Cin, Cout)
    w_taps = jnp.transpose(w_oihw, (2, 3, 1, 0)).reshape(9, c, cout).astype(MXU_DTYPE)

    kernel = functools.partial(_conv3x3_bn_relu_kernel,
                               stride=s, hq=hq, ho=ho, wo=wo)
    out = pl.pallas_call(
        kernel,
        out_shape=jax.ShapeDtypeStruct((n, ho * wo, cout), ACT_DTYPE),
        grid=(n,),
        in_specs=[
            pl.BlockSpec((None, s * s * hq, wq, c), lambda i: (i, 0, 0, 0)),
            pl.BlockSpec((s * s * hq, wq, 1), lambda i: (0, 0, 0)),
            pl.BlockSpec((1, c), lambda i: (0, 0)),
            pl.BlockSpec((1, c), lambda i: (0, 0)),
            pl.BlockSpec((9, c, cout), lambda i: (0, 0, 0)),
        ],
        out_specs=pl.BlockSpec((None, ho * wo, cout), lambda i: (i, 0, 0)),
        compiler_params=_compiler_params(),
    )(phases, vmask,
      scale.reshape(1, c).astype(jnp.float32),
      shift.reshape(1, c).astype(jnp.float32),
      w_taps)
    return out.reshape(n, ho, wo, cout)


# ------------------------- BottleNeck forward -------------------------

def _batch_stats(x, axes):
    # TODO(synk): BN batch-statistics reduction kept in plain JAX (cheap per-channel glue).
    # One-pass biased statistics: a single HBM read, XLA fuses both reductions.
    m1 = jnp.mean(x, axis=axes)
    m2 = jnp.mean(jnp.square(x), axis=axes)
    var = jnp.maximum(m2 - jnp.square(m1), 0.0)
    return m1, var


def _bn_scale_shift(mean, var, gamma, beta, eps=1e-5):
    scale = gamma / jnp.sqrt(var + eps)
    shift = beta - mean * scale
    return scale, shift


def bottleneck_forward(x_nchw, params, stride=1):
    x = jnp.transpose(x_nchw, (0, 2, 3, 1)).astype(ACT_DTYPE)     # NHWC
    n, h, w, in_ch = x.shape
    out_ch = params["w1_oihw"].shape[0]
    exp = 4

    # shared batch stats of the block input (used by both BN1 and the identity BN)
    mean_x, var_x = _batch_stats(x.astype(jnp.float32), (0, 1, 2))

    # --- Block1: BN + ReLU + 1x1 conv (fused) ---
    s1, t1 = _bn_scale_shift(mean_x, var_x, params["g1"], params["b1"])
    w1 = params["w1_oihw"][:, :, 0, 0].T                          # (in_ch, out_ch)
    x1 = bn_relu_matmul(x.reshape(n * h * w, in_ch), s1, t1, w1)
    x1 = x1.reshape(n, h, w, out_ch)

    # --- Block2: BN + ReLU + 3x3 conv (stride, pad=1), fully fused (no im2col) ---
    m2_, v2_ = _batch_stats(x1.astype(jnp.float32), (0, 1, 2))
    s2, t2 = _bn_scale_shift(m2_, v2_, params["g2"], params["b2"])
    x2 = conv3x3_bn_relu(x1, s2, t2, params["w2_oihw"], stride)   # (n, ho, wo, out_ch)
    ho, wo = x2.shape[1], x2.shape[2]

    # --- identity branch ---
    if params.get("wi_oihw") is not None:
        si, ti = _bn_scale_shift(mean_x, var_x, params["gi"], params["bi"])
        xs = x[:, ::stride, ::stride, :]                          # 1x1 stride-s conv = subsample
        wi = params["wi_oihw"][:, :, 0, 0].T                      # (in_ch, 4*out_ch)
        identity2d = bn_relu_matmul(xs.reshape(n * ho * wo, in_ch), si, ti, wi)
    else:
        assert stride == 1 and in_ch == exp * out_ch, "plain identity needs matching shapes"
        identity2d = x.reshape(n * h * w, in_ch)

    # --- Block3: BN + ReLU + 1x1 conv, fused residual add ---
    m3_, v3_ = _batch_stats(x2.astype(jnp.float32), (0, 1, 2))
    s3, t3 = _bn_scale_shift(m3_, v3_, params["g3"], params["b3"])
    w3 = params["w3_oihw"][:, :, 0, 0].T                          # (out_ch, 4*out_ch)
    out2d = bn_relu_matmul(x2.reshape(n * ho * wo, out_ch), s3, t3, w3,
                           residual=identity2d)
    out = out2d.reshape(n, ho, wo, exp * out_ch)
    return jnp.transpose(out, (0, 3, 1, 2))                       # back to NCHW


# ------------------------- pure-JAX reference (for checking) -------------------------

def _bn_relu_ref(x, gamma, beta, eps=1e-5):
    mean = jnp.mean(x, axis=(0, 2, 3), keepdims=True)
    var = jnp.mean(jnp.square(x - mean), axis=(0, 2, 3), keepdims=True)
    xn = (x - mean) / jnp.sqrt(var + eps)
    return jnp.maximum(xn * gamma.reshape(1, -1, 1, 1) + beta.reshape(1, -1, 1, 1), 0.0)


def _conv_ref(x, w_oihw, stride, pad):
    return lax.conv_general_dilated(
        x, w_oihw, (stride, stride), [(pad, pad), (pad, pad)],
        dimension_numbers=("NCHW", "OIHW", "NCHW"),
        precision=lax.Precision.HIGHEST)


def bottleneck_ref(x_nchw, params, stride=1):
    x = x_nchw.astype(jnp.float32)
    h1 = _conv_ref(_bn_relu_ref(x, params["g1"], params["b1"]), params["w1_oihw"], 1, 0)
    h2 = _conv_ref(_bn_relu_ref(h1, params["g2"], params["b2"]), params["w2_oihw"], stride, 1)
    h3 = _conv_ref(_bn_relu_ref(h2, params["g3"], params["b3"]), params["w3_oihw"], 1, 0)
    if params.get("wi_oihw") is not None:
        idn = _conv_ref(_bn_relu_ref(x, params["gi"], params["bi"]),
                        params["wi_oihw"], stride, 0)
    else:
        idn = x
    return h3 + idn


# ------------------------- parameter init & main -------------------------

def init_params(key, in_ch, out_ch, stride):
    exp = 4
    ks = jax.random.split(key, 12)
    p = {
        "g1": 1.0 + 0.1 * jax.random.normal(ks[0], (in_ch,), jnp.float32),
        "b1": 0.1 * jax.random.normal(ks[1], (in_ch,), jnp.float32),
        "w1_oihw": 0.2 * jax.random.normal(ks[2], (out_ch, in_ch, 1, 1), jnp.float32),
        "g2": 1.0 + 0.1 * jax.random.normal(ks[3], (out_ch,), jnp.float32),
        "b2": 0.1 * jax.random.normal(ks[4], (out_ch,), jnp.float32),
        "w2_oihw": 0.2 * jax.random.normal(ks[5], (out_ch, out_ch, 3, 3), jnp.float32),
        "g3": 1.0 + 0.1 * jax.random.normal(ks[6], (out_ch,), jnp.float32),
        "b3": 0.1 * jax.random.normal(ks[7], (out_ch,), jnp.float32),
        "w3_oihw": 0.2 * jax.random.normal(ks[8], (exp * out_ch, out_ch, 1, 1), jnp.float32),
    }
    if stride != 1 or in_ch != exp * out_ch:
        p["gi"] = 1.0 + 0.1 * jax.random.normal(ks[9], (in_ch,), jnp.float32)
        p["bi"] = 0.1 * jax.random.normal(ks[10], (in_ch,), jnp.float32)
        p["wi_oihw"] = 0.2 * jax.random.normal(ks[11], (exp * out_ch, in_ch, 1, 1),
                                               jnp.float32)
    else:
        p["wi_oihw"] = None
    return p


if __name__ == "__main__":
    key = jax.random.PRNGKey(0)
    kx_, kp1, kp2 = jax.random.split(key, 3)

    N, IN_CH, H, W = 2, 4, 16, 16
    OUT_CH = 4
    x = jax.random.normal(kx_, (N, IN_CH, H, W), jnp.float32)     # NCHW like PyTorch

    ok = True
    for stride, kp in ((1, kp1), (2, kp2)):
        params = init_params(kp, IN_CH, OUT_CH, stride)
        fwd = jax.jit(functools.partial(bottleneck_forward, stride=stride))
        out = jax.block_until_ready(fwd(x, params))
        ref = jax.block_until_ready(bottleneck_ref(x, params, stride=stride))
        assert out.shape == ref.shape, (out.shape, ref.shape)
        # tolerance reflects bf16 MXU operands (f32 accumulation) vs the f32 HIGHEST reference
        if not jnp.allclose(out, ref, rtol=2e-2, atol=2e-2):
            ok = False
            print(f"mismatch at stride={stride}: "
                  f"max abs err {float(jnp.max(jnp.abs(out - ref)))}")

    if ok:
        print("KERNEL_OK")
</pallas_src>

<mosaic_0001>
module attributes {stable_mosaic.version = 11 : i64} {
  func.func @_bn_relu_matmul_kernel(%arg0: i32, %arg1: memref<512x4xf32, #tpu.memory_space<vmem>>, %arg2: memref<1x4xf32, #tpu.memory_space<vmem>>, %arg3: memref<1x4xf32, #tpu.memory_space<vmem>>, %arg4: memref<4x4xbf16, #tpu.memory_space<vmem>>, %arg5: memref<512x4xf32, #tpu.memory_space<vmem>>) attributes {dimension_semantics = [#tpu.dimension_semantics<parallel>], iteration_bounds = array<i64: 1>, scalar_prefetch = 0 : i64, scratch_operands = 0 : i64, tpu.core_type = #tpu.core_type<tc>, window_params = [{transform_indices = @transform_0, window_bounds = array<i64: 512, 4>}, {pipeline_mode = #tpu.pipeline_mode<synchronous>, transform_indices = @transform_1, window_bounds = array<i64: 1, 4>}, {pipeline_mode = #tpu.pipeline_mode<synchronous>, transform_indices = @transform_2, window_bounds = array<i64: 1, 4>}, {pipeline_mode = #tpu.pipeline_mode<synchronous>, transform_indices = @transform_3, window_bounds = array<i64: 4, 4>}, {transform_indices = @transform_4, window_bounds = array<i64: 512, 4>}]} {
    %c0 = arith.constant 0 : index
    %c0_0 = arith.constant 0 : index
    %0 = vector.load %arg1[%c0, %c0_0] : memref<512x4xf32, #tpu.memory_space<vmem>>, vector<512x4xf32>
    %c0_1 = arith.constant 0 : index
    %c0_2 = arith.constant 0 : index
    %1 = vector.load %arg2[%c0_1, %c0_2] : memref<1x4xf32, #tpu.memory_space<vmem>>, vector<1x4xf32>
    %2 = vector.broadcast %1 : vector<1x4xf32> to vector<512x4xf32>
    %3 = arith.mulf %0, %2 : vector<512x4xf32>
    %c0_3 = arith.constant 0 : index
    %c0_4 = arith.constant 0 : index
    %4 = vector.load %arg3[%c0_3, %c0_4] : memref<1x4xf32, #tpu.memory_space<vmem>>, vector<1x4xf32>
    %5 = vector.broadcast %4 : vector<1x4xf32> to vector<512x4xf32>
    %6 = arith.addf %3, %5 : vector<512x4xf32>
    %cst = arith.constant 0.000000e+00 : f32
    %7 = vector.broadcast %cst : f32 to vector<512x4xf32>
    %8 = arith.maximumf %6, %7 : vector<512x4xf32>
    %9 = arith.truncf %8 : vector<512x4xf32> to vector<512x4xbf16>
    %c0_5 = arith.constant 0 : index
    %c0_6 = arith.constant 0 : index
    %10 = vector.load %arg4[%c0_5, %c0_6] : memref<4x4xbf16, #tpu.memory_space<vmem>>, vector<4x4xbf16>
    %cst_7 = arith.constant dense<0.000000e+00> : vector<512x4xf32>
    %11 = tpu.matmul %9, %10, %cst_7 {dimension_numbers = #tpu.dot_dimension_numbers<[1], [0], [0], [1], [0, 0, 1, 1], [], []>} : vector<512x4xbf16>, vector<4x4xbf16>, vector<512x4xf32> -> vector<512x4xf32>
    %c0_8 = arith.constant 0 : index
    %c0_9 = arith.constant 0 : index
    %12 = vector.load %arg5[%c0_8, %c0_9] : memref<512x4xf32, #tpu.memory_space<vmem>>, vector<512x4xf32>
    tpu.vector_store %arg5[%c0_8, %c0_9], %11 {strides = array<i32>} : memref<512x4xf32, #tpu.memory_space<vmem>>, vector<512x4xf32>,
    return
  }
  func.func @transform_0(%arg0: i32) -> (i32, i32) {
    %c0_i32 = arith.constant 0 : i32
    %c0_i32_0 = arith.constant 0 : i32
    return %arg0, %c0_i32 : i32, i32
  }
  func.func @transform_1(%arg0: i32) -> (i32, i32) {
    %c0_i32 = arith.constant 0 : i32
    %c0_i32_0 = arith.constant 0 : i32
    %c0_i32_1 = arith.constant 0 : i32
    return %c0_i32, %c0_i32_0 : i32, i32
  }
  func.func @transform_2(%arg0: i32) -> (i32, i32) {
    %c0_i32 = arith.constant 0 : i32
    %c0_i32_0 = arith.constant 0 : i32
    %c0_i32_1 = arith.constant 0 : i32
    return %c0_i32, %c0_i32_0 : i32, i32
  }
  func.func @transform_3(%arg0: i32) -> (i32, i32) {
    %c0_i32 = arith.constant 0 : i32
    %c0_i32_0 = arith.constant 0 : i32
    %c0_i32_1 = arith.constant 0 : i32
    return %c0_i32, %c0_i32_0 : i32, i32
  }
  func.func @transform_4(%arg0: i32) -> (i32, i32) {
    %c0_i32 = arith.constant 0 : i32
    %c0_i32_0 = arith.constant 0 : i32
    return %arg0, %c0_i32 : i32, i32
  }
}

module attributes {stable_mosaic.version = 11 : i64} {
  func.func @_bn_relu_matmul_kernel(%arg0: i32, %arg1: memref<512x4xf32, #tpu.memory_space<vmem>>, %arg2: memref<1x4xf32, #tpu.memory_space<vmem>>, %arg3: memref<1x4xf32, #tpu.memory_space<vmem>>, %arg4: memref<4x16xbf16, #tpu.memory_space<vmem>>, %arg5: memref<512x16xf32, #tpu.memory_space<vmem>>) attributes {dimension_semantics = [#tpu.dimension_semantics<parallel>], iteration_bounds = array<i64: 1>, scalar_prefetch = 0 : i64, scratch_operands = 0 : i64, tpu.core_type = #tpu.core_type<tc>, window_params = [{transform_indices = @transform_0, window_bounds = array<i64: 512, 4>}, {pipeline_mode = #tpu.pipeline_mode<synchronous>, transform_indices = @transform_1, window_bounds = array<i64: 1, 4>}, {pipeline_mode = #tpu.pipeline_mode<synchronous>, transform_indices = @transform_2, window_bounds = array<i64: 1, 4>}, {pipeline_mode = #tpu.pipeline_mode<synchronous>, transform_indices = @transform_3, window_bounds = array<i64: 4, 16>}, {transform_indices = @transform_4, window_bounds = array<i64: 512, 16>}]} {
    %c0 = arith.constant 0 : index
    %c0_0 = arith.constant 0 : index
    %0 = vector.load %arg1[%c0, %c0_0] : memref<512x4xf32, #tpu.memory_space<vmem>>, vector<512x4xf32>
    %c0_1 = arith.constant 0 : index
    %c0_2 = arith.constant 0 : index
    %1 = vector.load %arg2[%c0_1, %c0_2] : memref<1x4xf32, #tpu.memory_space<vmem>>, vector<1x4xf32>
    %2 = vector.broadcast %1 : vector<1x4xf32> to vector<512x4xf32>
    %3 = arith.mulf %0, %2 : vector<512x4xf32>
    %c0_3 = arith.constant 0 : index
    %c0_4 = arith.constant 0 : index
    %4 = vector.load %arg3[%c0_3, %c0_4] : memref<1x4xf32, #tpu.memory_space<vmem>>, vector<1x4xf32>
    %5 = vector.broadcast %4 : vector<1x4xf32> to vector<512x4xf32>
    %6 = arith.addf %3, %5 : vector<512x4xf32>
    %cst = arith.constant 0.000000e+00 : f32
    %7 = vector.broadcast %cst : f32 to vector<512x4xf32>
    %8 = arith.maximumf %6, %7 : vector<512x4xf32>
    %9 = arith.truncf %8 : vector<512x4xf32> to vector<512x4xbf16>
    %c0_5 = arith.constant 0 : index
    %c0_6 = arith.constant 0 : index
    %10 = vector.load %arg4[%c0_5, %c0_6] : memref<4x16xbf16, #tpu.memory_space<vmem>>, vector<4x16xbf16>
    %cst_7 = arith.constant dense<0.000000e+00> : vector<512x16xf32>
    %11 = tpu.matmul %9, %10, %cst_7 {dimension_numbers = #tpu.dot_dimension_numbers<[1], [0], [0], [1], [0, 0, 1, 1], [], []>} : vector<512x4xbf16>, vector<4x16xbf16>, vector<512x16xf32> -> vector<512x16xf32>
    %c0_8 = arith.constant 0 : index
    %c0_9 = arith.constant 0 : index
    %12 = vector.load %arg5[%c0_8, %c0_9] : memref<512x16xf32, #tpu.memory_space<vmem>>, vector<512x16xf32>
    tpu.vector_store %arg5[%c0_8, %c0_9], %11 {strides = array<i32>} : memref<512x16xf32, #tpu.memory_space<vmem>>, vector<512x16xf32>,
    return
  }
  func.func @transform_0(%arg0: i32) -> (i32, i32) {
    %c0_i32 = arith.constant 0 : i32
    %c0_i32_0 = arith.constant 0 : i32
    return %arg0, %c0_i32 : i32, i32
  }
  func.func @transform_1(%arg0: i32) -> (i32, i32) {
    %c0_i32 = arith.constant 0 : i32
    %c0_i32_0 = arith.constant 0 : i32
    %c0_i32_1 = arith.constant 0 : i32
    return %c0_i32, %c0_i32_0 : i32, i32
  }
  func.func @transform_2(%arg0: i32) -> (i32, i32) {
    %c0_i32 = arith.constant 0 : i32
    %c0_i32_0 = arith.constant 0 : i32
    %c0_i32_1 = arith.constant 0 : i32
    return %c0_i32, %c0_i32_0 : i32, i32
  }
  func.func @transform_3(%arg0: i32) -> (i32, i32) {
    %c0_i32 = arith.constant 0 : i32
    %c0_i32_0 = arith.constant 0 : i32
    %c0_i32_1 = arith.constant 0 : i32
    return %c0_i32, %c0_i32_0 : i32, i32
  }
  func.func @transform_4(%arg0: i32) -> (i32, i32) {
    %c0_i32 = arith.constant 0 : i32
    %c0_i32_0 = arith.constant 0 : i32
    return %arg0, %c0_i32 : i32, i32
  }
}

module attributes {stable_mosaic.version = 11 : i64} {
  func.func @_conv3x3_bn_relu_kernel(%arg0: i32, %arg1: memref<1x18x18x4xf32, #tpu.memory_space<vmem>>, %arg2: memref<18x18x1xf32, #tpu.memory_space<vmem>>, %arg3: memref<1x4xf32, #tpu.memory_space<vmem>>, %arg4: memref<1x4xf32, #tpu.memory_space<vmem>>, %arg5: memref<9x4x4xbf16, #tpu.memory_space<vmem>>, %arg6: memref<1x256x4xf32, #tpu.memory_space<vmem>>) attributes {dimension_semantics = [#tpu.dimension_semantics<parallel>], iteration_bounds = array<i64: 2>, scalar_prefetch = 0 : i64, scratch_operands = 0 : i64, tpu.core_type = #tpu.core_type<tc>, window_params = [{transform_indices = @transform_0, window_bounds = array<i64: 1, 18, 18, 4>}, {pipeline_mode = #tpu.pipeline_mode<synchronous>, transform_indices = @transform_1, window_bounds = array<i64: 18, 18, 1>}, {pipeline_mode = #tpu.pipeline_mode<synchronous>, transform_indices = @transform_2, window_bounds = array<i64: 1, 4>}, {pipeline_mode = #tpu.pipeline_mode<synchronous>, transform_indices = @transform_3, window_bounds = array<i64: 1, 4>}, {pipeline_mode = #tpu.pipeline_mode<synchronous>, transform_indices = @transform_4, window_bounds = array<i64: 9, 4, 4>}, {transform_indices = @transform_5, window_bounds = array<i64: 1, 256, 4>}]} {
    %c0 = arith.constant 0 : index
    %c0_0 = arith.constant 0 : index
    %c0_1 = arith.constant 0 : index
    %c0_2 = arith.constant 0 : index
    %0 = vector.load %arg1[%c0, %c0_0, %c0_1, %c0_2] : memref<1x18x18x4xf32, #tpu.memory_space<vmem>>, vector<1x18x18x4xf32>
    %1 = vector.shape_cast %0 : vector<1x18x18x4xf32> to vector<18x18x4xf32>
    %c0_3 = arith.constant 0 : index
    %c0_4 = arith.constant 0 : index
    %2 = vector.load %arg3[%c0_3, %c0_4] : memref<1x4xf32, #tpu.memory_space<vmem>>, vector<1x4xf32>
    %3 = vector.shape_cast %2 : vector<1x4xf32> to vector<1x1x4xf32>
    %4 = vector.broadcast %3 : vector<1x1x4xf32> to vector<18x18x4xf32>
    %5 = arith.mulf %1, %4 : vector<18x18x4xf32>
    %c0_5 = arith.constant 0 : index
    %c0_6 = arith.constant 0 : index
    %6 = vector.load %arg4[%c0_5, %c0_6] : memref<1x4xf32, #tpu.memory_space<vmem>>, vector<1x4xf32>
    %7 = vector.shape_cast %6 : vector<1x4xf32> to vector<1x1x4xf32>
    %8 = vector.broadcast %7 : vector<1x1x4xf32> to vector<18x18x4xf32>
    %9 = arith.addf %5, %8 : vector<18x18x4xf32>
    %cst = arith.constant 0.000000e+00 : f32
    %10 = vector.broadcast %cst : f32 to vector<18x18x4xf32>
    %11 = arith.maximumf %9, %10 : vector<18x18x4xf32>
    %c0_7 = arith.constant 0 : index
    %c0_8 = arith.constant 0 : index
    %c0_9 = arith.constant 0 : index
    %12 = vector.load %arg2[%c0_7, %c0_8, %c0_9] : memref<18x18x1xf32, #tpu.memory_space<vmem>>, vector<18x18x1xf32>
    %13 = vector.broadcast %12 : vector<18x18x1xf32> to vector<18x18x4xf32>
    %14 = arith.mulf %11, %13 : vector<18x18x4xf32>
    %15 = arith.truncf %14 : vector<18x18x4xf32> to vector<18x18x4xbf16>
    %cst_10 = arith.constant 0.000000e+00 : f32
    %16 = vector.broadcast %cst_10 : f32 to vector<256x4xf32>
    %17 = vector.extract_strided_slice %15 {offsets = [0, 0, 0], sizes = [16, 16, 4], strides = [1, 1, 1]} : vector<18x18x4xbf16> to vector<16x16x4xbf16>
    %18 = vector.shape_cast %17 : vector<16x16x4xbf16> to vector<256x4xbf16>
    %c0_11 = arith.constant 0 : index
    %c0_12 = arith.constant 0 : index
    %c0_13 = arith.constant 0 : index
    %19 = vector.load %arg5[%c0_11, %c0_12, %c0_13] : memref<9x4x4xbf16, #tpu.memory_space<vmem>>, vector<1x4x4xbf16>
    %20 = vector.shape_cast %19 : vector<1x4x4xbf16> to vector<4x4xbf16>
    %cst_14 = arith.constant dense<0.000000e+00> : vector<256x4xf32>
    %21 = tpu.matmul %18, %20, %cst_14 {dimension_numbers = #tpu.dot_dimension_numbers<[1], [0], [0], [1], [0, 0, 1, 1], [], []>} : vector<256x4xbf16>, vector<4x4xbf16>, vector<256x4xf32> -> vector<256x4xf32>
    %22 = arith.addf %16, %21 : vector<256x4xf32>
    %23 = vector.extract_strided_slice %15 {offsets = [0, 1, 0], sizes = [16, 16, 4], strides = [1, 1, 1]} : vector<18x18x4xbf16> to vector<16x16x4xbf16>
    %24 = vector.shape_cast %23 : vector<16x16x4xbf16> to vector<256x4xbf16>
    %c1 = arith.constant 1 : index
    %c0_15 = arith.constant 0 : index
    %c0_16 = arith.constant 0 : index
    %25 = vector.load %arg5[%c1, %c0_15, %c0_16] : memref<9x4x4xbf16, #tpu.memory_space<vmem>>, vector<1x4x4xbf16>
    %26 = vector.shape_cast %25 : vector<1x4x4xbf16> to vector<4x4xbf16>
    %cst_17 = arith.constant dense<0.000000e+00> : vector<256x4xf32>
    %27 = tpu.matmul %24, %26, %cst_17 {dimension_numbers = #tpu.dot_dimension_numbers<[1], [0], [0], [1], [0, 0, 1, 1], [], []>} : vector<256x4xbf16>, vector<4x4xbf16>, vector<256x4xf32> -> vector<256x4xf32>
    %28 = arith.addf %22, %27 : vector<256x4xf32>
    %29 = vector.extract_strided_slice %15 {offsets = [0, 2, 0], sizes = [16, 16, 4], strides = [1, 1, 1]} : vector<18x18x4xbf16> to vector<16x16x4xbf16>
    %30 = vector.shape_cast %29 : vector<16x16x4xbf16> to vector<256x4xbf16>
    %c2 = arith.constant 2 : index
    %c0_18 = arith.constant 0 : index
    %c0_19 = arith.constant 0 : index
    %31 = vector.load %arg5[%c2, %c0_18, %c0_19] : memref<9x4x4xbf16, #tpu.memory_space<vmem>>, vector<1x4x4xbf16>
    %32 = vector.shape_cast %31 : vector<1x4x4xbf16> to vector<4x4xbf16>
    %cst_20 = arith.constant dense<0.000000e+00> : vector<256x4xf32>
    %33 = tpu.matmul %30, %32, %cst_20 {dimension_numbers = #tpu.dot_dimension_numbers<[1], [0], [0], [1], [0, 0, 1, 1], [], []>} : vector<256x4xbf16>, vector<4x4xbf16>, vector<256x4xf32> -> vector<256x4xf32>
    %34 = arith.addf %28, %33 : vector<256x4xf32>
    %35 = vector.extract_strided_slice %15 {offsets = [1, 0, 0], sizes = [16, 16, 4], strides = [1, 1, 1]} : vector<18x18x4xbf16> to vector<16x16x4xbf16>
    %36 = vector.shape_cast %35 : vector<16x16x4xbf16> to vector<256x4xbf16>
    %c3 = arith.constant 3 : index
    %c0_21 = arith.constant 0 : index
    %c0_22 = arith.constant 0 : index
    %37 = vector.load %arg5[%c3, %c0_21, %c0_22] : memref<9x4x4xbf16, #tpu.memory_space<vmem>>, vector<1x4x4xbf16>
    %38 = vector.shape_cast %37 : vector<1x4x4xbf16> to vector<4x4xbf16>
    %cst_23 = arith.constant dense<0.000000e+00> : vector<256x4xf32>
    %39 = tpu.matmul %36, %38, %cst_23 {dimension_numbers = #tpu.dot_dimension_numbers<[1], [0], [0], [1], [0, 0, 1, 1], [], []>} : vector<256x4xbf16>, vector<4x4xbf16>, vector<256x4xf32> -> vector<256x4xf32>
    %40 = arith.addf %34, %39 : vector<256x4xf32>
    %41 = vector.extract_strided_slice %15 {offsets = [1, 1, 0], sizes = [16, 16, 4], strides = [1, 1, 1]} : vector<18x18x4xbf16> to vector<16x16x4xbf16>
    %42 = vector.shape_cast %41 : vector<16x16x4xbf16> to vector<256x4xbf16>
    %c4 = arith.constant 4 : index
    %c0_24 = arith.constant 0 : index
    %c0_25 = arith.constant 0 : index
    %43 = vector.load %arg5[%c4, %c0_24, %c0_25] : memref<9x4x4xbf16, #tpu.memory_space<vmem>>, vector<1x4x4xbf16>
    %44 = vector.shape_cast %43 : vector<1x4x4xbf16> to vector<4x4xbf16>
    %cst_26 = arith.constant dense<0.000000e+00> : vector<256x4xf32>
    %45 = tpu.matmul %42, %44, %cst_26 {dimension_numbers = #tpu.dot_dimension_numbers<[1], [0], [0], [1], [0, 0, 1, 1], [], []>} : vector<256x4xbf16>, vector<4x4xbf16>, vector<256x4xf32> -> vector<256x4xf32>
    %46 = arith.addf %40, %45 : vector<256x4xf32>
    %47 = vector.extract_strided_slice %15 {offsets = [1, 2, 0], sizes = [16, 16, 4], strides = [1, 1, 1]} : vector<18x18x4xbf16> to vector<16x16x4xbf16>
    %48 = vector.shape_cast %47 : vector<16x16x4xbf16> to vector<256x4xbf16>
    %c5 = arith.constant 5 : index
    %c0_27 = arith.constant 0 : index
    %c0_28 = arith.constant 0 : index
    %49 = vector.load %arg5[%c5, %c0_27, %c0_28] : memref<9x4x4xbf16, #tpu.memory_space<vmem>>, vector<1x4x4xbf16>
    %50 = vector.shape_cast %49 : vector<1x4x4xbf16> to vector<4x4xbf16>
    %cst_29 = arith.constant dense<0.000000e+00> : vector<256x4xf32>
    %51 = tpu.matmul %48, %50, %cst_29 {dimension_numbers = #tpu.dot_dimension_numbers<[1], [0], [0], [1], [0, 0, 1, 1], [], []>} : vector<256x4xbf16>, vector<4x4xbf16>, vector<256x4xf32> -> vector<256x4xf32>
    %52 = arith.addf %46, %51 : vector<256x4xf32>
    %53 = vector.extract_strided_slice %15 {offsets = [2, 0, 0], sizes = [16, 16, 4], strides = [1, 1, 1]} : vector<18x18x4xbf16> to vector<16x16x4xbf16>
    %54 = vector.shape_cast %53 : vector<16x16x4xbf16> to vector<256x4xbf16>
    %c6 = arith.constant 6 : index
    %c0_30 = arith.constant 0 : index
    %c0_31 = arith.constant 0 : index
    %55 = vector.load %arg5[%c6, %c0_30, %c0_31] : memref<9x4x4xbf16, #tpu.memory_space<vmem>>, vector<1x4x4xbf16>
    %56 = vector.shape_cast %55 : vector<1x4x4xbf16> to vector<4x4xbf16>
    %cst_32 = arith.constant dense<0.000000e+00> : vector<256x4xf32>
    %57 = tpu.matmul %54, %56, %cst_32 {dimension_numbers = #tpu.dot_dimension_numbers<[1], [0], [0], [1], [0, 0, 1, 1], [], []>} : vector<256x4xbf16>, vector<4x4xbf16>, vector<256x4xf32> -> vector<256x4xf32>
    %58 = arith.addf %52, %57 : vector<256x4xf32>
    %59 = vector.extract_strided_slice %15 {offsets = [2, 1, 0], sizes = [16, 16, 4], strides = [1, 1, 1]} : vector<18x18x4xbf16> to vector<16x16x4xbf16>
    %60 = vector.shape_cast %59 : vector<16x16x4xbf16> to vector<256x4xbf16>
    %c7 = arith.constant 7 : index
    %c0_33 = arith.constant 0 : index
    %c0_34 = arith.constant 0 : index
    %61 = vector.load %arg5[%c7, %c0_33, %c0_34] : memref<9x4x4xbf16, #tpu.memory_space<vmem>>, vector<1x4x4xbf16>
    %62 = vector.shape_cast %61 : vector<1x4x4xbf16> to vector<4x4xbf16>
    %cst_35 = arith.constant dense<0.000000e+00> : vector<256x4xf32>
    %63 = tpu.matmul %60, %62, %cst_35 {dimension_numbers = #tpu.dot_dimension_numbers<[1], [0], [0], [1], [0, 0, 1, 1], [], []>} : vector<256x4xbf16>, vector<4x4xbf16>, vector<256x4xf32> -> vector<256x4xf32>
    %64 = arith.addf %58, %63 : vector<256x4xf32>
    %65 = vector.extract_strided_slice %15 {offsets = [2, 2, 0], sizes = [16, 16, 4], strides = [1, 1, 1]} : vector<18x18x4xbf16> to vector<16x16x4xbf16>
    %66 = vector.shape_cast %65 : vector<16x16x4xbf16> to vector<256x4xbf16>
    %c8 = arith.constant 8 : index
    %c0_36 = arith.constant 0 : index
    %c0_37 = arith.constant 0 : index
    %67 = vector.load %arg5[%c8, %c0_36, %c0_37] : memref<9x4x4xbf16, #tpu.memory_space<vmem>>, vector<1x4x4xbf16>
    %68 = vector.shape_cast %67 : vector<1x4x4xbf16> to vector<4x4xbf16>
    %cst_38 = arith.constant dense<0.000000e+00> : vector<256x4xf32>
    %69 = tpu.matmul %66, %68, %cst_38 {dimension_numbers = #tpu.dot_dimension_numbers<[1], [0], [0], [1], [0, 0, 1, 1], [], []>} : vector<256x4xbf16>, vector<4x4xbf16>, vector<256x4xf32> -> vector<256x4xf32>
    %70 = arith.addf %64, %69 : vector<256x4xf32>
    %c0_39 = arith.constant 0 : index
    %c0_40 = arith.constant 0 : index
    %c0_41 = arith.constant 0 : index
    %71 = vector.load %arg6[%c0_39, %c0_40, %c0_41] : memref<1x256x4xf32, #tpu.memory_space<vmem>>, vector<1x256x4xf32>
    %72 = vector.shape_cast %71 : vector<1x256x4xf32> to vector<256x4xf32>
    %73 = vector.shape_cast %70 : vector<256x4xf32> to vector<1x256x4xf32>
    tpu.vector_store %arg6[%c0_39, %c0_40, %c0_41], %73 {strides = array<i32>} : memref<1x256x4xf32, #tpu.memory_space<vmem>>, vector<1x256x4xf32>,
    return
  }
  func.func @transform_0(%arg0: i32) -> (i32, i32, i32, i32) {
    %c0_i32 = arith.constant 0 : i32
    %c0_i32_0 = arith.constant 0 : i32
    %c0_i32_1 = arith.constant 0 : i32
    %c0_i32_2 = arith.constant 0 : i32
    return %arg0, %c0_i32, %c0_i32_0, %c0_i32_1 : i32, i32, i32, i32
  }
  func.func @transform_1(%arg0: i32) -> (i32, i32, i32) {
    %c0_i32 = arith.constant 0 : i32
    %c0_i32_0 = arith.constant 0 : i32
    %c0_i32_1 = arith.constant 0 : i32
    %c0_i32_2 = arith.constant 0 : i32
    return %c0_i32, %c0_i32_0, %c0_i32_1 : i32, i32, i32
  }
  func.func @transform_2(%arg0: i32) -> (i32, i32) {
    %c0_i32 = arith.constant 0 : i32
    %c0_i32_0 = arith.constant 0 : i32
    %c0_i32_1 = arith.constant 0 : i32
    return %c0_i32, %c0_i32_0 : i32, i32
  }
  func.func @transform_3(%arg0: i32) -> (i32, i32) {
    %c0_i32 = arith.constant 0 : i32
    %c0_i32_0 = arith.constant 0 : i32
    %c0_i32_1 = arith.constant 0 : i32
    return %c0_i32, %c0_i32_0 : i32, i32
  }
  func.func @transform_4(%arg0: i32) -> (i32, i32, i32) {
    %c0_i32 = arith.constant 0 : i32
    %c0_i32_0 = arith.constant 0 : i32
    %c0_i32_1 = arith.constant 0 : i32
    %c0_i32_2 = arith.constant 0 : i32
    return %c0_i32, %c0_i32_0, %c0_i32_1 : i32, i32, i32
  }
  func.func @transform_5(%arg0: i32) -> (i32, i32, i32) {
    %c0_i32 = arith.constant 0 : i32
    %c0_i32_0 = arith.constant 0 : i32
    %c0_i32_1 = arith.constant 0 : i32
    return %arg0, %c0_i32, %c0_i32_0 : i32, i32, i32
  }
}

module attributes {stable_mosaic.version = 11 : i64} {
  func.func @_bn_relu_matmul_add_kernel(%arg0: i32, %arg1: memref<512x4xf32, #tpu.memory_space<vmem>>, %arg2: memref<1x4xf32, #tpu.memory_space<vmem>>, %arg3: memref<1x4xf32, #tpu.memory_space<vmem>>, %arg4: memref<4x16xbf16, #tpu.memory_space<vmem>>, %arg5: memref<512x16xf32, #tpu.memory_space<vmem>>, %arg6: memref<512x16xf32, #tpu.memory_space<vmem>>) attributes {dimension_semantics = [#tpu.dimension_semantics<parallel>], iteration_bounds = array<i64: 1>, scalar_prefetch = 0 : i64, scratch_operands = 0 : i64, tpu.core_type = #tpu.core_type<tc>, window_params = [{transform_indices = @transform_0, window_bounds = array<i64: 512, 4>}, {pipeline_mode = #tpu.pipeline_mode<synchronous>, transform_indices = @transform_1, window_bounds = array<i64: 1, 4>}, {pipeline_mode = #tpu.pipeline_mode<synchronous>, transform_indices = @transform_2, window_bounds = array<i64: 1, 4>}, {pipeline_mode = #tpu.pipeline_mode<synchronous>, transform_indices = @transform_3, window_bounds = array<i64: 4, 16>}, {transform_indices = @transform_4, window_bounds = array<i64: 512, 16>}, {transform_indices = @transform_5, window_bounds = array<i64: 512, 16>}]} {
    %c0 = arith.constant 0 : index
    %c0_0 = arith.constant 0 : index
    %0 = vector.load %arg1[%c0, %c0_0] : memref<512x4xf32, #tpu.memory_space<vmem>>, vector<512x4xf32>
    %c0_1 = arith.constant 0 : index
    %c0_2 = arith.constant 0 : index
    %1 = vector.load %arg2[%c0_1, %c0_2] : memref<1x4xf32, #tpu.memory_space<vmem>>, vector<1x4xf32>
    %2 = vector.broadcast %1 : vector<1x4xf32> to vector<512x4xf32>
    %3 = arith.mulf %0, %2 : vector<512x4xf32>
    %c0_3 = arith.constant 0 : index
    %c0_4 = arith.constant 0 : index
    %4 = vector.load %arg3[%c0_3, %c0_4] : memref<1x4xf32, #tpu.memory_space<vmem>>, vector<1x4xf32>
    %5 = vector.broadcast %4 : vector<1x4xf32> to vector<512x4xf32>
    %6 = arith.addf %3, %5 : vector<512x4xf32>
    %cst = arith.constant 0.000000e+00 : f32
    %7 = vector.broadcast %cst : f32 to vector<512x4xf32>
    %8 = arith.maximumf %6, %7 : vector<512x4xf32>
    %9 = arith.truncf %8 : vector<512x4xf32> to vector<512x4xbf16>
    %c0_5 = arith.constant 0 : index
    %c0_6 = arith.constant 0 : index
    %10 = vector.load %arg4[%c0_5, %c0_6] : memref<4x16xbf16, #tpu.memory_space<vmem>>, vector<4x16xbf16>
    %cst_7 = arith.constant dense<0.000000e+00> : vector<512x16xf32>
    %11 = tpu.matmul %9, %10, %cst_7 {dimension_numbers = #tpu.dot_dimension_numbers<[1], [0], [0], [1], [0, 0, 1, 1], [], []>} : vector<512x4xbf16>, vector<4x16xbf16>, vector<512x16xf32> -> vector<512x16xf32>
    %c0_8 = arith.constant 0 : index
    %c0_9 = arith.constant 0 : index
    %12 = vector.load %arg5[%c0_8, %c0_9] : memref<512x16xf32, #tpu.memory_space<vmem>>, vector<512x16xf32>
    %13 = arith.addf %11, %12 : vector<512x16xf32>
    %c0_10 = arith.constant 0 : index
    %c0_11 = arith.constant 0 : index
    %14 = vector.load %arg6[%c0_10, %c0_11] : memref<512x16xf32, #tpu.memory_space<vmem>>, vector<512x16xf32>
    tpu.vector_store %arg6[%c0_10, %c0_11], %13 {strides = array<i32>} : memref<512x16xf32, #tpu.memory_space<vmem>>, vector<512x16xf32>,
    return
  }
  func.func @transform_0(%arg0: i32) -> (i32, i32) {
    %c0_i32 = arith.constant 0 : i32
    %c0_i32_0 = arith.constant 0 : i32
    return %arg0, %c0_i32 : i32, i32
  }
  func.func @transform_1(%arg0: i32) -> (i32, i32) {
    %c0_i32 = arith.constant 0 : i32
    %c0_i32_0 = arith.constant 0 : i32
    %c0_i32_1 = arith.constant 0 : i32
    return %c0_i32, %c0_i32_0 : i32, i32
  }
  func.func @transform_2(%arg0: i32) -> (i32, i32) {
    %c0_i32 = arith.constant 0 : i32
    %c0_i32_0 = arith.constant 0 : i32
    %c0_i32_1 = arith.constant 0 : i32
    return %c0_i32, %c0_i32_0 : i32, i32
  }
  func.func @transform_3(%arg0: i32) -> (i32, i32) {
    %c0_i32 = arith.constant 0 : i32
    %c0_i32_0 = arith.constant 0 : i32
    %c0_i32_1 = arith.constant 0 : i32
    return %c0_i32, %c0_i32_0 : i32, i32
  }
  func.func @transform_4(%arg0: i32) -> (i32, i32) {
    %c0_i32 = arith.constant 0 : i32
    %c0_i32_0 = arith.constant 0 : i32
    return %arg0, %c0_i32 : i32, i32
  }
  func.func @transform_5(%arg0: i32) -> (i32, i32) {
    %c0_i32 = arith.constant 0 : i32
    %c0_i32_0 = arith.constant 0 : i32
    return %arg0, %c0_i32 : i32, i32
  }
}

</mosaic_0001>

<bundles_post_ra>
// kernel: bottleneck_forward.6
= control target key start
LH: loop header
LB: loop body
LE: loop exit
PB: predicated region body
PF: predicated region fallthrough
CT: control target
= control target key end

     0   :  { %vm412_vm0 = vcmask 1041408   ;;  %vm315_vm1 = vcmask 31744   ;;  %vm585_vm2 = vcmask 130048   ;;  %s1337_s3 = inlined_call_operand.vmem [shape: bf16[4,16], index: 3, kind: input, shape index: {}]   ;;  %s1338_s0 = inlined_call_operand.vmem [shape: f32[512,4], index: 0, kind: input, shape index: {}]   ;;  %s1339_s1 = inlined_call_operand.vmem [shape: f32[1,4], index: 1, kind: input, shape index: {}]   ;;  %s1340_s2 = inlined_call_operand.vmem [shape: f32[1,4], index: 2, kind: input, shape index: {}]   ;;  %s1341_s4 = inlined_call_operand.vmem [shape: f32[512,16], index: 4, kind: output, shape index: {}]  }
   0x1   :  { %v314_v0 = vld [vmem:[%s1337_s3] sm:$0x3]  ;;  %v19_v2 = vld [vmem:[%s1338_s0 + $0x8] sm:$0xff]  ;;  %v20_v31 = vld [vmem:[%s1338_s0 + $0x10] sm:$0xff] }
   0x2   :  { %v18_v1 = vld [vmem:[%s1338_s0] sm:$0xff]  ;;  %v414_v3 = vsel %vm412_vm0, %v314_v0, 0  ;;  %v35_v7 = vld [vmem:[%s1338_s0 + $0x88] sm:$0xff]  ;;  %v21_v36 = vld [vmem:[%s1338_s0 + $0x18] sm:$0xff] }
   0x3   :  { %v728_v4 = vld [vmem:[%s1339_s1] ss:$0 sm:$0xff]  ;;  %423 = vmatpush.bf16.msra.mxu0 %v414_v3  ;;  %686 = vmatpush.bf16.msra.mxu1 %v414_v3  ;;  %v51_v12 = vld [vmem:[%s1338_s0 + $0x108] sm:$0xff]  ;;  %v36_v37 = vld [vmem:[%s1338_s0 + $0x90] sm:$0xff] }
   0x4   :  { %v34_v5 = vld [vmem:[%s1338_s0 + $0x80] sm:$0xff]  ;;  %687 = vmatpush.bf16.msra.mxu2 %v414_v3  ;;  %688 = vmatpush.bf16.msra.mxu3 %v414_v3  ;;  %v86_v8 = vmul.f32 %v728_v4, %v18_v1  ;;  %v87_v9 = vmul.f32 %v728_v4, %v19_v2  ;;  %v103_v14 = vmul.f32 %v728_v4, %v35_v7  ;;  %v67_v17 = vld [vmem:[%s1338_s0 + $0x188] sm:$0xff]  ;;  %v37_v40 = vld [vmem:[%s1338_s0 + $0x98] sm:$0xff] }
   0x5   :  { %v736_v6 = vld [vmem:[%s1340_s2] ss:$0 sm:$0xff]  ;;  %v102_v10 = vmul.f32 %v728_v4, %v34_v5  ;;  %v119_v16 = vmul.f32 %v728_v4, %v51_v12  ;;  %v135_v22 = vmul.f32 %v728_v4, %v67_v17  ;;  %v52_v41 = vld [vmem:[%s1338_s0 + $0x110] sm:$0xff]  ;;  %v53_v42 = vld [vmem:[%s1338_s0 + $0x118] sm:$0xff]  ;;  %v88_v47 = vmul.f32 %v728_v4, %v20_v31 }
   0x6   :  { %v50_v11 = vld [vmem:[%s1338_s0 + $0x100] sm:$0xff]  ;;  %v154_v19 = vadd.f32 %v736_v6, %v86_v8  ;;  %v155_v20 = vadd.f32 %v736_v6, %v87_v9  ;;  %v171_v23 = vadd.f32 %v736_v6, %v103_v14  ;;  %v68_v45 = vld [vmem:[%s1338_s0 + $0x190] sm:$0xff]  ;;  %v89_v48 = vmul.f32 %v728_v4, %v21_v36  ;;  %v69_v50 = vld [vmem:[%s1338_s0 + $0x198] sm:$0xff] }
   0x7   :  { %v66_v13 = vld [vmem:[%s1338_s0 + $0x180] sm:$0xff]  ;;  %v118_v15 = vmul.f32 %v728_v4, %v50_v11  ;;  %v170_v21 = vadd.f32 %v736_v6, %v102_v10  ;;  %v187_v25 = vadd.f32 %v736_v6, %v119_v16  ;;  %v203_v30 = vadd.f32 %v736_v6, %v135_v22  ;;  %v23_v14 = vld [vmem:[%s1338_s0 + $0x28] sm:$0xff] }
   0x8   :  { %v134_v18 = vmul.f32 %v728_v4, %v66_v13  ;;  %v218_v27 = vmax.f32 %v154_v19, 0.0  ;;  %v219_v28 = vmax.f32 %v155_v20, 0.0  ;;  %v235_v32 = vmax.f32 %v171_v23, 0.0  ;;  %v22_v13 = vld [vmem:[%s1338_s0 + $0x20] sm:$0xff]  ;;  %v39_v17 = vld [vmem:[%s1338_s0 + $0xa8] sm:$0xff] }
   0x9   :  { %v186_v24 = vadd.f32 %v736_v6, %v118_v15  ;;  %v234_v29 = vmax.f32 %v170_v21, 0.0  ;;  %v251_v34 = vmax.f32 %v187_v25, 0.0  ;;  %v267_v39 = vmax.f32 %v203_v30, 0.0  ;;  %v38_v15 = vld [vmem:[%s1338_s0 + $0xa0] sm:$0xff]  ;;  %v55_v19 = vld [vmem:[%s1338_s0 + $0x128] sm:$0xff] }
   0xa   :  { %v202_v26 = vadd.f32 %v736_v6, %v134_v18  ;;  %v282_v38 = vpack.c.bf16 %v219_v28, %v218_v27  ;;  %v104_v49 = vmul.f32 %v728_v4, %v36_v37  ;;  %v105_v51 = vmul.f32 %v728_v4, %v37_v40  ;;  %v54_v18 = vld [vmem:[%s1338_s0 + $0x120] sm:$0xff]  ;;  %v71_v21 = vld [vmem:[%s1338_s0 + $0x1a8] sm:$0xff] }
   0xb   :  { %v250_v33 = vmax.f32 %v186_v24, 0.0  ;;  %v290_v43 = vpack.c.bf16 %v235_v32, %v234_v29  ;;  %v120_v52 = vmul.f32 %v728_v4, %v52_v41  ;;  %v121_v53 = vmul.f32 %v728_v4, %v53_v42  ;;  %v70_v20 = vld [vmem:[%s1338_s0 + $0x1a0] sm:$0xff] }
   0xc   :  { %v266_v35 = vmax.f32 %v202_v26, 0.0  ;;  %654 = vmatmul.msk.bf16.vlgmr.msra.gmra.mxu0 %vm315_vm1, %v282_v38  ;;  %v136_v54 = vmul.f32 %v728_v4, %v68_v45  ;;  %v137_v55 = vmul.f32 %v728_v4, %v69_v50  ;;  %v156_v56 = vadd.f32 %v736_v6, %v88_v47  ;;  %v25_v50 = vld [vmem:[%s1338_s0 + $0x38] sm:$0xff] }
   0xd   :  { %v298_v44 = vpack.c.bf16 %v251_v34, %v250_v33  ;;  %662 = vmatmul.msk.bf16.vlgmr.msra.gmra.mxu1 %vm315_vm1, %v290_v43  ;;  %v157_v57 = vadd.f32 %v736_v6, %v89_v48  ;;  %v172_v58 = vadd.f32 %v736_v6, %v104_v49  ;;  %v173_v59 = vadd.f32 %v736_v6, %v105_v51  ;;  %v24_v49 = vld [vmem:[%s1338_s0 + $0x30] sm:$0xff] }
   0xe   :  { %v306_v46 = vpack.c.bf16 %v267_v39, %v266_v35  ;;  %v188_v60 = vadd.f32 %v736_v6, %v120_v52  ;;  %v189_v61 = vadd.f32 %v736_v6, %v121_v53  ;;  %v204_v62 = vadd.f32 %v736_v6, %v136_v54  ;;  %v40_v51 = vld [vmem:[%s1338_s0 + $0xb0] sm:$0xff]  ;;  %v41_v53 = vld [vmem:[%s1338_s0 + $0xb8] sm:$0xff] }
   0xf   :  { %670 = vmatmul.msk.bf16.vlgmr.msra.gmra.mxu2 %vm315_vm1, %v298_v44  ;;  %v205_v63 = vadd.f32 %v736_v6, %v137_v55  ;;  %v220_v0 = vmax.f32 %v156_v56, 0.0  ;;  %v221_v1 = vmax.f32 %v157_v57, 0.0  ;;  %v236_v2 = vmax.f32 %v172_v58, 0.0  ;;  %v56_v54 = vld [vmem:[%s1338_s0 + $0x130] sm:$0xff]  ;;  %v57_v55 = vld [vmem:[%s1338_s0 + $0x138] sm:$0xff] }
  0x10   :  { %678 = vmatmul.msk.bf16.vlgmr.msra.gmra.mxu3 %vm315_vm1, %v306_v46  ;;  %v237_v3 = vmax.f32 %v173_v59, 0.0  ;;  %v252_v5 = vmax.f32 %v188_v60, 0.0  ;;  %v253_v7 = vmax.f32 %v189_v61, 0.0  ;;  %v268_v8 = vmax.f32 %v204_v62, 0.0  ;;  %v72_v56 = vld [vmem:[%s1338_s0 + $0x1b0] sm:$0xff]  ;;  %v73_v57 = vld [vmem:[%s1338_s0 + $0x1b8] sm:$0xff] }
  0x11   :  { %v269_v9 = vmax.f32 %v205_v63, 0.0  ;;  %v283_v10 = vpack.c.bf16 %v221_v1, %v220_v0  ;;  %v90_v22 = vmul.f32 %v728_v4, %v22_v13  ;;  %v91_v23 = vmul.f32 %v728_v4, %v23_v14 }
  0x12   :  { %v291_v11 = vpack.c.bf16 %v237_v3, %v236_v2  ;;  %v299_v12 = vpack.c.bf16 %v253_v7, %v252_v5  ;;  %v106_v24 = vmul.f32 %v728_v4, %v38_v15  ;;  %v107_v25 = vmul.f32 %v728_v4, %v39_v17 }
  0x13   :  { %v307_v16 = vpack.c.bf16 %v269_v9, %v268_v8  ;;  %v122_v26 = vmul.f32 %v728_v4, %v54_v18  ;;  %v123_v27 = vmul.f32 %v728_v4, %v55_v19  ;;  %v138_v28 = vmul.f32 %v728_v4, %v70_v20 }
  0x14   :  { %v139_v29 = vmul.f32 %v728_v4, %v71_v21  ;;  %v158_v30 = vadd.f32 %v736_v6, %v90_v22  ;;  %v159_v31 = vadd.f32 %v736_v6, %v91_v23  ;;  %v174_v32 = vadd.f32 %v736_v6, %v106_v24  ;;  %v26_v23 = vld [vmem:[%s1338_s0 + $0x40] sm:$0xff]  ;;  %v27_v24 = vld [vmem:[%s1338_s0 + $0x48] sm:$0xff] }
  0x15   :  { %v175_v33 = vadd.f32 %v736_v6, %v107_v25  ;;  %v190_v34 = vadd.f32 %v736_v6, %v122_v26  ;;  %v191_v35 = vadd.f32 %v736_v6, %v123_v27  ;;  %v206_v36 = vadd.f32 %v736_v6, %v138_v28  ;;  %v42_v25 = vld [vmem:[%s1338_s0 + $0xc0] sm:$0xff]  ;;  %v43_v27 = vld [vmem:[%s1338_s0 + $0xc8] sm:$0xff] }
  0x16   :  { %v207_v37 = vadd.f32 %v736_v6, %v139_v29  ;;  %v222_v38 = vmax.f32 %v158_v30, 0.0  ;;  %v223_v39 = vmax.f32 %v159_v31, 0.0  ;;  %v238_v40 = vmax.f32 %v174_v32, 0.0  ;;  %v58_v28 = vld [vmem:[%s1338_s0 + $0x140] sm:$0xff]  ;;  %v59_v29 = vld [vmem:[%s1338_s0 + $0x148] sm:$0xff] }
  0x17   :  { %v239_v41 = vmax.f32 %v175_v33, 0.0  ;;  %v254_v42 = vmax.f32 %v190_v34, 0.0  ;;  %v255_v43 = vmax.f32 %v191_v35, 0.0  ;;  %v270_v44 = vmax.f32 %v206_v36, 0.0  ;;  %v74_v30 = vld [vmem:[%s1338_s0 + $0x1c0] sm:$0xff]  ;;  %v75_v31 = vld [vmem:[%s1338_s0 + $0x1c8] sm:$0xff] }
  0x18   :  { %v271_v45 = vmax.f32 %v207_v37, 0.0  ;;  %v284_v46 = vpack.c.bf16 %v223_v39, %v222_v38  ;;  %v92_v58 = vmul.f32 %v728_v4, %v24_v49  ;;  %v93_v59 = vmul.f32 %v728_v4, %v25_v50 }
  0x19   :  { %v292_v47 = vpack.c.bf16 %v239_v41, %v238_v40  ;;  %v300_v48 = vpack.c.bf16 %v255_v43, %v254_v42  ;;  %v108_v60 = vmul.f32 %v728_v4, %v40_v51  ;;  %v109_v61 = vmul.f32 %v728_v4, %v41_v53 }
  0x1a   :  { %v308_v52 = vpack.c.bf16 %v271_v45, %v270_v44  ;;  %v124_v62 = vmul.f32 %v728_v4, %v56_v54  ;;  %v125_v63 = vmul.f32 %v728_v4, %v57_v55  ;;  %v140_v0 = vmul.f32 %v728_v4, %v72_v56 }
  0x1b   :  { %v141_v1 = vmul.f32 %v728_v4, %v73_v57  ;;  %v160_v2 = vadd.f32 %v736_v6, %v92_v58  ;;  %v161_v3 = vadd.f32 %v736_v6, %v93_v59  ;;  %v176_v5 = vadd.f32 %v736_v6, %v108_v60  ;;  %v28_v59 = vld [vmem:[%s1338_s0 + $0x50] sm:$0xff]  ;;  %v29_v60 = vld [vmem:[%s1338_s0 + $0x58] sm:$0xff] }
  0x1c   :  { %655 = vmatmul.msk.bf16.gmra.mxu0 %vm315_vm1, %v283_v10  ;;  %v177_v7 = vadd.f32 %v736_v6, %v109_v61  ;;  %v192_v8 = vadd.f32 %v736_v6, %v124_v62  ;;  %v193_v9 = vadd.f32 %v736_v6, %v125_v63  ;;  %v208_v10 = vadd.f32 %v736_v6, %v140_v0  ;;  %v44_v61 = vld [vmem:[%s1338_s0 + $0xd0] sm:$0xff]  ;;  %v45_v63 = vld [vmem:[%s1338_s0 + $0xd8] sm:$0xff] }
  0x1d   :  { %663 = vmatmul.msk.bf16.gmra.mxu1 %vm315_vm1, %v291_v11  ;;  %v209_v11 = vadd.f32 %v736_v6, %v141_v1  ;;  %v225_v13 = vmax.f32 %v161_v3, 0.0  ;;  %v240_v14 = vmax.f32 %v176_v5, 0.0  ;;  %v94_v32 = vmul.f32 %v728_v4, %v26_v23  ;;  %v60_v0 = vld [vmem:[%s1338_s0 + $0x150] sm:$0xff]  ;;  %v61_v1 = vld [vmem:[%s1338_s0 + $0x158] sm:$0xff] }
  0x1e   :  { %v241_v15 = vmax.f32 %v177_v7, 0.0  ;;  %v257_v17 = vmax.f32 %v193_v9, 0.0  ;;  %v272_v18 = vmax.f32 %v208_v10, 0.0  ;;  %v95_v33 = vmul.f32 %v728_v4, %v27_v24  ;;  %v77_v3 = vld [vmem:[%s1338_s0 + $0x1d8] sm:$0xff] }
  0x1f   :  { %671 = vmatmul.msk.bf16.gmra.mxu2 %vm315_vm1, %v299_v12  ;;  %v224_v12 = vmax.f32 %v160_v2, 0.0  ;;  %v273_v19 = vmax.f32 %v209_v11, 0.0  ;;  %v110_v34 = vmul.f32 %v728_v4, %v42_v25  ;;  %v111_v35 = vmul.f32 %v728_v4, %v43_v27  ;;  %v76_v2 = vld [vmem:[%s1338_s0 + $0x1d0] sm:$0xff] }
  0x20   :  { %679 = vmatmul.msk.bf16.gmra.mxu3 %vm315_vm1, %v307_v16  ;;  %v256_v16 = vmax.f32 %v192_v8, 0.0  ;;  %v293_v21 = vpack.c.bf16 %v241_v15, %v240_v14  ;;  %v126_v36 = vmul.f32 %v728_v4, %v58_v28  ;;  %v127_v37 = vmul.f32 %v728_v4, %v59_v29 }
  0x21   :  { %v285_v20 = vpack.c.bf16 %v225_v13, %v224_v12  ;;  %v309_v26 = vpack.c.bf16 %v273_v19, %v272_v18  ;;  %v142_v38 = vmul.f32 %v728_v4, %v74_v30  ;;  %v143_v39 = vmul.f32 %v728_v4, %v75_v31 }
  0x22   :  { %v301_v22 = vpack.c.bf16 %v257_v17, %v256_v16  ;;  %v162_v40 = vadd.f32 %v736_v6, %v94_v32  ;;  %v163_v41 = vadd.f32 %v736_v6, %v95_v33  ;;  %v178_v42 = vadd.f32 %v736_v6, %v110_v34  ;;  %v30_v33 = vld [vmem:[%s1338_s0 + $0x60] sm:$0xff]  ;;  %v31_v34 = vld [vmem:[%s1338_s0 + $0x68] sm:$0xff] }
  0x23   :  { %v179_v43 = vadd.f32 %v736_v6, %v111_v35  ;;  %v194_v44 = vadd.f32 %v736_v6, %v126_v36  ;;  %v195_v45 = vadd.f32 %v736_v6, %v127_v37  ;;  %v96_v5 = vmul.f32 %v728_v4, %v28_v59  ;;  %v46_v35 = vld [vmem:[%s1338_s0 + $0xe0] sm:$0xff]  ;;  %v47_v37 = vld [vmem:[%s1338_s0 + $0xe8] sm:$0xff] }
  0x24   :  { %v227_v49 = vmax.f32 %v163_v41, 0.0  ;;  %v242_v50 = vmax.f32 %v178_v42, 0.0  ;;  %v97_v7 = vmul.f32 %v728_v4, %v29_v60  ;;  %v112_v8 = vmul.f32 %v728_v4, %v44_v61  ;;  %v79_v41 = vld [vmem:[%s1338_s0 + $0x1e8] sm:$0xff] }
  0x25   :  { %v243_v51 = vmax.f32 %v179_v43, 0.0  ;;  %v259_v53 = vmax.f32 %v195_v45, 0.0  ;;  %v113_v9 = vmul.f32 %v728_v4, %v45_v63  ;;  %v128_v10 = vmul.f32 %v728_v4, %v60_v0 }
  0x26   :  { %v129_v11 = vmul.f32 %v728_v4, %v61_v1  ;;  %v144_v12 = vmul.f32 %v728_v4, %v76_v2  ;;  %v145_v13 = vmul.f32 %v728_v4, %v77_v3  ;;  %v164_v14 = vadd.f32 %v736_v6, %v96_v5 }
  0x27   :  { %v294_v57 = vpack.c.bf16 %v243_v51, %v242_v50  ;;  %v165_v15 = vadd.f32 %v736_v6, %v97_v7  ;;  %v180_v16 = vadd.f32 %v736_v6, %v112_v8  ;;  %v181_v17 = vadd.f32 %v736_v6, %v113_v9  ;;  %v32_v7 = vld [vmem:[%s1338_s0 + $0x70] sm:$0xff]  ;;  %v33_v8 = vld [vmem:[%s1338_s0 + $0x78] sm:$0xff] }
  0x28   :  { %v196_v18 = vadd.f32 %v736_v6, %v128_v10  ;;  %v197_v19 = vadd.f32 %v736_v6, %v129_v11  ;;  %v98_v42 = vmul.f32 %v728_v4, %v30_v33  ;;  %v99_v43 = vmul.f32 %v728_v4, %v31_v34  ;;  %v48_v9 = vld [vmem:[%s1338_s0 + $0xf0] sm:$0xff]  ;;  %v49_v11 = vld [vmem:[%s1338_s0 + $0xf8] sm:$0xff] }
  0x29   :  { %v229_v23 = vmax.f32 %v165_v15, 0.0  ;;  %v244_v24 = vmax.f32 %v180_v16, 0.0  ;;  %v245_v25 = vmax.f32 %v181_v17, 0.0  ;;  %v115_v45 = vmul.f32 %v728_v4, %v47_v37  ;;  %v81_v15 = vld [vmem:[%s1338_s0 + $0x1f8] sm:$0xff] }
  0x2a   :  { %v261_v27 = vmax.f32 %v197_v19, 0.0  ;;  %v166_v50 = vadd.f32 %v736_v6, %v98_v42  ;;  %v167_v51 = vadd.f32 %v736_v6, %v99_v43  ;;  %v100_v16 = vmul.f32 %v728_v4, %v32_v7 }
  0x2b   :  { %v295_v31 = vpack.c.bf16 %v245_v25, %v244_v24  ;;  %v101_v17 = vmul.f32 %v728_v4, %v33_v8  ;;  %v117_v19 = vmul.f32 %v728_v4, %v49_v11 }
  0x2c   :  { %656 = vmatmul.msk.bf16.gmra.mxu0 %vm315_vm1, %v284_v46  ;;  %v210_v46 = vadd.f32 %v736_v6, %v142_v38  ;;  %v62_v38 = vld [vmem:[%s1338_s0 + $0x160] sm:$0xff]  ;;  %v231_v59 = vmax.f32 %v167_v51, 0.0  ;;  %v168_v24 = vadd.f32 %v736_v6, %v100_v16 }
  0x2d   :  { %664 = vmatmul.msk.bf16.gmra.mxu1 %vm315_vm1, %v292_v47  ;;  %v211_v47 = vadd.f32 %v736_v6, %v143_v39  ;;  %v63_v39 = vld [vmem:[%s1338_s0 + $0x168] sm:$0xff]  ;;  %v169_v25 = vadd.f32 %v736_v6, %v101_v17 }
  0x2e   :  { %v274_v54 = vmax.f32 %v210_v46, 0.0  ;;  %v130_v46 = vmul.f32 %v728_v4, %v62_v38 }
  0x2f   :  { %672 = vmatmul.msk.bf16.gmra.mxu2 %vm315_vm1, %v300_v48  ;;  %v226_v48 = vmax.f32 %v162_v40, 0.0  ;;  %v275_v55 = vmax.f32 %v211_v47, 0.0  ;;  %v78_v40 = vld [vmem:[%s1338_s0 + $0x1e0] sm:$0xff]  ;;  %v131_v47 = vmul.f32 %v728_v4, %v63_v39  ;;  %v233_v33 = vmax.f32 %v169_v25, 0.0 }
  0x30   :  { %680 = vmatmul.msk.bf16.gmra.mxu3 %vm315_vm1, %v308_v52  ;;  %v258_v52 = vmax.f32 %v194_v44, 0.0  ;;  %v114_v44 = vmul.f32 %v728_v4, %v46_v35 }
  0x31   :  { %v286_v56 = vpack.c.bf16 %v227_v49, %v226_v48  ;;  %v310_v62 = vpack.c.bf16 %v275_v55, %v274_v54  ;;  %v146_v48 = vmul.f32 %v728_v4, %v78_v40  ;;  %v147_v49 = vmul.f32 %v728_v4, %v79_v41 }
  0x32   :  { %v302_v58 = vpack.c.bf16 %v259_v53, %v258_v52  ;;  %v182_v52 = vadd.f32 %v736_v6, %v114_v44  ;;  %v183_v53 = vadd.f32 %v736_v6, %v115_v45  ;;  %v198_v54 = vadd.f32 %v736_v6, %v130_v46 }
  0x33   :  { %v199_v55 = vadd.f32 %v736_v6, %v131_v47 }
  0x34   :  { %v246_v60 = vmax.f32 %v182_v52, 0.0  ;;  %v247_v61 = vmax.f32 %v183_v53, 0.0 }
  0x35   :  { %v263_v63 = vmax.f32 %v199_v55, 0.0 }
  0x36   :  { %v296_v3 = vpack.c.bf16 %v247_v61, %v246_v60 }
  0x3c   :  { %657 = vmatmul.msk.bf16.gmra.mxu0 %vm315_vm1, %v285_v20  ;;  %v212_v20 = vadd.f32 %v736_v6, %v144_v12  ;;  %v64_v12 = vld [vmem:[%s1338_s0 + $0x170] sm:$0xff] }
  0x3d   :  { %665 = vmatmul.msk.bf16.gmra.mxu1 %vm315_vm1, %v293_v21  ;;  %v213_v21 = vadd.f32 %v736_v6, %v145_v13  ;;  %v65_v13 = vld [vmem:[%s1338_s0 + $0x178] sm:$0xff] }
  0x3e   :  { %v276_v28 = vmax.f32 %v212_v20, 0.0  ;;  %v132_v20 = vmul.f32 %v728_v4, %v64_v12 }
  0x3f   :  { %673 = vmatmul.msk.bf16.gmra.mxu2 %vm315_vm1, %v301_v22  ;;  %v228_v22 = vmax.f32 %v164_v14, 0.0  ;;  %v277_v29 = vmax.f32 %v213_v21, 0.0  ;;  %v80_v14 = vld [vmem:[%s1338_s0 + $0x1f0] sm:$0xff]  ;;  %v133_v21 = vmul.f32 %v728_v4, %v65_v13 }
  0x40   :  { %681 = vmatmul.msk.bf16.gmra.mxu3 %vm315_vm1, %v309_v26  ;;  %v260_v26 = vmax.f32 %v196_v18, 0.0  ;;  %v116_v18 = vmul.f32 %v728_v4, %v48_v9 }
  0x41   :  { %v287_v30 = vpack.c.bf16 %v229_v23, %v228_v22  ;;  %v311_v36 = vpack.c.bf16 %v277_v29, %v276_v28  ;;  %v148_v22 = vmul.f32 %v728_v4, %v80_v14  ;;  %v149_v23 = vmul.f32 %v728_v4, %v81_v15 }
  0x42   :  { %v303_v32 = vpack.c.bf16 %v261_v27, %v260_v26  ;;  %v184_v26 = vadd.f32 %v736_v6, %v116_v18  ;;  %v185_v27 = vadd.f32 %v736_v6, %v117_v19  ;;  %v200_v28 = vadd.f32 %v736_v6, %v132_v20 }
  0x43   :  { %v201_v29 = vadd.f32 %v736_v6, %v133_v21 }
  0x44   :  { %v248_v34 = vmax.f32 %v184_v26, 0.0  ;;  %v249_v4 = vmax.f32 %v185_v27, 0.0  ;;  %v264_v35 = vmax.f32 %v200_v28, 0.0 }
  0x46   :  { %v297_v40 = vpack.c.bf16 %v249_v4, %v248_v34 }
  0x4c   :  { %658 = vmatmul.msk.bf16.gmra.mxu0 %vm315_vm1, %v286_v56  ;;  %v214_v56 = vadd.f32 %v736_v6, %v146_v48 }
  0x4d   :  { %666 = vmatmul.msk.bf16.gmra.mxu1 %vm315_vm1, %v294_v57  ;;  %v215_v57 = vadd.f32 %v736_v6, %v147_v49 }
  0x4e   :  { %v278_v0 = vmax.f32 %v214_v56, 0.0 }
  0x4f   :  { %674 = vmatmul.msk.bf16.gmra.mxu2 %vm315_vm1, %v302_v58  ;;  %v230_v58 = vmax.f32 %v166_v50, 0.0  ;;  %v279_v1 = vmax.f32 %v215_v57, 0.0 }
  0x50   :  { %682 = vmatmul.msk.bf16.gmra.mxu3 %vm315_vm1, %v310_v62  ;;  %v262_v62 = vmax.f32 %v198_v54, 0.0 }
  0x51   :  { %v288_v2 = vpack.c.bf16 %v231_v59, %v230_v58  ;;  %v312_v10 = vpack.c.bf16 %v279_v1, %v278_v0 }
  0x52   :  { %v304_v5 = vpack.c.bf16 %v263_v63, %v262_v62 }
  0x5c   :  { %659 = vmatmul.msk.bf16.gmra.mxu0 %vm315_vm1, %v287_v30  ;;  %v216_v30 = vadd.f32 %v736_v6, %v148_v22 }
  0x5d   :  { %667 = vmatmul.msk.bf16.gmra.mxu1 %vm315_vm1, %v295_v31  ;;  %v217_v31 = vadd.f32 %v736_v6, %v149_v23 }
  0x5e   :  { %v280_v37 = vmax.f32 %v216_v30, 0.0 }
  0x5f   :  { %675 = vmatmul.msk.bf16.gmra.mxu2 %vm315_vm1, %v303_v32  ;;  %v232_v32 = vmax.f32 %v168_v24, 0.0  ;;  %v281_v38 = vmax.f32 %v217_v31, 0.0 }
  0x60   :  { %683 = vmatmul.msk.bf16.gmra.mxu3 %vm315_vm1, %v311_v36  ;;  %v265_v36 = vmax.f32 %v201_v29, 0.0 }
  0x61   :  { %v289_v39 = vpack.c.bf16 %v233_v33, %v232_v32  ;;  %v313_v42 = vpack.c.bf16 %v281_v38, %v280_v37 }
  0x62   :  { %v305_v41 = vpack.c.bf16 %v265_v36, %v264_v35 }
  0x6c   :  { %660 = vmatmul.msk.bf16.gmra.mxu0 %vm315_vm1, %v288_v2 }
  0x6d   :  { %668 = vmatmul.msk.bf16.gmra.mxu1 %vm315_vm1, %v296_v3 }
  0x6f   :  { %676 = vmatmul.msk.bf16.gmra.mxu2 %vm315_vm1, %v304_v5 }
  0x70   :  { %684 = vmatmul.msk.bf16.gmra.mxu3 %vm315_vm1, %v312_v10 }
  0x7c   :  { %661 = vmatmul.msk.bf16.gmra.mxu0 %vm315_vm1, %v289_v39 }
  0x7d   :  { %669 = vmatmul.msk.bf16.gmra.mxu1 %vm315_vm1, %v297_v40 }
  0x7f   :  { %677 = vmatmul.msk.bf16.gmra.mxu2 %vm315_vm1, %v305_v41 }
  0x80   :  { %685 = vmatmul.msk.bf16.gmra.mxu3 %vm315_vm1, %v313_v42 }
  0x89   :  { %v425_v6 = vpop.f32.mrf.mxu0 }
  0x8a   :  { %586 = vst.msk [vmem:[%s1341_s4] sm:$0xff] %vm585_vm2, %v425_v6  ;;  %v465_v43 = vpop.f32.mrf.mxu1 }
  0x8b   :  { %602 = vst.msk [vmem:[%s1341_s4 + $0x80] sm:$0xff] %vm585_vm2, %v465_v43 }
  0x91   :  { %v427_v46 = vpop.f32.mrf.mxu0 }
  0x92   :  { %v505_v44 = vpop.f32.mrf.mxu2  ;;  %v467_v47 = vpop.f32.mrf.mxu1  ;;  %587 = vst.msk [vmem:[%s1341_s4 + $0x8] sm:$0xff] %vm585_vm2, %v427_v46 }
  0x93   :  { %618 = vst.msk [vmem:[%s1341_s4 + $0x100] sm:$0xff] %vm585_vm2, %v505_v44  ;;  %v545_v45 = vpop.f32.mrf.mxu3 }
  0x94   :  { %634 = vst.msk [vmem:[%s1341_s4 + $0x180] sm:$0xff] %vm585_vm2, %v545_v45 }
  0x95   :  { %603 = vst.msk [vmem:[%s1341_s4 + $0x88] sm:$0xff] %vm585_vm2, %v467_v47 }
  0x99   :  { %v430_v50 = vpop.f32.mrf.mxu0 }
  0x9a   :  { %v507_v48 = vpop.f32.mrf.mxu2  ;;  %v470_v51 = vpop.f32.mrf.mxu1  ;;  %588 = vst.msk [vmem:[%s1341_s4 + $0x10] sm:$0xff] %vm585_vm2, %v430_v50 }
  0x9b   :  { %619 = vst.msk [vmem:[%s1341_s4 + $0x108] sm:$0xff] %vm585_vm2, %v507_v48  ;;  %v547_v49 = vpop.f32.mrf.mxu3 }
  0x9c   :  { %635 = vst.msk [vmem:[%s1341_s4 + $0x188] sm:$0xff] %vm585_vm2, %v547_v49 }
  0x9d   :  { %604 = vst.msk [vmem:[%s1341_s4 + $0x90] sm:$0xff] %vm585_vm2, %v470_v51 }
  0xa1   :  { %v432_v54 = vpop.f32.mrf.mxu0 }
  0xa2   :  { %v510_v52 = vpop.f32.mrf.mxu2  ;;  %v472_v55 = vpop.f32.mrf.mxu1  ;;  %589 = vst.msk [vmem:[%s1341_s4 + $0x18] sm:$0xff] %vm585_vm2, %v432_v54 }
  0xa3   :  { %620 = vst.msk [vmem:[%s1341_s4 + $0x110] sm:$0xff] %vm585_vm2, %v510_v52  ;;  %v550_v53 = vpop.f32.mrf.mxu3 }
  0xa4   :  { %636 = vst.msk [vmem:[%s1341_s4 + $0x190] sm:$0xff] %vm585_vm2, %v550_v53 }
  0xa5   :  { %605 = vst.msk [vmem:[%s1341_s4 + $0x98] sm:$0xff] %vm585_vm2, %v472_v55 }
  0xa9   :  { %v435_v58 = vpop.f32.mrf.mxu0 }
  0xaa   :  { %v512_v56 = vpop.f32.mrf.mxu2  ;;  %v475_v59 = vpop.f32.mrf.mxu1  ;;  %590 = vst.msk [vmem:[%s1341_s4 + $0x20] sm:$0xff] %vm585_vm2, %v435_v58 }
  0xab   :  { %621 = vst.msk [vmem:[%s1341_s4 + $0x118] sm:$0xff] %vm585_vm2, %v512_v56  ;;  %v552_v57 = vpop.f32.mrf.mxu3 }
  0xac   :  { %637 = vst.msk [vmem:[%s1341_s4 + $0x198] sm:$0xff] %vm585_vm2, %v552_v57 }
  0xad   :  { %606 = vst.msk [vmem:[%s1341_s4 + $0xa0] sm:$0xff] %vm585_vm2, %v475_v59 }
  0xb1   :  { %v437_v62 = vpop.f32.mrf.mxu0 }
  0xb2   :  { %v515_v60 = vpop.f32.mrf.mxu2  ;;  %v477_v63 = vpop.f32.mrf.mxu1  ;;  %591 = vst.msk [vmem:[%s1341_s4 + $0x28] sm:$0xff] %vm585_vm2, %v437_v62 }
  0xb3   :  { %622 = vst.msk [vmem:[%s1341_s4 + $0x120] sm:$0xff] %vm585_vm2, %v515_v60  ;;  %v555_v61 = vpop.f32.mrf.mxu3 }
  0xb4   :  { %638 = vst.msk [vmem:[%s1341_s4 + $0x1a0] sm:$0xff] %vm585_vm2, %v555_v61 }
  0xb5   :  { %607 = vst.msk [vmem:[%s1341_s4 + $0xa8] sm:$0xff] %vm585_vm2, %v477_v63 }
  0xb9   :  { %v440_v2 = vpop.f32.mrf.mxu0 }
  0xba   :  { %v517_v0 = vpop.f32.mrf.mxu2  ;;  %v480_v3 = vpop.f32.mrf.mxu1  ;;  %592 = vst.msk [vmem:[%s1341_s4 + $0x30] sm:$0xff] %vm585_vm2, %v440_v2 }
  0xbb   :  { %623 = vst.msk [vmem:[%s1341_s4 + $0x128] sm:$0xff] %vm585_vm2, %v517_v0  ;;  %v557_v1 = vpop.f32.mrf.mxu3 }
  0xbc   :  { %639 = vst.msk [vmem:[%s1341_s4 + $0x1a8] sm:$0xff] %vm585_vm2, %v557_v1 }
  0xbd   :  { %608 = vst.msk [vmem:[%s1341_s4 + $0xb0] sm:$0xff] %vm585_vm2, %v480_v3 }
  0xc1   :  { %v442_v8 = vpop.f32.mrf.mxu0 }
  0xc2   :  { %v520_v5 = vpop.f32.mrf.mxu2  ;;  %v482_v9 = vpop.f32.mrf.mxu1  ;;  %593 = vst.msk [vmem:[%s1341_s4 + $0x38] sm:$0xff] %vm585_vm2, %v442_v8 }
  0xc3   :  { %624 = vst.msk [vmem:[%s1341_s4 + $0x130] sm:$0xff] %vm585_vm2, %v520_v5  ;;  %v560_v7 = vpop.f32.mrf.mxu3 }
  0xc4   :  { %640 = vst.msk [vmem:[%s1341_s4 + $0x1b0] sm:$0xff] %vm585_vm2, %v560_v7 }
  0xc5   :  { %609 = vst.msk [vmem:[%s1341_s4 + $0xb8] sm:$0xff] %vm585_vm2, %v482_v9 }
  0xc9   :  { %v445_v12 = vpop.f32.mrf.mxu0 }
  0xca   :  { %v522_v10 = vpop.f32.mrf.mxu2  ;;  %v485_v13 = vpop.f32.mrf.mxu1  ;;  %594 = vst.msk [vmem:[%s1341_s4 + $0x40] sm:$0xff] %vm585_vm2, %v445_v12 }
  0xcb   :  { %625 = vst.msk [vmem:[%s1341_s4 + $0x138] sm:$0xff] %vm585_vm2, %v522_v10  ;;  %v562_v11 = vpop.f32.mrf.mxu3 }
  0xcc   :  { %641 = vst.msk [vmem:[%s1341_s4 + $0x1b8] sm:$0xff] %vm585_vm2, %v562_v11 }
  0xcd   :  { %610 = vst.msk [vmem:[%s1341_s4 + $0xc0] sm:$0xff] %vm585_vm2, %v485_v13 }
  0xd1   :  { %v447_v16 = vpop.f32.mrf.mxu0 }
  0xd2   :  { %v525_v14 = vpop.f32.mrf.mxu2  ;;  %v487_v17 = vpop.f32.mrf.mxu1  ;;  %595 = vst.msk [vmem:[%s1341_s4 + $0x48] sm:$0xff] %vm585_vm2, %v447_v16 }
  0xd3   :  { %626 = vst.msk [vmem:[%s1341_s4 + $0x140] sm:$0xff] %vm585_vm2, %v525_v14  ;;  %v565_v15 = vpop.f32.mrf.mxu3 }
  0xd4   :  { %642 = vst.msk [vmem:[%s1341_s4 + $0x1c0] sm:$0xff] %vm585_vm2, %v565_v15 }
  0xd5   :  { %611 = vst.msk [vmem:[%s1341_s4 + $0xc8] sm:$0xff] %vm585_vm2, %v487_v17 }
  0xd9   :  { %v450_v20 = vpop.f32.mrf.mxu0 }
  0xda   :  { %v527_v18 = vpop.f32.mrf.mxu2  ;;  %v490_v21 = vpop.f32.mrf.mxu1  ;;  %596 = vst.msk [vmem:[%s1341_s4 + $0x50] sm:$0xff] %vm585_vm2, %v450_v20 }
  0xdb   :  { %627 = vst.msk [vmem:[%s1341_s4 + $0x148] sm:$0xff] %vm585_vm2, %v527_v18  ;;  %v567_v19 = vpop.f32.mrf.mxu3 }
  0xdc   :  { %643 = vst.msk [vmem:[%s1341_s4 + $0x1c8] sm:$0xff] %vm585_vm2, %v567_v19 }
  0xdd   :  { %612 = vst.msk [vmem:[%s1341_s4 + $0xd0] sm:$0xff] %vm585_vm2, %v490_v21 }
  0xe1   :  { %v452_v24 = vpop.f32.mrf.mxu0 }
  0xe2   :  { %v530_v22 = vpop.f32.mrf.mxu2  ;;  %v492_v25 = vpop.f32.mrf.mxu1  ;;  %597 = vst.msk [vmem:[%s1341_s4 + $0x58] sm:$0xff] %vm585_vm2, %v452_v24 }
  0xe3   :  { %628 = vst.msk [vmem:[%s1341_s4 + $0x150] sm:$0xff] %vm585_vm2, %v530_v22  ;;  %v570_v23 = vpop.f32.mrf.mxu3 }
  0xe4   :  { %644 = vst.msk [vmem:[%s1341_s4 + $0x1d0] sm:$0xff] %vm585_vm2, %v570_v23 }
  0xe5   :  { %613 = vst.msk [vmem:[%s1341_s4 + $0xd8] sm:$0xff] %vm585_vm2, %v492_v25 }
  0xe9   :  { %v455_v28 = vpop.f32.mrf.mxu0 }
  0xea   :  { %v532_v26 = vpop.f32.mrf.mxu2  ;;  %v495_v29 = vpop.f32.mrf.mxu1  ;;  %598 = vst.msk [vmem:[%s1341_s4 + $0x60] sm:$0xff] %vm585_vm2, %v455_v28 }
  0xeb   :  { %629 = vst.msk [vmem:[%s1341_s4 + $0x158] sm:$0xff] %vm585_vm2, %v532_v26  ;;  %v572_v27 = vpop.f32.mrf.mxu3 }
  0xec   :  { %645 = vst.msk [vmem:[%s1341_s4 + $0x1d8] sm:$0xff] %vm585_vm2, %v572_v27 }
  0xed   :  { %614 = vst.msk [vmem:[%s1341_s4 + $0xe0] sm:$0xff] %vm585_vm2, %v495_v29 }
  0xf1   :  { %v457_v32 = vpop.f32.mrf.mxu0 }
  0xf2   :  { %v535_v30 = vpop.f32.mrf.mxu2  ;;  %v497_v33 = vpop.f32.mrf.mxu1  ;;  %599 = vst.msk [vmem:[%s1341_s4 + $0x68] sm:$0xff] %vm585_vm2, %v457_v32 }
  0xf3   :  { %630 = vst.msk [vmem:[%s1341_s4 + $0x160] sm:$0xff] %vm585_vm2, %v535_v30  ;;  %v575_v31 = vpop.f32.mrf.mxu3 }
  0xf4   :  { %646 = vst.msk [vmem:[%s1341_s4 + $0x1e0] sm:$0xff] %vm585_vm2, %v575_v31 }
  0xf5   :  { %615 = vst.msk [vmem:[%s1341_s4 + $0xe8] sm:$0xff] %vm585_vm2, %v497_v33 }
  0xf9   :  { %v460_v35 = vpop.f32.mrf.mxu0 }
  0xfa   :  { %v537_v34 = vpop.f32.mrf.mxu2  ;;  %v500_v36 = vpop.f32.mrf.mxu1  ;;  %600 = vst.msk [vmem:[%s1341_s4 + $0x70] sm:$0xff] %vm585_vm2, %v460_v35 }
  0xfb   :  { %631 = vst.msk [vmem:[%s1341_s4 + $0x168] sm:$0xff] %vm585_vm2, %v537_v34  ;;  %v577_v4 = vpop.f32.mrf.mxu3 }
  0xfc   :  { %647 = vst.msk [vmem:[%s1341_s4 + $0x1e8] sm:$0xff] %vm585_vm2, %v577_v4 }
  0xfd   :  { %616 = vst.msk [vmem:[%s1341_s4 + $0xf0] sm:$0xff] %vm585_vm2, %v500_v36 }
 0x101   :  { %v462_v39 = vpop.f32.mrf.mxu0 }
 0x102   :  { %v540_v37 = vpop.f32.mrf.mxu2  ;;  %v502_v40 = vpop.f32.mrf.mxu1  ;;  %601 = vst.msk [vmem:[%s1341_s4 + $0x78] sm:$0xff] %vm585_vm2, %v462_v39 }
 0x103   :  { %632 = vst.msk [vmem:[%s1341_s4 + $0x170] sm:$0xff] %vm585_vm2, %v540_v37  ;;  %v580_v38 = vpop.f32.mrf.mxu3 }
 0x104   :  { %648 = vst.msk [vmem:[%s1341_s4 + $0x1f0] sm:$0xff] %vm585_vm2, %v580_v38 }
 0x105   :  { %617 = vst.msk [vmem:[%s1341_s4 + $0xf8] sm:$0xff] %vm585_vm2, %v502_v40 }
 0x10a   :  { %v542_v41 = vpop.f32.mrf.mxu2 }
 0x10b   :  { %633 = vst.msk [vmem:[%s1341_s4 + $0x178] sm:$0xff] %vm585_vm2, %v542_v41  ;;  %v582_v42 = vpop.f32.mrf.mxu3 }
 0x10c   :  { %649 = vst.msk [vmem:[%s1341_s4 + $0x1f8] sm:$0xff] %vm585_vm2, %v582_v42 }

// kernel: bottleneck_forward.4
= control target key start
LH: loop header
LB: loop body
LE: loop exit
PB: predicated region body
PF: predicated region fallthrough
CT: control target
= control target key end

     0   :  { %vm412_vm0 = vcmask 1041408   ;;  %vm315_vm1 = vcmask 31744   ;;  %s1336_s3 = inlined_call_operand.vmem [shape: bf16[4,4], index: 3, kind: input, shape index: {}]   ;;  %s1337_s0 = inlined_call_operand.vmem [shape: f32[512,4], index: 0, kind: input, shape index: {}]   ;;  %s1338_s1 = inlined_call_operand.vmem [shape: f32[1,4], index: 1, kind: input, shape index: {}]   ;;  %s1339_s2 = inlined_call_operand.vmem [shape: f32[1,4], index: 2, kind: input, shape index: {}]   ;;  %s1340_s4 = inlined_call_operand.vmem [shape: f32[512,4], index: 4, kind: output, shape index: {}]  }
   0x1   :  { %v314_v0 = vld [vmem:[%s1336_s3] sm:$0x3]  ;;  %v19_v2 = vld [vmem:[%s1337_s0 + $0x8] sm:$0xff]  ;;  %v20_v31 = vld [vmem:[%s1337_s0 + $0x10] sm:$0xff] }
   0x2   :  { %v18_v1 = vld [vmem:[%s1337_s0] sm:$0xff]  ;;  %v414_v3 = vsel %vm412_vm0, %v314_v0, 0  ;;  %v35_v7 = vld [vmem:[%s1337_s0 + $0x88] sm:$0xff]  ;;  %v21_v36 = vld [vmem:[%s1337_s0 + $0x18] sm:$0xff] }
   0x3   :  { %v727_v4 = vld [vmem:[%s1338_s1] ss:$0 sm:$0xff]  ;;  %423 = vmatpush.bf16.msra.mxu0 %v414_v3  ;;  %685 = vmatpush.bf16.msra.mxu1 %v414_v3  ;;  %v51_v12 = vld [vmem:[%s1337_s0 + $0x108] sm:$0xff]  ;;  %v36_v37 = vld [vmem:[%s1337_s0 + $0x90] sm:$0xff] }
   0x4   :  { %v34_v5 = vld [vmem:[%s1337_s0 + $0x80] sm:$0xff]  ;;  %686 = vmatpush.bf16.msra.mxu2 %v414_v3  ;;  %687 = vmatpush.bf16.msra.mxu3 %v414_v3  ;;  %v86_v8 = vmul.f32 %v727_v4, %v18_v1  ;;  %v87_v9 = vmul.f32 %v727_v4, %v19_v2  ;;  %v103_v14 = vmul.f32 %v727_v4, %v35_v7  ;;  %v67_v17 = vld [vmem:[%s1337_s0 + $0x188] sm:$0xff]  ;;  %v37_v40 = vld [vmem:[%s1337_s0 + $0x98] sm:$0xff] }
   0x5   :  { %v735_v6 = vld [vmem:[%s1339_s2] ss:$0 sm:$0xff]  ;;  %v102_v10 = vmul.f32 %v727_v4, %v34_v5  ;;  %v119_v16 = vmul.f32 %v727_v4, %v51_v12  ;;  %v135_v22 = vmul.f32 %v727_v4, %v67_v17  ;;  %v52_v41 = vld [vmem:[%s1337_s0 + $0x110] sm:$0xff]  ;;  %v53_v42 = vld [vmem:[%s1337_s0 + $0x118] sm:$0xff]  ;;  %v88_v47 = vmul.f32 %v727_v4, %v20_v31 }
   0x6   :  { %v50_v11 = vld [vmem:[%s1337_s0 + $0x100] sm:$0xff]  ;;  %v154_v19 = vadd.f32 %v735_v6, %v86_v8  ;;  %v155_v20 = vadd.f32 %v735_v6, %v87_v9  ;;  %v171_v23 = vadd.f32 %v735_v6, %v103_v14  ;;  %v68_v45 = vld [vmem:[%s1337_s0 + $0x190] sm:$0xff]  ;;  %v89_v48 = vmul.f32 %v727_v4, %v21_v36  ;;  %v69_v50 = vld [vmem:[%s1337_s0 + $0x198] sm:$0xff] }
   0x7   :  { %v66_v13 = vld [vmem:[%s1337_s0 + $0x180] sm:$0xff]  ;;  %v118_v15 = vmul.f32 %v727_v4, %v50_v11  ;;  %v170_v21 = vadd.f32 %v735_v6, %v102_v10  ;;  %v187_v25 = vadd.f32 %v735_v6, %v119_v16  ;;  %v203_v30 = vadd.f32 %v735_v6, %v135_v22  ;;  %v23_v14 = vld [vmem:[%s1337_s0 + $0x28] sm:$0xff] }
   0x8   :  { %v134_v18 = vmul.f32 %v727_v4, %v66_v13  ;;  %v218_v27 = vmax.f32 %v154_v19, 0.0  ;;  %v219_v28 = vmax.f32 %v155_v20, 0.0  ;;  %v235_v32 = vmax.f32 %v171_v23, 0.0  ;;  %v22_v13 = vld [vmem:[%s1337_s0 + $0x20] sm:$0xff]  ;;  %v39_v17 = vld [vmem:[%s1337_s0 + $0xa8] sm:$0xff] }
   0x9   :  { %v186_v24 = vadd.f32 %v735_v6, %v118_v15  ;;  %v234_v29 = vmax.f32 %v170_v21, 0.0  ;;  %v251_v34 = vmax.f32 %v187_v25, 0.0  ;;  %v267_v39 = vmax.f32 %v203_v30, 0.0  ;;  %v38_v15 = vld [vmem:[%s1337_s0 + $0xa0] sm:$0xff]  ;;  %v55_v19 = vld [vmem:[%s1337_s0 + $0x128] sm:$0xff] }
   0xa   :  { %v202_v26 = vadd.f32 %v735_v6, %v134_v18  ;;  %v282_v38 = vpack.c.bf16 %v219_v28, %v218_v27  ;;  %v104_v49 = vmul.f32 %v727_v4, %v36_v37  ;;  %v105_v51 = vmul.f32 %v727_v4, %v37_v40  ;;  %v54_v18 = vld [vmem:[%s1337_s0 + $0x120] sm:$0xff]  ;;  %v71_v21 = vld [vmem:[%s1337_s0 + $0x1a8] sm:$0xff] }
   0xb   :  { %v250_v33 = vmax.f32 %v186_v24, 0.0  ;;  %v290_v43 = vpack.c.bf16 %v235_v32, %v234_v29  ;;  %v120_v52 = vmul.f32 %v727_v4, %v52_v41  ;;  %v121_v53 = vmul.f32 %v727_v4, %v53_v42  ;;  %v70_v20 = vld [vmem:[%s1337_s0 + $0x1a0] sm:$0xff] }
   0xc   :  { %v266_v35 = vmax.f32 %v202_v26, 0.0  ;;  %653 = vmatmul.msk.bf16.vlgmr.msra.gmra.mxu0 %vm315_vm1, %v282_v38  ;;  %v136_v54 = vmul.f32 %v727_v4, %v68_v45  ;;  %v137_v55 = vmul.f32 %v727_v4, %v69_v50  ;;  %v156_v56 = vadd.f32 %v735_v6, %v88_v47  ;;  %v25_v50 = vld [vmem:[%s1337_s0 + $0x38] sm:$0xff] }
   0xd   :  { %v298_v44 = vpack.c.bf16 %v251_v34, %v250_v33  ;;  %661 = vmatmul.msk.bf16.vlgmr.msra.gmra.mxu1 %vm315_vm1, %v290_v43  ;;  %v157_v57 = vadd.f32 %v735_v6, %v89_v48  ;;  %v172_v58 = vadd.f32 %v735_v6, %v104_v49  ;;  %v173_v59 = vadd.f32 %v735_v6, %v105_v51  ;;  %v24_v49 = vld [vmem:[%s1337_s0 + $0x30] sm:$0xff] }
   0xe   :  { %v306_v46 = vpack.c.bf16 %v267_v39, %v266_v35  ;;  %v188_v60 = vadd.f32 %v735_v6, %v120_v52  ;;  %v189_v61 = vadd.f32 %v735_v6, %v121_v53  ;;  %v204_v62 = vadd.f32 %v735_v6, %v136_v54  ;;  %v40_v51 = vld [vmem:[%s1337_s0 + $0xb0] sm:$0xff]  ;;  %v41_v53 = vld [vmem:[%s1337_s0 + $0xb8] sm:$0xff] }
   0xf   :  { %669 = vmatmul.msk.bf16.vlgmr.msra.gmra.mxu2 %vm315_vm1, %v298_v44  ;;  %v205_v63 = vadd.f32 %v735_v6, %v137_v55  ;;  %v220_v0 = vmax.f32 %v156_v56, 0.0  ;;  %v221_v1 = vmax.f32 %v157_v57, 0.0  ;;  %v236_v2 = vmax.f32 %v172_v58, 0.0  ;;  %v56_v54 = vld [vmem:[%s1337_s0 + $0x130] sm:$0xff]  ;;  %v57_v55 = vld [vmem:[%s1337_s0 + $0x138] sm:$0xff] }
  0x10   :  { %677 = vmatmul.msk.bf16.vlgmr.msra.gmra.mxu3 %vm315_vm1, %v306_v46  ;;  %v237_v3 = vmax.f32 %v173_v59, 0.0  ;;  %v252_v5 = vmax.f32 %v188_v60, 0.0  ;;  %v253_v7 = vmax.f32 %v189_v61, 0.0  ;;  %v268_v8 = vmax.f32 %v204_v62, 0.0  ;;  %v72_v56 = vld [vmem:[%s1337_s0 + $0x1b0] sm:$0xff]  ;;  %v73_v57 = vld [vmem:[%s1337_s0 + $0x1b8] sm:$0xff] }
  0x11   :  { %v269_v9 = vmax.f32 %v205_v63, 0.0  ;;  %v283_v10 = vpack.c.bf16 %v221_v1, %v220_v0  ;;  %v90_v22 = vmul.f32 %v727_v4, %v22_v13  ;;  %v91_v23 = vmul.f32 %v727_v4, %v23_v14 }
  0x12   :  { %v291_v11 = vpack.c.bf16 %v237_v3, %v236_v2  ;;  %v299_v12 = vpack.c.bf16 %v253_v7, %v252_v5  ;;  %v106_v24 = vmul.f32 %v727_v4, %v38_v15  ;;  %v107_v25 = vmul.f32 %v727_v4, %v39_v17 }
  0x13   :  { %v307_v16 = vpack.c.bf16 %v269_v9, %v268_v8  ;;  %v122_v26 = vmul.f32 %v727_v4, %v54_v18  ;;  %v123_v27 = vmul.f32 %v727_v4, %v55_v19  ;;  %v138_v28 = vmul.f32 %v727_v4, %v70_v20 }
  0x14   :  { %v139_v29 = vmul.f32 %v727_v4, %v71_v21  ;;  %v158_v30 = vadd.f32 %v735_v6, %v90_v22  ;;  %v159_v31 = vadd.f32 %v735_v6, %v91_v23  ;;  %v174_v32 = vadd.f32 %v735_v6, %v106_v24  ;;  %v26_v23 = vld [vmem:[%s1337_s0 + $0x40] sm:$0xff]  ;;  %v27_v24 = vld [vmem:[%s1337_s0 + $0x48] sm:$0xff] }
  0x15   :  { %v175_v33 = vadd.f32 %v735_v6, %v107_v25  ;;  %v190_v34 = vadd.f32 %v735_v6, %v122_v26  ;;  %v191_v35 = vadd.f32 %v735_v6, %v123_v27  ;;  %v206_v36 = vadd.f32 %v735_v6, %v138_v28  ;;  %v42_v25 = vld [vmem:[%s1337_s0 + $0xc0] sm:$0xff]  ;;  %v43_v27 = vld [vmem:[%s1337_s0 + $0xc8] sm:$0xff] }
  0x16   :  { %v207_v37 = vadd.f32 %v735_v6, %v139_v29  ;;  %v222_v38 = vmax.f32 %v158_v30, 0.0  ;;  %v223_v39 = vmax.f32 %v159_v31, 0.0  ;;  %v238_v40 = vmax.f32 %v174_v32, 0.0  ;;  %v58_v28 = vld [vmem:[%s1337_s0 + $0x140] sm:$0xff]  ;;  %v59_v29 = vld [vmem:[%s1337_s0 + $0x148] sm:$0xff] }
  0x17   :  { %v239_v41 = vmax.f32 %v175_v33, 0.0  ;;  %v254_v42 = vmax.f32 %v190_v34, 0.0  ;;  %v255_v43 = vmax.f32 %v191_v35, 0.0  ;;  %v270_v44 = vmax.f32 %v206_v36, 0.0  ;;  %v74_v30 = vld [vmem:[%s1337_s0 + $0x1c0] sm:$0xff]  ;;  %v75_v31 = vld [vmem:[%s1337_s0 + $0x1c8] sm:$0xff] }
  0x18   :  { %v271_v45 = vmax.f32 %v207_v37, 0.0  ;;  %v284_v46 = vpack.c.bf16 %v223_v39, %v222_v38  ;;  %v92_v58 = vmul.f32 %v727_v4, %v24_v49  ;;  %v93_v59 = vmul.f32 %v727_v4, %v25_v50 }
  0x19   :  { %v292_v47 = vpack.c.bf16 %v239_v41, %v238_v40  ;;  %v300_v48 = vpack.c.bf16 %v255_v43, %v254_v42  ;;  %v108_v60 = vmul.f32 %v727_v4, %v40_v51  ;;  %v109_v61 = vmul.f32 %v727_v4, %v41_v53 }
  0x1a   :  { %v308_v52 = vpack.c.bf16 %v271_v45, %v270_v44  ;;  %v124_v62 = vmul.f32 %v727_v4, %v56_v54  ;;  %v125_v63 = vmul.f32 %v727_v4, %v57_v55  ;;  %v140_v0 = vmul.f32 %v727_v4, %v72_v56 }
  0x1b   :  { %v141_v1 = vmul.f32 %v727_v4, %v73_v57  ;;  %v160_v2 = vadd.f32 %v735_v6, %v92_v58  ;;  %v161_v3 = vadd.f32 %v735_v6, %v93_v59  ;;  %v176_v5 = vadd.f32 %v735_v6, %v108_v60  ;;  %v28_v59 = vld [vmem:[%s1337_s0 + $0x50] sm:$0xff]  ;;  %v29_v60 = vld [vmem:[%s1337_s0 + $0x58] sm:$0xff] }
  0x1c   :  { %654 = vmatmul.msk.bf16.gmra.mxu0 %vm315_vm1, %v283_v10  ;;  %v177_v7 = vadd.f32 %v735_v6, %v109_v61  ;;  %v192_v8 = vadd.f32 %v735_v6, %v124_v62  ;;  %v193_v9 = vadd.f32 %v735_v6, %v125_v63  ;;  %v208_v10 = vadd.f32 %v735_v6, %v140_v0  ;;  %v44_v61 = vld [vmem:[%s1337_s0 + $0xd0] sm:$0xff]  ;;  %v45_v63 = vld [vmem:[%s1337_s0 + $0xd8] sm:$0xff] }
  0x1d   :  { %662 = vmatmul.msk.bf16.gmra.mxu1 %vm315_vm1, %v291_v11  ;;  %v209_v11 = vadd.f32 %v735_v6, %v141_v1  ;;  %v225_v13 = vmax.f32 %v161_v3, 0.0  ;;  %v240_v14 = vmax.f32 %v176_v5, 0.0  ;;  %v94_v32 = vmul.f32 %v727_v4, %v26_v23  ;;  %v60_v0 = vld [vmem:[%s1337_s0 + $0x150] sm:$0xff]  ;;  %v61_v1 = vld [vmem:[%s1337_s0 + $0x158] sm:$0xff] }
  0x1e   :  { %v241_v15 = vmax.f32 %v177_v7, 0.0  ;;  %v257_v17 = vmax.f32 %v193_v9, 0.0  ;;  %v272_v18 = vmax.f32 %v208_v10, 0.0  ;;  %v95_v33 = vmul.f32 %v727_v4, %v27_v24  ;;  %v77_v3 = vld [vmem:[%s1337_s0 + $0x1d8] sm:$0xff] }
  0x1f   :  { %670 = vmatmul.msk.bf16.gmra.mxu2 %vm315_vm1, %v299_v12  ;;  %v224_v12 = vmax.f32 %v160_v2, 0.0  ;;  %v273_v19 = vmax.f32 %v209_v11, 0.0  ;;  %v110_v34 = vmul.f32 %v727_v4, %v42_v25  ;;  %v111_v35 = vmul.f32 %v727_v4, %v43_v27  ;;  %v76_v2 = vld [vmem:[%s1337_s0 + $0x1d0] sm:$0xff] }
  0x20   :  { %678 = vmatmul.msk.bf16.gmra.mxu3 %vm315_vm1, %v307_v16  ;;  %v256_v16 = vmax.f32 %v192_v8, 0.0  ;;  %v293_v21 = vpack.c.bf16 %v241_v15, %v240_v14  ;;  %v126_v36 = vmul.f32 %v727_v4, %v58_v28  ;;  %v127_v37 = vmul.f32 %v727_v4, %v59_v29 }
  0x21   :  { %v285_v20 = vpack.c.bf16 %v225_v13, %v224_v12  ;;  %v309_v26 = vpack.c.bf16 %v273_v19, %v272_v18  ;;  %v142_v38 = vmul.f32 %v727_v4, %v74_v30  ;;  %v143_v39 = vmul.f32 %v727_v4, %v75_v31 }
  0x22   :  { %v301_v22 = vpack.c.bf16 %v257_v17, %v256_v16  ;;  %v162_v40 = vadd.f32 %v735_v6, %v94_v32  ;;  %v163_v41 = vadd.f32 %v735_v6, %v95_v33  ;;  %v178_v42 = vadd.f32 %v735_v6, %v110_v34  ;;  %v30_v33 = vld [vmem:[%s1337_s0 + $0x60] sm:$0xff]  ;;  %v31_v34 = vld [vmem:[%s1337_s0 + $0x68] sm:$0xff] }
  0x23   :  { %v179_v43 = vadd.f32 %v735_v6, %v111_v35  ;;  %v194_v44 = vadd.f32 %v735_v6, %v126_v36  ;;  %v195_v45 = vadd.f32 %v735_v6, %v127_v37  ;;  %v96_v5 = vmul.f32 %v727_v4, %v28_v59  ;;  %v46_v35 = vld [vmem:[%s1337_s0 + $0xe0] sm:$0xff]  ;;  %v47_v37 = vld [vmem:[%s1337_s0 + $0xe8] sm:$0xff] }
  0x24   :  { %v227_v49 = vmax.f32 %v163_v41, 0.0  ;;  %v242_v50 = vmax.f32 %v178_v42, 0.0  ;;  %v97_v7 = vmul.f32 %v727_v4, %v29_v60  ;;  %v112_v8 = vmul.f32 %v727_v4, %v44_v61  ;;  %v79_v41 = vld [vmem:[%s1337_s0 + $0x1e8] sm:$0xff] }
  0x25   :  { %v243_v51 = vmax.f32 %v179_v43, 0.0  ;;  %v259_v53 = vmax.f32 %v195_v45, 0.0  ;;  %v113_v9 = vmul.f32 %v727_v4, %v45_v63  ;;  %v128_v10 = vmul.f32 %v727_v4, %v60_v0 }
  0x26   :  { %v129_v11 = vmul.f32 %v727_v4, %v61_v1  ;;  %v144_v12 = vmul.f32 %v727_v4, %v76_v2  ;;  %v145_v13 = vmul.f32 %v727_v4, %v77_v3  ;;  %v164_v14 = vadd.f32 %v735_v6, %v96_v5 }
  0x27   :  { %v294_v57 = vpack.c.bf16 %v243_v51, %v242_v50  ;;  %v165_v15 = vadd.f32 %v735_v6, %v97_v7  ;;  %v180_v16 = vadd.f32 %v735_v6, %v112_v8  ;;  %v181_v17 = vadd.f32 %v735_v6, %v113_v9  ;;  %v32_v7 = vld [vmem:[%s1337_s0 + $0x70] sm:$0xff]  ;;  %v33_v8 = vld [vmem:[%s1337_s0 + $0x78] sm:$0xff] }
  0x28   :  { %v196_v18 = vadd.f32 %v735_v6, %v128_v10  ;;  %v197_v19 = vadd.f32 %v735_v6, %v129_v11  ;;  %v98_v42 = vmul.f32 %v727_v4, %v30_v33  ;;  %v99_v43 = vmul.f32 %v727_v4, %v31_v34  ;;  %v48_v9 = vld [vmem:[%s1337_s0 + $0xf0] sm:$0xff]  ;;  %v49_v11 = vld [vmem:[%s1337_s0 + $0xf8] sm:$0xff] }
  0x29   :  { %v229_v23 = vmax.f32 %v165_v15, 0.0  ;;  %v244_v24 = vmax.f32 %v180_v16, 0.0  ;;  %v245_v25 = vmax.f32 %v181_v17, 0.0  ;;  %v115_v45 = vmul.f32 %v727_v4, %v47_v37  ;;  %v81_v15 = vld [vmem:[%s1337_s0 + $0x1f8] sm:$0xff] }
  0x2a   :  { %v261_v27 = vmax.f32 %v197_v19, 0.0  ;;  %v166_v50 = vadd.f32 %v735_v6, %v98_v42  ;;  %v167_v51 = vadd.f32 %v735_v6, %v99_v43  ;;  %v100_v16 = vmul.f32 %v727_v4, %v32_v7 }
  0x2b   :  { %v295_v31 = vpack.c.bf16 %v245_v25, %v244_v24  ;;  %v101_v17 = vmul.f32 %v727_v4, %v33_v8  ;;  %v117_v19 = vmul.f32 %v727_v4, %v49_v11 }
  0x2c   :  { %655 = vmatmul.msk.bf16.gmra.mxu0 %vm315_vm1, %v284_v46  ;;  %v210_v46 = vadd.f32 %v735_v6, %v142_v38  ;;  %v62_v38 = vld [vmem:[%s1337_s0 + $0x160] sm:$0xff]  ;;  %v231_v59 = vmax.f32 %v167_v51, 0.0  ;;  %v168_v24 = vadd.f32 %v735_v6, %v100_v16 }
  0x2d   :  { %663 = vmatmul.msk.bf16.gmra.mxu1 %vm315_vm1, %v292_v47  ;;  %v211_v47 = vadd.f32 %v735_v6, %v143_v39  ;;  %v63_v39 = vld [vmem:[%s1337_s0 + $0x168] sm:$0xff]  ;;  %v169_v25 = vadd.f32 %v735_v6, %v101_v17 }
  0x2e   :  { %v274_v54 = vmax.f32 %v210_v46, 0.0  ;;  %v130_v46 = vmul.f32 %v727_v4, %v62_v38 }
  0x2f   :  { %671 = vmatmul.msk.bf16.gmra.mxu2 %vm315_vm1, %v300_v48  ;;  %v226_v48 = vmax.f32 %v162_v40, 0.0  ;;  %v275_v55 = vmax.f32 %v211_v47, 0.0  ;;  %v78_v40 = vld [vmem:[%s1337_s0 + $0x1e0] sm:$0xff]  ;;  %v131_v47 = vmul.f32 %v727_v4, %v63_v39  ;;  %v233_v33 = vmax.f32 %v169_v25, 0.0 }
  0x30   :  { %679 = vmatmul.msk.bf16.gmra.mxu3 %vm315_vm1, %v308_v52  ;;  %v258_v52 = vmax.f32 %v194_v44, 0.0  ;;  %v114_v44 = vmul.f32 %v727_v4, %v46_v35 }
  0x31   :  { %v286_v56 = vpack.c.bf16 %v227_v49, %v226_v48  ;;  %v310_v62 = vpack.c.bf16 %v275_v55, %v274_v54  ;;  %v146_v48 = vmul.f32 %v727_v4, %v78_v40  ;;  %v147_v49 = vmul.f32 %v727_v4, %v79_v41 }
  0x32   :  { %v302_v58 = vpack.c.bf16 %v259_v53, %v258_v52  ;;  %v182_v52 = vadd.f32 %v735_v6, %v114_v44  ;;  %v183_v53 = vadd.f32 %v735_v6, %v115_v45  ;;  %v198_v54 = vadd.f32 %v735_v6, %v130_v46 }
  0x33   :  { %v199_v55 = vadd.f32 %v735_v6, %v131_v47 }
  0x34   :  { %v246_v60 = vmax.f32 %v182_v52, 0.0  ;;  %v247_v61 = vmax.f32 %v183_v53, 0.0 }
  0x35   :  { %v263_v63 = vmax.f32 %v199_v55, 0.0 }
  0x36   :  { %v296_v3 = vpack.c.bf16 %v247_v61, %v246_v60 }
  0x3c   :  { %656 = vmatmul.msk.bf16.gmra.mxu0 %vm315_vm1, %v285_v20  ;;  %v212_v20 = vadd.f32 %v735_v6, %v144_v12  ;;  %v64_v12 = vld [vmem:[%s1337_s0 + $0x170] sm:$0xff] }
  0x3d   :  { %664 = vmatmul.msk.bf16.gmra.mxu1 %vm315_vm1, %v293_v21  ;;  %v213_v21 = vadd.f32 %v735_v6, %v145_v13  ;;  %v65_v13 = vld [vmem:[%s1337_s0 + $0x178] sm:$0xff] }
  0x3e   :  { %v276_v28 = vmax.f32 %v212_v20, 0.0  ;;  %v132_v20 = vmul.f32 %v727_v4, %v64_v12 }
  0x3f   :  { %672 = vmatmul.msk.bf16.gmra.mxu2 %vm315_vm1, %v301_v22  ;;  %v228_v22 = vmax.f32 %v164_v14, 0.0  ;;  %v277_v29 = vmax.f32 %v213_v21, 0.0  ;;  %v80_v14 = vld [vmem:[%s1337_s0 + $0x1f0] sm:$0xff]  ;;  %v133_v21 = vmul.f32 %v727_v4, %v65_v13 }
  0x40   :  { %680 = vmatmul.msk.bf16.gmra.mxu3 %vm315_vm1, %v309_v26  ;;  %v260_v26 = vmax.f32 %v196_v18, 0.0  ;;  %v116_v18 = vmul.f32 %v727_v4, %v48_v9 }
  0x41   :  { %v287_v30 = vpack.c.bf16 %v229_v23, %v228_v22  ;;  %v311_v36 = vpack.c.bf16 %v277_v29, %v276_v28  ;;  %v148_v22 = vmul.f32 %v727_v4, %v80_v14  ;;  %v149_v23 = vmul.f32 %v727_v4, %v81_v15 }
  0x42   :  { %v303_v32 = vpack.c.bf16 %v261_v27, %v260_v26  ;;  %v184_v26 = vadd.f32 %v735_v6, %v116_v18  ;;  %v185_v27 = vadd.f32 %v735_v6, %v117_v19  ;;  %v200_v28 = vadd.f32 %v735_v6, %v132_v20 }
  0x43   :  { %v201_v29 = vadd.f32 %v735_v6, %v133_v21 }
  0x44   :  { %v248_v34 = vmax.f32 %v184_v26, 0.0  ;;  %v249_v4 = vmax.f32 %v185_v27, 0.0  ;;  %v264_v35 = vmax.f32 %v200_v28, 0.0 }
  0x46   :  { %v297_v40 = vpack.c.bf16 %v249_v4, %v248_v34 }
  0x4c   :  { %657 = vmatmul.msk.bf16.gmra.mxu0 %vm315_vm1, %v286_v56  ;;  %v214_v56 = vadd.f32 %v735_v6, %v146_v48 }
  0x4d   :  { %665 = vmatmul.msk.bf16.gmra.mxu1 %vm315_vm1, %v294_v57  ;;  %v215_v57 = vadd.f32 %v735_v6, %v147_v49 }
  0x4e   :  { %v278_v0 = vmax.f32 %v214_v56, 0.0 }
  0x4f   :  { %673 = vmatmul.msk.bf16.gmra.mxu2 %vm315_vm1, %v302_v58  ;;  %v230_v58 = vmax.f32 %v166_v50, 0.0  ;;  %v279_v1 = vmax.f32 %v215_v57, 0.0 }
  0x50   :  { %681 = vmatmul.msk.bf16.gmra.mxu3 %vm315_vm1, %v310_v62  ;;  %v262_v62 = vmax.f32 %v198_v54, 0.0 }
  0x51   :  { %v288_v2 = vpack.c.bf16 %v231_v59, %v230_v58  ;;  %v312_v10 = vpack.c.bf16 %v279_v1, %v278_v0 }
  0x52   :  { %v304_v5 = vpack.c.bf16 %v263_v63, %v262_v62 }
  0x5c   :  { %658 = vmatmul.msk.bf16.gmra.mxu0 %vm315_vm1, %v287_v30  ;;  %v216_v30 = vadd.f32 %v735_v6, %v148_v22 }
  0x5d   :  { %666 = vmatmul.msk.bf16.gmra.mxu1 %vm315_vm1, %v295_v31  ;;  %v217_v31 = vadd.f32 %v735_v6, %v149_v23 }
  0x5e   :  { %v280_v37 = vmax.f32 %v216_v30, 0.0 }
  0x5f   :  { %674 = vmatmul.msk.bf16.gmra.mxu2 %vm315_vm1, %v303_v32  ;;  %v232_v32 = vmax.f32 %v168_v24, 0.0  ;;  %v281_v38 = vmax.f32 %v217_v31, 0.0 }
  0x60   :  { %682 = vmatmul.msk.bf16.gmra.mxu3 %vm315_vm1, %v311_v36  ;;  %v265_v36 = vmax.f32 %v201_v29, 0.0 }
  0x61   :  { %v289_v39 = vpack.c.bf16 %v233_v33, %v232_v32  ;;  %v313_v42 = vpack.c.bf16 %v281_v38, %v280_v37 }
  0x62   :  { %v305_v41 = vpack.c.bf16 %v265_v36, %v264_v35 }
  0x6c   :  { %659 = vmatmul.msk.bf16.gmra.mxu0 %vm315_vm1, %v288_v2 }
  0x6d   :  { %667 = vmatmul.msk.bf16.gmra.mxu1 %vm315_vm1, %v296_v3 }
  0x6f   :  { %675 = vmatmul.msk.bf16.gmra.mxu2 %vm315_vm1, %v304_v5 }
  0x70   :  { %683 = vmatmul.msk.bf16.gmra.mxu3 %vm315_vm1, %v312_v10 }
  0x7c   :  { %660 = vmatmul.msk.bf16.gmra.mxu0 %vm315_vm1, %v289_v39 }
  0x7d   :  { %668 = vmatmul.msk.bf16.gmra.mxu1 %vm315_vm1, %v297_v40 }
  0x7f   :  { %676 = vmatmul.msk.bf16.gmra.mxu2 %vm315_vm1, %v305_v41 }
  0x80   :  { %684 = vmatmul.msk.bf16.gmra.mxu3 %vm315_vm1, %v313_v42 }
  0x89   :  { %v425_v6 = vpop.f32.mrf.mxu0 }
  0x8a   :  { %585 = vst.msk [vmem:[%s1340_s4] sm:$0xff] %vm315_vm1, %v425_v6  ;;  %v465_v43 = vpop.f32.mrf.mxu1 }
  0x8b   :  { %601 = vst.msk [vmem:[%s1340_s4 + $0x80] sm:$0xff] %vm315_vm1, %v465_v43 }
  0x91   :  { %v427_v46 = vpop.f32.mrf.mxu0 }
  0x92   :  { %v505_v44 = vpop.f32.mrf.mxu2  ;;  %v467_v47 = vpop.f32.mrf.mxu1  ;;  %586 = vst.msk [vmem:[%s1340_s4 + $0x8] sm:$0xff] %vm315_vm1, %v427_v46 }
  0x93   :  { %617 = vst.msk [vmem:[%s1340_s4 + $0x100] sm:$0xff] %vm315_vm1, %v505_v44  ;;  %v545_v45 = vpop.f32.mrf.mxu3 }
  0x94   :  { %633 = vst.msk [vmem:[%s1340_s4 + $0x180] sm:$0xff] %vm315_vm1, %v545_v45 }
  0x95   :  { %602 = vst.msk [vmem:[%s1340_s4 + $0x88] sm:$0xff] %vm315_vm1, %v467_v47 }
  0x99   :  { %v430_v50 = vpop.f32.mrf.mxu0 }
  0x9a   :  { %v507_v48 = vpop.f32.mrf.mxu2  ;;  %v470_v51 = vpop.f32.mrf.mxu1  ;;  %587 = vst.msk [vmem:[%s1340_s4 + $0x10] sm:$0xff] %vm315_vm1, %v430_v50 }
  0x9b   :  { %618 = vst.msk [vmem:[%s1340_s4 + $0x108] sm:$0xff] %vm315_vm1, %v507_v48  ;;  %v547_v49 = vpop.f32.mrf.mxu3 }
  0x9c   :  { %634 = vst.msk [vmem:[%s1340_s4 + $0x188] sm:$0xff] %vm315_vm1, %v547_v49 }
  0x9d   :  { %603 = vst.msk [vmem:[%s1340_s4 + $0x90] sm:$0xff] %vm315_vm1, %v470_v51 }
  0xa1   :  { %v432_v54 = vpop.f32.mrf.mxu0 }
  0xa2   :  { %v510_v52 = vpop.f32.mrf.mxu2  ;;  %v472_v55 = vpop.f32.mrf.mxu1  ;;  %588 = vst.msk [vmem:[%s1340_s4 + $0x18] sm:$0xff] %vm315_vm1, %v432_v54 }
  0xa3   :  { %619 = vst.msk [vmem:[%s1340_s4 + $0x110] sm:$0xff] %vm315_vm1, %v510_v52  ;;  %v550_v53 = vpop.f32.mrf.mxu3 }
  0xa4   :  { %635 = vst.msk [vmem:[%s1340_s4 + $0x190] sm:$0xff] %vm315_vm1, %v550_v53 }
  0xa5   :  { %604 = vst.msk [vmem:[%s1340_s4 + $0x98] sm:$0xff] %vm315_vm1, %v472_v55 }
  0xa9   :  { %v435_v58 = vpop.f32.mrf.mxu0 }
  0xaa   :  { %v512_v56 = vpop.f32.mrf.mxu2  ;;  %v475_v59 = vpop.f32.mrf.mxu1  ;;  %589 = vst.msk [vmem:[%s1340_s4 + $0x20] sm:$0xff] %vm315_vm1, %v435_v58 }
  0xab   :  { %620 = vst.msk [vmem:[%s1340_s4 + $0x118] sm:$0xff] %vm315_vm1, %v512_v56  ;;  %v552_v57 = vpop.f32.mrf.mxu3 }
  0xac   :  { %636 = vst.msk [vmem:[%s1340_s4 + $0x198] sm:$0xff] %vm315_vm1, %v552_v57 }
  0xad   :  { %605 = vst.msk [vmem:[%s1340_s4 + $0xa0] sm:$0xff] %vm315_vm1, %v475_v59 }
  0xb1   :  { %v437_v62 = vpop.f32.mrf.mxu0 }
  0xb2   :  { %v515_v60 = vpop.f32.mrf.mxu2  ;;  %v477_v63 = vpop.f32.mrf.mxu1  ;;  %590 = vst.msk [vmem:[%s1340_s4 + $0x28] sm:$0xff] %vm315_vm1, %v437_v62 }
  0xb3   :  { %621 = vst.msk [vmem:[%s1340_s4 + $0x120] sm:$0xff] %vm315_vm1, %v515_v60  ;;  %v555_v61 = vpop.f32.mrf.mxu3 }
  0xb4   :  { %637 = vst.msk [vmem:[%s1340_s4 + $0x1a0] sm:$0xff] %vm315_vm1, %v555_v61 }
  0xb5   :  { %606 = vst.msk [vmem:[%s1340_s4 + $0xa8] sm:$0xff] %vm315_vm1, %v477_v63 }
  0xb9   :  { %v440_v2 = vpop.f32.mrf.mxu0 }
  0xba   :  { %v517_v0 = vpop.f32.mrf.mxu2  ;;  %v480_v3 = vpop.f32.mrf.mxu1  ;;  %591 = vst.msk [vmem:[%s1340_s4 + $0x30] sm:$0xff] %vm315_vm1, %v440_v2 }
  0xbb   :  { %622 = vst.msk [vmem:[%s1340_s4 + $0x128] sm:$0xff] %vm315_vm1, %v517_v0  ;;  %v557_v1 = vpop.f32.mrf.mxu3 }
  0xbc   :  { %638 = vst.msk [vmem:[%s1340_s4 + $0x1a8] sm:$0xff] %vm315_vm1, %v557_v1 }
  0xbd   :  { %607 = vst.msk [vmem:[%s1340_s4 + $0xb0] sm:$0xff] %vm315_vm1, %v480_v3 }
  0xc1   :  { %v442_v8 = vpop.f32.mrf.mxu0 }
  0xc2   :  { %v520_v5 = vpop.f32.mrf.mxu2  ;;  %v482_v9 = vpop.f32.mrf.mxu1  ;;  %592 = vst.msk [vmem:[%s1340_s4 + $0x38] sm:$0xff] %vm315_vm1, %v442_v8 }
  0xc3   :  { %623 = vst.msk [vmem:[%s1340_s4 + $0x130] sm:$0xff] %vm315_vm1, %v520_v5  ;;  %v560_v7 = vpop.f32.mrf.mxu3 }
  0xc4   :  { %639 = vst.msk [vmem:[%s1340_s4 + $0x1b0] sm:$0xff] %vm315_vm1, %v560_v7 }
  0xc5   :  { %608 = vst.msk [vmem:[%s1340_s4 + $0xb8] sm:$0xff] %vm315_vm1, %v482_v9 }
  0xc9   :  { %v445_v12 = vpop.f32.mrf.mxu0 }
  0xca   :  { %v522_v10 = vpop.f32.mrf.mxu2  ;;  %v485_v13 = vpop.f32.mrf.mxu1  ;;  %593 = vst.msk [vmem:[%s1340_s4 + $0x40] sm:$0xff] %vm315_vm1, %v445_v12 }
  0xcb   :  { %624 = vst.msk [vmem:[%s1340_s4 + $0x138] sm:$0xff] %vm315_vm1, %v522_v10  ;;  %v562_v11 = vpop.f32.mrf.mxu3 }
  0xcc   :  { %640 = vst.msk [vmem:[%s1340_s4 + $0x1b8] sm:$0xff] %vm315_vm1, %v562_v11 }
  0xcd   :  { %609 = vst.msk [vmem:[%s1340_s4 + $0xc0] sm:$0xff] %vm315_vm1, %v485_v13 }
  0xd1   :  { %v447_v16 = vpop.f32.mrf.mxu0 }
  0xd2   :  { %v525_v14 = vpop.f32.mrf.mxu2  ;;  %v487_v17 = vpop.f32.mrf.mxu1  ;;  %594 = vst.msk [vmem:[%s1340_s4 + $0x48] sm:$0xff] %vm315_vm1, %v447_v16 }
  0xd3   :  { %625 = vst.msk [vmem:[%s1340_s4 + $0x140] sm:$0xff] %vm315_vm1, %v525_v14  ;;  %v565_v15 = vpop.f32.mrf.mxu3 }
  0xd4   :  { %641 = vst.msk [vmem:[%s1340_s4 + $0x1c0] sm:$0xff] %vm315_vm1, %v565_v15 }
  0xd5   :  { %610 = vst.msk [vmem:[%s1340_s4 + $0xc8] sm:$0xff] %vm315_vm1, %v487_v17 }
  0xd9   :  { %v450_v20 = vpop.f32.mrf.mxu0 }
  0xda   :  { %v527_v18 = vpop.f32.mrf.mxu2  ;;  %v490_v21 = vpop.f32.mrf.mxu1  ;;  %595 = vst.msk [vmem:[%s1340_s4 + $0x50] sm:$0xff] %vm315_vm1, %v450_v20 }
  0xdb   :  { %626 = vst.msk [vmem:[%s1340_s4 + $0x148] sm:$0xff] %vm315_vm1, %v527_v18  ;;  %v567_v19 = vpop.f32.mrf.mxu3 }
  0xdc   :  { %642 = vst.msk [vmem:[%s1340_s4 + $0x1c8] sm:$0xff] %vm315_vm1, %v567_v19 }
  0xdd   :  { %611 = vst.msk [vmem:[%s1340_s4 + $0xd0] sm:$0xff] %vm315_vm1, %v490_v21 }
  0xe1   :  { %v452_v24 = vpop.f32.mrf.mxu0 }
  0xe2   :  { %v530_v22 = vpop.f32.mrf.mxu2  ;;  %v492_v25 = vpop.f32.mrf.mxu1  ;;  %596 = vst.msk [vmem:[%s1340_s4 + $0x58] sm:$0xff] %vm315_vm1, %v452_v24 }
  0xe3   :  { %627 = vst.msk [vmem:[%s1340_s4 + $0x150] sm:$0xff] %vm315_vm1, %v530_v22  ;;  %v570_v23 = vpop.f32.mrf.mxu3 }
  0xe4   :  { %643 = vst.msk [vmem:[%s1340_s4 + $0x1d0] sm:$0xff] %vm315_vm1, %v570_v23 }
  0xe5   :  { %612 = vst.msk [vmem:[%s1340_s4 + $0xd8] sm:$0xff] %vm315_vm1, %v492_v25 }
  0xe9   :  { %v455_v28 = vpop.f32.mrf.mxu0 }
  0xea   :  { %v532_v26 = vpop.f32.mrf.mxu2  ;;  %v495_v29 = vpop.f32.mrf.mxu1  ;;  %597 = vst.msk [vmem:[%s1340_s4 + $0x60] sm:$0xff] %vm315_vm1, %v455_v28 }
  0xeb   :  { %628 = vst.msk [vmem:[%s1340_s4 + $0x158] sm:$0xff] %vm315_vm1, %v532_v26  ;;  %v572_v27 = vpop.f32.mrf.mxu3 }
  0xec   :  { %644 = vst.msk [vmem:[%s1340_s4 + $0x1d8] sm:$0xff] %vm315_vm1, %v572_v27 }
  0xed   :  { %613 = vst.msk [vmem:[%s1340_s4 + $0xe0] sm:$0xff] %vm315_vm1, %v495_v29 }
  0xf1   :  { %v457_v32 = vpop.f32.mrf.mxu0 }
  0xf2   :  { %v535_v30 = vpop.f32.mrf.mxu2  ;;  %v497_v33 = vpop.f32.mrf.mxu1  ;;  %598 = vst.msk [vmem:[%s1340_s4 + $0x68] sm:$0xff] %vm315_vm1, %v457_v32 }
  0xf3   :  { %629 = vst.msk [vmem:[%s1340_s4 + $0x160] sm:$0xff] %vm315_vm1, %v535_v30  ;;  %v575_v31 = vpop.f32.mrf.mxu3 }
  0xf4   :  { %645 = vst.msk [vmem:[%s1340_s4 + $0x1e0] sm:$0xff] %vm315_vm1, %v575_v31 }
  0xf5   :  { %614 = vst.msk [vmem:[%s1340_s4 + $0xe8] sm:$0xff] %vm315_vm1, %v497_v33 }
  0xf9   :  { %v460_v35 = vpop.f32.mrf.mxu0 }
  0xfa   :  { %v537_v34 = vpop.f32.mrf.mxu2  ;;  %v500_v36 = vpop.f32.mrf.mxu1  ;;  %599 = vst.msk [vmem:[%s1340_s4 + $0x70] sm:$0xff] %vm315_vm1, %v460_v35 }
  0xfb   :  { %630 = vst.msk [vmem:[%s1340_s4 + $0x168] sm:$0xff] %vm315_vm1, %v537_v34  ;;  %v577_v4 = vpop.f32.mrf.mxu3 }
  0xfc   :  { %646 = vst.msk [vmem:[%s1340_s4 + $0x1e8] sm:$0xff] %vm315_vm1, %v577_v4 }
  0xfd   :  { %615 = vst.msk [vmem:[%s1340_s4 + $0xf0] sm:$0xff] %vm315_vm1, %v500_v36 }
 0x101   :  { %v462_v39 = vpop.f32.mrf.mxu0 }
 0x102   :  { %v540_v37 = vpop.f32.mrf.mxu2  ;;  %v502_v40 = vpop.f32.mrf.mxu1  ;;  %600 = vst.msk [vmem:[%s1340_s4 + $0x78] sm:$0xff] %vm315_vm1, %v462_v39 }
 0x103   :  { %631 = vst.msk [vmem:[%s1340_s4 + $0x170] sm:$0xff] %vm315_vm1, %v540_v37  ;;  %v580_v38 = vpop.f32.mrf.mxu3 }
 0x104   :  { %647 = vst.msk [vmem:[%s1340_s4 + $0x1f0] sm:$0xff] %vm315_vm1, %v580_v38 }
 0x105   :  { %616 = vst.msk [vmem:[%s1340_s4 + $0xf8] sm:$0xff] %vm315_vm1, %v502_v40 }
 0x10a   :  { %v542_v41 = vpop.f32.mrf.mxu2 }
 0x10b   :  { %632 = vst.msk [vmem:[%s1340_s4 + $0x178] sm:$0xff] %vm315_vm1, %v542_v41  ;;  %v582_v42 = vpop.f32.mrf.mxu3 }
 0x10c   :  { %648 = vst.msk [vmem:[%s1340_s4 + $0x1f8] sm:$0xff] %vm315_vm1, %v582_v42 }

// kernel: bottleneck_forward.7
= control target key start
LH: loop header
LB: loop body
LE: loop exit
PB: predicated region body
PF: predicated region fallthrough
CT: control target
= control target key end

     0   :  { %vm479_vm0 = vcmask 1041408   ;;  %vm382_vm1 = vcmask 31744   ;;  %vm652_vm2 = vcmask 130048   ;;  %s1601_s3 = inlined_call_operand.vmem [shape: bf16[4,16], index: 3, kind: input, shape index: {}]   ;;  %s1602_s0 = inlined_call_operand.vmem [shape: f32[512,4], index: 0, kind: input, shape index: {}]   ;;  %s1603_s1 = inlined_call_operand.vmem [shape: f32[1,4], index: 1, kind: input, shape index: {}]   ;;  %s1604_s2 = inlined_call_operand.vmem [shape: f32[1,4], index: 2, kind: input, shape index: {}]   ;;  %s1605_s4 = inlined_call_operand.vmem [shape: f32[512,16], index: 4, kind: input, shape index: {}]   ;;  %s1606_s5 = inlined_call_operand.vmem [shape: f32[512,16], index: 5, kind: output, shape index: {}]  }
   0x1   :  { %v317_v0 = vld [vmem:[%s1601_s3] sm:$0x3]  ;;  %v22_v2 = vld [vmem:[%s1602_s0 + $0x8] sm:$0xff]  ;;  %v23_v31 = vld [vmem:[%s1602_s0 + $0x10] sm:$0xff] }
   0x2   :  { %v21_v1 = vld [vmem:[%s1602_s0] sm:$0xff]  ;;  %v481_v3 = vsel %vm479_vm0, %v317_v0, 0  ;;  %v38_v7 = vld [vmem:[%s1602_s0 + $0x88] sm:$0xff]  ;;  %v24_v36 = vld [vmem:[%s1602_s0 + $0x18] sm:$0xff] }
   0x3   :  { %v800_v4 = vld [vmem:[%s1603_s1] ss:$0 sm:$0xff]  ;;  %490 = vmatpush.bf16.msra.mxu0 %v481_v3  ;;  %753 = vmatpush.bf16.msra.mxu1 %v481_v3  ;;  %v54_v12 = vld [vmem:[%s1602_s0 + $0x108] sm:$0xff]  ;;  %v39_v37 = vld [vmem:[%s1602_s0 + $0x90] sm:$0xff] }
   0x4   :  { %v37_v5 = vld [vmem:[%s1602_s0 + $0x80] sm:$0xff]  ;;  %754 = vmatpush.bf16.msra.mxu2 %v481_v3  ;;  %755 = vmatpush.bf16.msra.mxu3 %v481_v3  ;;  %v89_v8 = vmul.f32 %v800_v4, %v21_v1  ;;  %v90_v9 = vmul.f32 %v800_v4, %v22_v2  ;;  %v106_v14 = vmul.f32 %v800_v4, %v38_v7  ;;  %v70_v17 = vld [vmem:[%s1602_s0 + $0x188] sm:$0xff]  ;;  %v40_v40 = vld [vmem:[%s1602_s0 + $0x98] sm:$0xff] }
   0x5   :  { %v808_v6 = vld [vmem:[%s1604_s2] ss:$0 sm:$0xff]  ;;  %v105_v10 = vmul.f32 %v800_v4, %v37_v5  ;;  %v122_v16 = vmul.f32 %v800_v4, %v54_v12  ;;  %v138_v22 = vmul.f32 %v800_v4, %v70_v17  ;;  %v55_v41 = vld [vmem:[%s1602_s0 + $0x110] sm:$0xff]  ;;  %v56_v42 = vld [vmem:[%s1602_s0 + $0x118] sm:$0xff]  ;;  %v91_v47 = vmul.f32 %v800_v4, %v23_v31 }
   0x6   :  { %v53_v11 = vld [vmem:[%s1602_s0 + $0x100] sm:$0xff]  ;;  %v157_v19 = vadd.f32 %v808_v6, %v89_v8  ;;  %v158_v20 = vadd.f32 %v808_v6, %v90_v9  ;;  %v174_v23 = vadd.f32 %v808_v6, %v106_v14  ;;  %v71_v45 = vld [vmem:[%s1602_s0 + $0x190] sm:$0xff]  ;;  %v92_v48 = vmul.f32 %v800_v4, %v24_v36  ;;  %v72_v50 = vld [vmem:[%s1602_s0 + $0x198] sm:$0xff] }
   0x7   :  { %v69_v13 = vld [vmem:[%s1602_s0 + $0x180] sm:$0xff]  ;;  %v121_v15 = vmul.f32 %v800_v4, %v53_v11  ;;  %v173_v21 = vadd.f32 %v808_v6, %v105_v10  ;;  %v190_v25 = vadd.f32 %v808_v6, %v122_v16  ;;  %v206_v30 = vadd.f32 %v808_v6, %v138_v22  ;;  %v26_v14 = vld [vmem:[%s1602_s0 + $0x28] sm:$0xff] }
   0x8   :  { %v137_v18 = vmul.f32 %v800_v4, %v69_v13  ;;  %v221_v27 = vmax.f32 %v157_v19, 0.0  ;;  %v222_v28 = vmax.f32 %v158_v20, 0.0  ;;  %v238_v32 = vmax.f32 %v174_v23, 0.0  ;;  %v25_v13 = vld [vmem:[%s1602_s0 + $0x20] sm:$0xff]  ;;  %v42_v17 = vld [vmem:[%s1602_s0 + $0xa8] sm:$0xff] }
   0x9   :  { %v189_v24 = vadd.f32 %v808_v6, %v121_v15  ;;  %v237_v29 = vmax.f32 %v173_v21, 0.0  ;;  %v254_v34 = vmax.f32 %v190_v25, 0.0  ;;  %v270_v39 = vmax.f32 %v206_v30, 0.0  ;;  %v41_v15 = vld [vmem:[%s1602_s0 + $0xa0] sm:$0xff]  ;;  %v58_v19 = vld [vmem:[%s1602_s0 + $0x128] sm:$0xff] }
   0xa   :  { %v205_v26 = vadd.f32 %v808_v6, %v137_v18  ;;  %v285_v38 = vpack.c.bf16 %v222_v28, %v221_v27  ;;  %v107_v49 = vmul.f32 %v800_v4, %v39_v37  ;;  %v108_v51 = vmul.f32 %v800_v4, %v40_v40  ;;  %v57_v18 = vld [vmem:[%s1602_s0 + $0x120] sm:$0xff]  ;;  %v74_v21 = vld [vmem:[%s1602_s0 + $0x1a8] sm:$0xff] }
   0xb   :  { %v253_v33 = vmax.f32 %v189_v24, 0.0  ;;  %v293_v43 = vpack.c.bf16 %v238_v32, %v237_v29  ;;  %v123_v52 = vmul.f32 %v800_v4, %v55_v41  ;;  %v124_v53 = vmul.f32 %v800_v4, %v56_v42  ;;  %v73_v20 = vld [vmem:[%s1602_s0 + $0x1a0] sm:$0xff] }
   0xc   :  { %v269_v35 = vmax.f32 %v205_v26, 0.0  ;;  %721 = vmatmul.msk.bf16.vlgmr.msra.gmra.mxu0 %vm382_vm1, %v285_v38  ;;  %v139_v54 = vmul.f32 %v800_v4, %v71_v45  ;;  %v140_v55 = vmul.f32 %v800_v4, %v72_v50  ;;  %v159_v56 = vadd.f32 %v808_v6, %v91_v47  ;;  %v28_v50 = vld [vmem:[%s1602_s0 + $0x38] sm:$0xff] }
   0xd   :  { %v301_v44 = vpack.c.bf16 %v254_v34, %v253_v33  ;;  %729 = vmatmul.msk.bf16.vlgmr.msra.gmra.mxu1 %vm382_vm1, %v293_v43  ;;  %v160_v57 = vadd.f32 %v808_v6, %v92_v48  ;;  %v175_v58 = vadd.f32 %v808_v6, %v107_v49  ;;  %v176_v59 = vadd.f32 %v808_v6, %v108_v51  ;;  %v27_v49 = vld [vmem:[%s1602_s0 + $0x30] sm:$0xff] }
   0xe   :  { %v309_v46 = vpack.c.bf16 %v270_v39, %v269_v35  ;;  %v191_v60 = vadd.f32 %v808_v6, %v123_v52  ;;  %v192_v61 = vadd.f32 %v808_v6, %v124_v53  ;;  %v207_v62 = vadd.f32 %v808_v6, %v139_v54  ;;  %v43_v51 = vld [vmem:[%s1602_s0 + $0xb0] sm:$0xff]  ;;  %v44_v53 = vld [vmem:[%s1602_s0 + $0xb8] sm:$0xff] }
   0xf   :  { %737 = vmatmul.msk.bf16.vlgmr.msra.gmra.mxu2 %vm382_vm1, %v301_v44  ;;  %v208_v63 = vadd.f32 %v808_v6, %v140_v55  ;;  %v223_v0 = vmax.f32 %v159_v56, 0.0  ;;  %v224_v1 = vmax.f32 %v160_v57, 0.0  ;;  %v239_v2 = vmax.f32 %v175_v58, 0.0  ;;  %v59_v54 = vld [vmem:[%s1602_s0 + $0x130] sm:$0xff]  ;;  %v60_v55 = vld [vmem:[%s1602_s0 + $0x138] sm:$0xff] }
  0x10   :  { %745 = vmatmul.msk.bf16.vlgmr.msra.gmra.mxu3 %vm382_vm1, %v309_v46  ;;  %v240_v3 = vmax.f32 %v176_v59, 0.0  ;;  %v255_v5 = vmax.f32 %v191_v60, 0.0  ;;  %v256_v7 = vmax.f32 %v192_v61, 0.0  ;;  %v271_v8 = vmax.f32 %v207_v62, 0.0  ;;  %v75_v56 = vld [vmem:[%s1602_s0 + $0x1b0] sm:$0xff]  ;;  %v76_v57 = vld [vmem:[%s1602_s0 + $0x1b8] sm:$0xff] }
  0x11   :  { %v272_v9 = vmax.f32 %v208_v63, 0.0  ;;  %v286_v10 = vpack.c.bf16 %v224_v1, %v223_v0  ;;  %v93_v22 = vmul.f32 %v800_v4, %v25_v13  ;;  %v94_v23 = vmul.f32 %v800_v4, %v26_v14 }
  0x12   :  { %v294_v11 = vpack.c.bf16 %v240_v3, %v239_v2  ;;  %v302_v12 = vpack.c.bf16 %v256_v7, %v255_v5  ;;  %v109_v24 = vmul.f32 %v800_v4, %v41_v15  ;;  %v110_v25 = vmul.f32 %v800_v4, %v42_v17 }
  0x13   :  { %v310_v16 = vpack.c.bf16 %v272_v9, %v271_v8  ;;  %v125_v26 = vmul.f32 %v800_v4, %v57_v18  ;;  %v126_v27 = vmul.f32 %v800_v4, %v58_v19  ;;  %v141_v28 = vmul.f32 %v800_v4, %v73_v20 }
  0x14   :  { %v142_v29 = vmul.f32 %v800_v4, %v74_v21  ;;  %v161_v30 = vadd.f32 %v808_v6, %v93_v22  ;;  %v162_v31 = vadd.f32 %v808_v6, %v94_v23  ;;  %v177_v32 = vadd.f32 %v808_v6, %v109_v24  ;;  %v29_v23 = vld [vmem:[%s1602_s0 + $0x40] sm:$0xff]  ;;  %v30_v24 = vld [vmem:[%s1602_s0 + $0x48] sm:$0xff] }
  0x15   :  { %v178_v33 = vadd.f32 %v808_v6, %v110_v25  ;;  %v193_v34 = vadd.f32 %v808_v6, %v125_v26  ;;  %v194_v35 = vadd.f32 %v808_v6, %v126_v27  ;;  %v209_v36 = vadd.f32 %v808_v6, %v141_v28  ;;  %v45_v25 = vld [vmem:[%s1602_s0 + $0xc0] sm:$0xff]  ;;  %v46_v27 = vld [vmem:[%s1602_s0 + $0xc8] sm:$0xff] }
  0x16   :  { %v210_v37 = vadd.f32 %v808_v6, %v142_v29  ;;  %v225_v38 = vmax.f32 %v161_v30, 0.0  ;;  %v226_v39 = vmax.f32 %v162_v31, 0.0  ;;  %v241_v40 = vmax.f32 %v177_v32, 0.0  ;;  %v61_v28 = vld [vmem:[%s1602_s0 + $0x140] sm:$0xff]  ;;  %v62_v29 = vld [vmem:[%s1602_s0 + $0x148] sm:$0xff] }
  0x17   :  { %v242_v41 = vmax.f32 %v178_v33, 0.0  ;;  %v257_v42 = vmax.f32 %v193_v34, 0.0  ;;  %v258_v43 = vmax.f32 %v194_v35, 0.0  ;;  %v273_v44 = vmax.f32 %v209_v36, 0.0  ;;  %v77_v30 = vld [vmem:[%s1602_s0 + $0x1c0] sm:$0xff]  ;;  %v78_v31 = vld [vmem:[%s1602_s0 + $0x1c8] sm:$0xff] }
  0x18   :  { %v274_v45 = vmax.f32 %v210_v37, 0.0  ;;  %v287_v46 = vpack.c.bf16 %v226_v39, %v225_v38  ;;  %v95_v58 = vmul.f32 %v800_v4, %v27_v49  ;;  %v96_v59 = vmul.f32 %v800_v4, %v28_v50 }
  0x19   :  { %v295_v47 = vpack.c.bf16 %v242_v41, %v241_v40  ;;  %v303_v48 = vpack.c.bf16 %v258_v43, %v257_v42  ;;  %v111_v60 = vmul.f32 %v800_v4, %v43_v51  ;;  %v112_v61 = vmul.f32 %v800_v4, %v44_v53 }
  0x1a   :  { %v311_v52 = vpack.c.bf16 %v274_v45, %v273_v44  ;;  %v127_v62 = vmul.f32 %v800_v4, %v59_v54  ;;  %v128_v63 = vmul.f32 %v800_v4, %v60_v55  ;;  %v143_v0 = vmul.f32 %v800_v4, %v75_v56 }
  0x1b   :  { %v144_v1 = vmul.f32 %v800_v4, %v76_v57  ;;  %v163_v2 = vadd.f32 %v808_v6, %v95_v58  ;;  %v164_v3 = vadd.f32 %v808_v6, %v96_v59  ;;  %v179_v5 = vadd.f32 %v808_v6, %v111_v60  ;;  %v31_v59 = vld [vmem:[%s1602_s0 + $0x50] sm:$0xff]  ;;  %v32_v60 = vld [vmem:[%s1602_s0 + $0x58] sm:$0xff] }
  0x1c   :  { %722 = vmatmul.msk.bf16.gmra.mxu0 %vm382_vm1, %v286_v10  ;;  %v180_v7 = vadd.f32 %v808_v6, %v112_v61  ;;  %v195_v8 = vadd.f32 %v808_v6, %v127_v62  ;;  %v196_v9 = vadd.f32 %v808_v6, %v128_v63  ;;  %v211_v10 = vadd.f32 %v808_v6, %v143_v0  ;;  %v47_v61 = vld [vmem:[%s1602_s0 + $0xd0] sm:$0xff]  ;;  %v48_v63 = vld [vmem:[%s1602_s0 + $0xd8] sm:$0xff] }
  0x1d   :  { %730 = vmatmul.msk.bf16.gmra.mxu1 %vm382_vm1, %v294_v11  ;;  %v212_v11 = vadd.f32 %v808_v6, %v144_v1  ;;  %v228_v13 = vmax.f32 %v164_v3, 0.0  ;;  %v243_v14 = vmax.f32 %v179_v5, 0.0  ;;  %v97_v32 = vmul.f32 %v800_v4, %v29_v23  ;;  %v63_v0 = vld [vmem:[%s1602_s0 + $0x150] sm:$0xff]  ;;  %v64_v1 = vld [vmem:[%s1602_s0 + $0x158] sm:$0xff] }
  0x1e   :  { %v244_v15 = vmax.f32 %v180_v7, 0.0  ;;  %v260_v17 = vmax.f32 %v196_v9, 0.0  ;;  %v275_v18 = vmax.f32 %v211_v10, 0.0  ;;  %v98_v33 = vmul.f32 %v800_v4, %v30_v24  ;;  %v80_v3 = vld [vmem:[%s1602_s0 + $0x1d8] sm:$0xff] }
  0x1f   :  { %738 = vmatmul.msk.bf16.gmra.mxu2 %vm382_vm1, %v302_v12  ;;  %v227_v12 = vmax.f32 %v163_v2, 0.0  ;;  %v276_v19 = vmax.f32 %v212_v11, 0.0  ;;  %v113_v34 = vmul.f32 %v800_v4, %v45_v25  ;;  %v114_v35 = vmul.f32 %v800_v4, %v46_v27  ;;  %v79_v2 = vld [vmem:[%s1602_s0 + $0x1d0] sm:$0xff] }
  0x20   :  { %746 = vmatmul.msk.bf16.gmra.mxu3 %vm382_vm1, %v310_v16  ;;  %v259_v16 = vmax.f32 %v195_v8, 0.0  ;;  %v296_v21 = vpack.c.bf16 %v244_v15, %v243_v14  ;;  %v129_v36 = vmul.f32 %v800_v4, %v61_v28  ;;  %v130_v37 = vmul.f32 %v800_v4, %v62_v29 }
  0x21   :  { %v288_v20 = vpack.c.bf16 %v228_v13, %v227_v12  ;;  %v312_v26 = vpack.c.bf16 %v276_v19, %v275_v18  ;;  %v145_v38 = vmul.f32 %v800_v4, %v77_v30  ;;  %v146_v39 = vmul.f32 %v800_v4, %v78_v31 }
  0x22   :  { %v304_v22 = vpack.c.bf16 %v260_v17, %v259_v16  ;;  %v165_v40 = vadd.f32 %v808_v6, %v97_v32  ;;  %v166_v41 = vadd.f32 %v808_v6, %v98_v33  ;;  %v181_v42 = vadd.f32 %v808_v6, %v113_v34  ;;  %v33_v33 = vld [vmem:[%s1602_s0 + $0x60] sm:$0xff]  ;;  %v34_v34 = vld [vmem:[%s1602_s0 + $0x68] sm:$0xff] }
  0x23   :  { %v182_v43 = vadd.f32 %v808_v6, %v114_v35  ;;  %v197_v44 = vadd.f32 %v808_v6, %v129_v36  ;;  %v198_v45 = vadd.f32 %v808_v6, %v130_v37  ;;  %v99_v5 = vmul.f32 %v800_v4, %v31_v59  ;;  %v49_v35 = vld [vmem:[%s1602_s0 + $0xe0] sm:$0xff]  ;;  %v50_v37 = vld [vmem:[%s1602_s0 + $0xe8] sm:$0xff] }
  0x24   :  { %v230_v49 = vmax.f32 %v166_v41, 0.0  ;;  %v245_v50 = vmax.f32 %v181_v42, 0.0  ;;  %v100_v7 = vmul.f32 %v800_v4, %v32_v60  ;;  %v115_v8 = vmul.f32 %v800_v4, %v47_v61  ;;  %v82_v41 = vld [vmem:[%s1602_s0 + $0x1e8] sm:$0xff] }
  0x25   :  { %v246_v51 = vmax.f32 %v182_v43, 0.0  ;;  %v262_v53 = vmax.f32 %v198_v45, 0.0  ;;  %v116_v9 = vmul.f32 %v800_v4, %v48_v63  ;;  %v131_v10 = vmul.f32 %v800_v4, %v63_v0 }
  0x26   :  { %v132_v11 = vmul.f32 %v800_v4, %v64_v1  ;;  %v147_v12 = vmul.f32 %v800_v4, %v79_v2  ;;  %v148_v13 = vmul.f32 %v800_v4, %v80_v3  ;;  %v167_v14 = vadd.f32 %v808_v6, %v99_v5 }
  0x27   :  { %v297_v57 = vpack.c.bf16 %v246_v51, %v245_v50  ;;  %v168_v15 = vadd.f32 %v808_v6, %v100_v7  ;;  %v183_v16 = vadd.f32 %v808_v6, %v115_v8  ;;  %v184_v17 = vadd.f32 %v808_v6, %v116_v9  ;;  %v35_v7 = vld [vmem:[%s1602_s0 + $0x70] sm:$0xff]  ;;  %v36_v8 = vld [vmem:[%s1602_s0 + $0x78] sm:$0xff] }
  0x28   :  { %v199_v18 = vadd.f32 %v808_v6, %v131_v10  ;;  %v200_v19 = vadd.f32 %v808_v6, %v132_v11  ;;  %v101_v42 = vmul.f32 %v800_v4, %v33_v33  ;;  %v102_v43 = vmul.f32 %v800_v4, %v34_v34  ;;  %v51_v9 = vld [vmem:[%s1602_s0 + $0xf0] sm:$0xff]  ;;  %v52_v11 = vld [vmem:[%s1602_s0 + $0xf8] sm:$0xff] }
  0x29   :  { %v232_v23 = vmax.f32 %v168_v15, 0.0  ;;  %v247_v24 = vmax.f32 %v183_v16, 0.0  ;;  %v248_v25 = vmax.f32 %v184_v17, 0.0  ;;  %v118_v45 = vmul.f32 %v800_v4, %v50_v37  ;;  %v84_v15 = vld [vmem:[%s1602_s0 + $0x1f8] sm:$0xff] }
  0x2a   :  { %v264_v27 = vmax.f32 %v200_v19, 0.0  ;;  %v169_v50 = vadd.f32 %v808_v6, %v101_v42  ;;  %v170_v51 = vadd.f32 %v808_v6, %v102_v43  ;;  %v103_v16 = vmul.f32 %v800_v4, %v35_v7  ;;  %v334_v43 = vld [vmem:[%s1605_s4 + $0x80] sm:$0xff] }
  0x2b   :  { %v298_v31 = vpack.c.bf16 %v248_v25, %v247_v24  ;;  %v104_v17 = vmul.f32 %v800_v4, %v36_v8  ;;  %v120_v19 = vmul.f32 %v800_v4, %v52_v11  ;;  %v368_v11 = vld [vmem:[%s1605_s4 + $0x190] sm:$0xff] }
  0x2c   :  { %723 = vmatmul.msk.bf16.gmra.mxu0 %vm382_vm1, %v287_v46  ;;  %v213_v46 = vadd.f32 %v808_v6, %v145_v38  ;;  %v65_v38 = vld [vmem:[%s1602_s0 + $0x160] sm:$0xff]  ;;  %v234_v59 = vmax.f32 %v170_v51, 0.0  ;;  %v171_v24 = vadd.f32 %v808_v6, %v103_v16 }
  0x2d   :  { %731 = vmatmul.msk.bf16.gmra.mxu1 %vm382_vm1, %v295_v47  ;;  %v214_v47 = vadd.f32 %v808_v6, %v146_v39  ;;  %v66_v39 = vld [vmem:[%s1602_s0 + $0x168] sm:$0xff]  ;;  %v172_v25 = vadd.f32 %v808_v6, %v104_v17 }
  0x2e   :  { %v277_v54 = vmax.f32 %v213_v46, 0.0  ;;  %v133_v46 = vmul.f32 %v800_v4, %v65_v38 }
  0x2f   :  { %739 = vmatmul.msk.bf16.gmra.mxu2 %vm382_vm1, %v303_v48  ;;  %v229_v48 = vmax.f32 %v165_v40, 0.0  ;;  %v278_v55 = vmax.f32 %v214_v47, 0.0  ;;  %v81_v40 = vld [vmem:[%s1602_s0 + $0x1e0] sm:$0xff]  ;;  %v134_v47 = vmul.f32 %v800_v4, %v66_v39  ;;  %v236_v33 = vmax.f32 %v172_v25, 0.0 }
  0x30   :  { %747 = vmatmul.msk.bf16.gmra.mxu3 %vm382_vm1, %v311_v52  ;;  %v261_v52 = vmax.f32 %v197_v44, 0.0  ;;  %v117_v44 = vmul.f32 %v800_v4, %v49_v35 }
  0x31   :  { %v289_v56 = vpack.c.bf16 %v230_v49, %v229_v48  ;;  %v313_v62 = vpack.c.bf16 %v278_v55, %v277_v54  ;;  %v149_v48 = vmul.f32 %v800_v4, %v81_v40  ;;  %v150_v49 = vmul.f32 %v800_v4, %v82_v41 }
  0x32   :  { %v305_v58 = vpack.c.bf16 %v262_v53, %v261_v52  ;;  %v185_v52 = vadd.f32 %v808_v6, %v117_v44  ;;  %v186_v53 = vadd.f32 %v808_v6, %v118_v45  ;;  %v201_v54 = vadd.f32 %v808_v6, %v133_v46 }
  0x33   :  { %v202_v55 = vadd.f32 %v808_v6, %v134_v47 }
  0x34   :  { %v249_v60 = vmax.f32 %v185_v52, 0.0  ;;  %v250_v61 = vmax.f32 %v186_v53, 0.0  ;;  %v335_v52 = vld [vmem:[%s1605_s4 + $0x88] sm:$0xff] }
  0x35   :  { %v266_v63 = vmax.f32 %v202_v55, 0.0 }
  0x36   :  { %v299_v3 = vpack.c.bf16 %v250_v61, %v249_v60  ;;  %v351_v60 = vld [vmem:[%s1605_s4 + $0x108] sm:$0xff] }
  0x37   :  { %v367_v61 = vld [vmem:[%s1605_s4 + $0x188] sm:$0xff] }
  0x3c   :  { %724 = vmatmul.msk.bf16.gmra.mxu0 %vm382_vm1, %v288_v20  ;;  %v215_v20 = vadd.f32 %v808_v6, %v147_v12  ;;  %v67_v12 = vld [vmem:[%s1602_s0 + $0x170] sm:$0xff] }
  0x3d   :  { %732 = vmatmul.msk.bf16.gmra.mxu1 %vm382_vm1, %v296_v21  ;;  %v216_v21 = vadd.f32 %v808_v6, %v148_v13  ;;  %v68_v13 = vld [vmem:[%s1602_s0 + $0x178] sm:$0xff] }
  0x3e   :  { %v279_v28 = vmax.f32 %v215_v20, 0.0  ;;  %v135_v20 = vmul.f32 %v800_v4, %v67_v12  ;;  %v321_v12 = vld [vmem:[%s1605_s4 + $0x18] sm:$0xff] }
  0x3f   :  { %740 = vmatmul.msk.bf16.gmra.mxu2 %vm382_vm1, %v304_v22  ;;  %v231_v22 = vmax.f32 %v167_v14, 0.0  ;;  %v280_v29 = vmax.f32 %v216_v21, 0.0  ;;  %v83_v14 = vld [vmem:[%s1602_s0 + $0x1f0] sm:$0xff]  ;;  %v136_v21 = vmul.f32 %v800_v4, %v68_v13 }
  0x40   :  { %748 = vmatmul.msk.bf16.gmra.mxu3 %vm382_vm1, %v312_v26  ;;  %v263_v26 = vmax.f32 %v199_v18, 0.0  ;;  %v119_v18 = vmul.f32 %v800_v4, %v51_v9 }
  0x41   :  { %v290_v30 = vpack.c.bf16 %v232_v23, %v231_v22  ;;  %v314_v36 = vpack.c.bf16 %v280_v29, %v279_v28  ;;  %v151_v22 = vmul.f32 %v800_v4, %v83_v14  ;;  %v152_v23 = vmul.f32 %v800_v4, %v84_v15  ;;  %v337_v14 = vld [vmem:[%s1605_s4 + $0x98] sm:$0xff] }
  0x42   :  { %v306_v32 = vpack.c.bf16 %v264_v27, %v263_v26  ;;  %v187_v26 = vadd.f32 %v808_v6, %v119_v18  ;;  %v188_v27 = vadd.f32 %v808_v6, %v120_v19  ;;  %v203_v28 = vadd.f32 %v808_v6, %v135_v20 }
  0x43   :  { %v204_v29 = vadd.f32 %v808_v6, %v136_v21 }
  0x44   :  { %v251_v34 = vmax.f32 %v187_v26, 0.0  ;;  %v252_v4 = vmax.f32 %v188_v27, 0.0  ;;  %v267_v35 = vmax.f32 %v203_v28, 0.0  ;;  %v338_v26 = vld [vmem:[%s1605_s4 + $0xa0] sm:$0xff] }
  0x46   :  { %v300_v40 = vpack.c.bf16 %v252_v4, %v251_v34  ;;  %v354_v34 = vld [vmem:[%s1605_s4 + $0x120] sm:$0xff] }
  0x47   :  { %v370_v4 = vld [vmem:[%s1605_s4 + $0x1a0] sm:$0xff] }
  0x4c   :  { %725 = vmatmul.msk.bf16.gmra.mxu0 %vm382_vm1, %v289_v56  ;;  %v217_v56 = vadd.f32 %v808_v6, %v149_v48  ;;  %v350_v48 = vld [vmem:[%s1605_s4 + $0x100] sm:$0xff] }
  0x4d   :  { %733 = vmatmul.msk.bf16.gmra.mxu1 %vm382_vm1, %v297_v57  ;;  %v218_v57 = vadd.f32 %v808_v6, %v150_v49  ;;  %v366_v49 = vld [vmem:[%s1605_s4 + $0x180] sm:$0xff] }
  0x4e   :  { %v281_v0 = vmax.f32 %v217_v56, 0.0 }
  0x4f   :  { %741 = vmatmul.msk.bf16.gmra.mxu2 %vm382_vm1, %v305_v58  ;;  %v233_v58 = vmax.f32 %v169_v50, 0.0  ;;  %v282_v1 = vmax.f32 %v218_v57, 0.0  ;;  %v319_v50 = vld [vmem:[%s1605_s4 + $0x8] sm:$0xff] }
  0x50   :  { %749 = vmatmul.msk.bf16.gmra.mxu3 %vm382_vm1, %v313_v62  ;;  %v265_v62 = vmax.f32 %v201_v54, 0.0 }
  0x51   :  { %v291_v2 = vpack.c.bf16 %v234_v59, %v233_v58  ;;  %v315_v10 = vpack.c.bf16 %v282_v1, %v281_v0  ;;  %v336_v0 = vld [vmem:[%s1605_s4 + $0x90] sm:$0xff] }
  0x52   :  { %v307_v5 = vpack.c.bf16 %v266_v63, %v265_v62  ;;  %v320_v62 = vld [vmem:[%s1605_s4 + $0x10] sm:$0xff] }
  0x5c   :  { %726 = vmatmul.msk.bf16.gmra.mxu0 %vm382_vm1, %v290_v30  ;;  %v219_v30 = vadd.f32 %v808_v6, %v151_v22  ;;  %v353_v22 = vld [vmem:[%s1605_s4 + $0x118] sm:$0xff] }
  0x5d   :  { %734 = vmatmul.msk.bf16.gmra.mxu1 %vm382_vm1, %v298_v31  ;;  %v220_v31 = vadd.f32 %v808_v6, %v152_v23  ;;  %v318_v6 = vld [vmem:[%s1605_s4] sm:$0xff]  ;;  %v369_v23 = vld [vmem:[%s1605_s4 + $0x198] sm:$0xff] }
  0x5e   :  { %v283_v37 = vmax.f32 %v219_v30, 0.0 }
  0x5f   :  { %742 = vmatmul.msk.bf16.gmra.mxu2 %vm382_vm1, %v306_v32  ;;  %v235_v32 = vmax.f32 %v171_v24, 0.0  ;;  %v284_v38 = vmax.f32 %v220_v31, 0.0  ;;  %v322_v24 = vld [vmem:[%s1605_s4 + $0x20] sm:$0xff] }
  0x60   :  { %750 = vmatmul.msk.bf16.gmra.mxu3 %vm382_vm1, %v314_v36  ;;  %v268_v36 = vmax.f32 %v204_v29, 0.0 }
  0x61   :  { %v292_v39 = vpack.c.bf16 %v236_v33, %v235_v32  ;;  %v316_v42 = vpack.c.bf16 %v284_v38, %v283_v37  ;;  %v339_v37 = vld [vmem:[%s1605_s4 + $0xa8] sm:$0xff] }
  0x62   :  { %v308_v41 = vpack.c.bf16 %v268_v36, %v267_v35  ;;  %v323_v35 = vld [vmem:[%s1605_s4 + $0x28] sm:$0xff] }
  0x6c   :  { %727 = vmatmul.msk.bf16.gmra.mxu0 %vm382_vm1, %v291_v2 }
  0x6d   :  { %735 = vmatmul.msk.bf16.gmra.mxu1 %vm382_vm1, %v299_v3 }
  0x6f   :  { %743 = vmatmul.msk.bf16.gmra.mxu2 %vm382_vm1, %v307_v5 }
  0x70   :  { %751 = vmatmul.msk.bf16.gmra.mxu3 %vm382_vm1, %v315_v10  ;;  %v352_v10 = vld [vmem:[%s1605_s4 + $0x110] sm:$0xff] }
  0x7c   :  { %728 = vmatmul.msk.bf16.gmra.mxu0 %vm382_vm1, %v292_v39 }
  0x7d   :  { %736 = vmatmul.msk.bf16.gmra.mxu1 %vm382_vm1, %v300_v40 }
  0x7f   :  { %744 = vmatmul.msk.bf16.gmra.mxu2 %vm382_vm1, %v308_v41 }
  0x80   :  { %752 = vmatmul.msk.bf16.gmra.mxu3 %vm382_vm1, %v316_v42 }
  0x89   :  { %v492_v44 = vpop.f32.mrf.mxu0 }
  0x8a   :  { %v493_v45 = vadd.f32 %v492_v44, %v318_v6  ;;  %v532_v46 = vpop.f32.mrf.mxu1  ;;  %v355_v44 = vld [vmem:[%s1605_s4 + $0x128] sm:$0xff] }
  0x8b   :  { %v533_v47 = vadd.f32 %v532_v46, %v334_v43  ;;  %v324_v46 = vld [vmem:[%s1605_s4 + $0x30] sm:$0xff] }
  0x8c   :  { %653 = vst.msk [vmem:[%s1606_s5] sm:$0xff] %vm652_vm2, %v493_v45  ;;  %v371_v45 = vld [vmem:[%s1605_s4 + $0x1a8] sm:$0xff] }
  0x8d   :  { %669 = vst.msk [vmem:[%s1606_s5 + $0x80] sm:$0xff] %vm652_vm2, %v533_v47 }
  0x91   :  { %v494_v55 = vpop.f32.mrf.mxu0 }
  0x92   :  { %v572_v51 = vpop.f32.mrf.mxu2  ;;  %v495_v57 = vadd.f32 %v494_v55, %v319_v50  ;;  %v534_v58 = vpop.f32.mrf.mxu1 }
  0x93   :  { %v573_v53 = vadd.f32 %v572_v51, %v350_v48  ;;  %v612_v54 = vpop.f32.mrf.mxu3  ;;  %v535_v59 = vadd.f32 %v534_v58, %v335_v52  ;;  %v340_v48 = vld [vmem:[%s1605_s4 + $0xb0] sm:$0xff]  ;;  %v325_v58 = vld [vmem:[%s1605_s4 + $0x38] sm:$0xff] }
  0x94   :  { %v613_v56 = vadd.f32 %v612_v54, %v366_v49  ;;  %654 = vst.msk [vmem:[%s1606_s5 + $0x8] sm:$0xff] %vm652_vm2, %v495_v57  ;;  %v372_v57 = vld [vmem:[%s1605_s4 + $0x1b0] sm:$0xff] }
  0x95   :  { %685 = vst.msk [vmem:[%s1606_s5 + $0x100] sm:$0xff] %vm652_vm2, %v573_v53 }
  0x96   :  { %701 = vst.msk [vmem:[%s1606_s5 + $0x180] sm:$0xff] %vm652_vm2, %v613_v56  ;;  %v356_v56 = vld [vmem:[%s1605_s4 + $0x130] sm:$0xff] }
  0x97   :  { %670 = vst.msk [vmem:[%s1606_s5 + $0x88] sm:$0xff] %vm652_vm2, %v535_v59 }
  0x99   :  { %v497_v3 = vpop.f32.mrf.mxu0 }
  0x9a   :  { %v574_v63 = vpop.f32.mrf.mxu2  ;;  %v498_v7 = vadd.f32 %v497_v3, %v320_v62  ;;  %v537_v8 = vpop.f32.mrf.mxu1 }
  0x9b   :  { %v575_v1 = vadd.f32 %v574_v63, %v351_v60  ;;  %v614_v2 = vpop.f32.mrf.mxu3  ;;  %v538_v9 = vadd.f32 %v537_v8, %v336_v0  ;;  %v341_v60 = vld [vmem:[%s1605_s4 + $0xb8] sm:$0xff]  ;;  %v326_v8 = vld [vmem:[%s1605_s4 + $0x40] sm:$0xff] }
  0x9c   :  { %v615_v5 = vadd.f32 %v614_v2, %v367_v61  ;;  %655 = vst.msk [vmem:[%s1606_s5 + $0x10] sm:$0xff] %vm652_vm2, %v498_v7  ;;  %v373_v7 = vld [vmem:[%s1605_s4 + $0x1b8] sm:$0xff] }
  0x9d   :  { %686 = vst.msk [vmem:[%s1606_s5 + $0x108] sm:$0xff] %vm652_vm2, %v575_v1 }
  0x9e   :  { %702 = vst.msk [vmem:[%s1606_s5 + $0x188] sm:$0xff] %vm652_vm2, %v615_v5  ;;  %v357_v5 = vld [vmem:[%s1605_s4 + $0x138] sm:$0xff] }
  0x9f   :  { %671 = vst.msk [vmem:[%s1606_s5 + $0x90] sm:$0xff] %vm652_vm2, %v538_v9 }
  0xa1   :  { %v499_v17 = vpop.f32.mrf.mxu0 }
  0xa2   :  { %v577_v13 = vpop.f32.mrf.mxu2  ;;  %v500_v19 = vadd.f32 %v499_v17, %v321_v12  ;;  %v539_v20 = vpop.f32.mrf.mxu1 }
  0xa3   :  { %v578_v15 = vadd.f32 %v577_v13, %v352_v10  ;;  %v617_v16 = vpop.f32.mrf.mxu3  ;;  %v540_v21 = vadd.f32 %v539_v20, %v337_v14  ;;  %v342_v10 = vld [vmem:[%s1605_s4 + $0xc0] sm:$0xff]  ;;  %v327_v20 = vld [vmem:[%s1605_s4 + $0x48] sm:$0xff] }
  0xa4   :  { %v618_v18 = vadd.f32 %v617_v16, %v368_v11  ;;  %656 = vst.msk [vmem:[%s1606_s5 + $0x18] sm:$0xff] %vm652_vm2, %v500_v19  ;;  %v374_v19 = vld [vmem:[%s1605_s4 + $0x1c0] sm:$0xff] }
  0xa5   :  { %687 = vst.msk [vmem:[%s1606_s5 + $0x110] sm:$0xff] %vm652_vm2, %v578_v15 }
  0xa6   :  { %703 = vst.msk [vmem:[%s1606_s5 + $0x190] sm:$0xff] %vm652_vm2, %v618_v18  ;;  %v358_v18 = vld [vmem:[%s1605_s4 + $0x140] sm:$0xff] }
  0xa7   :  { %672 = vst.msk [vmem:[%s1606_s5 + $0x98] sm:$0xff] %vm652_vm2, %v540_v21 }
  0xa9   :  { %v502_v29 = vpop.f32.mrf.mxu0 }
  0xaa   :  { %v579_v25 = vpop.f32.mrf.mxu2  ;;  %v503_v31 = vadd.f32 %v502_v29, %v322_v24  ;;  %v542_v32 = vpop.f32.mrf.mxu1 }
  0xab   :  { %v580_v27 = vadd.f32 %v579_v25, %v353_v22  ;;  %v619_v28 = vpop.f32.mrf.mxu3  ;;  %v543_v33 = vadd.f32 %v542_v32, %v338_v26  ;;  %v343_v22 = vld [vmem:[%s1605_s4 + $0xc8] sm:$0xff]  ;;  %v328_v32 = vld [vmem:[%s1605_s4 + $0x50] sm:$0xff] }
  0xac   :  { %v620_v30 = vadd.f32 %v619_v28, %v369_v23  ;;  %657 = vst.msk [vmem:[%s1606_s5 + $0x20] sm:$0xff] %vm652_vm2, %v503_v31  ;;  %v375_v31 = vld [vmem:[%s1605_s4 + $0x1c8] sm:$0xff] }
  0xad   :  { %688 = vst.msk [vmem:[%s1606_s5 + $0x118] sm:$0xff] %vm652_vm2, %v580_v27 }
  0xae   :  { %704 = vst.msk [vmem:[%s1606_s5 + $0x198] sm:$0xff] %vm652_vm2, %v620_v30  ;;  %v359_v30 = vld [vmem:[%s1605_s4 + $0x148] sm:$0xff] }
  0xaf   :  { %673 = vst.msk [vmem:[%s1606_s5 + $0xa0] sm:$0xff] %vm652_vm2, %v543_v33 }
  0xb1   :  { %v504_v40 = vpop.f32.mrf.mxu0 }
  0xb2   :  { %v582_v36 = vpop.f32.mrf.mxu2  ;;  %v505_v42 = vadd.f32 %v504_v40, %v323_v35  ;;  %v544_v6 = vpop.f32.mrf.mxu1 }
  0xb3   :  { %v583_v38 = vadd.f32 %v582_v36, %v354_v34  ;;  %v622_v39 = vpop.f32.mrf.mxu3  ;;  %v545_v43 = vadd.f32 %v544_v6, %v339_v37  ;;  %v344_v34 = vld [vmem:[%s1605_s4 + $0xd0] sm:$0xff]  ;;  %v329_v6 = vld [vmem:[%s1605_s4 + $0x58] sm:$0xff] }
  0xb4   :  { %v623_v41 = vadd.f32 %v622_v39, %v370_v4  ;;  %658 = vst.msk [vmem:[%s1606_s5 + $0x28] sm:$0xff] %vm652_vm2, %v505_v42  ;;  %v376_v42 = vld [vmem:[%s1605_s4 + $0x1d0] sm:$0xff] }
  0xb5   :  { %689 = vst.msk [vmem:[%s1606_s5 + $0x120] sm:$0xff] %vm652_vm2, %v583_v38 }
  0xb6   :  { %705 = vst.msk [vmem:[%s1606_s5 + $0x1a0] sm:$0xff] %vm652_vm2, %v623_v41  ;;  %v360_v41 = vld [vmem:[%s1605_s4 + $0x150] sm:$0xff] }
  0xb7   :  { %674 = vst.msk [vmem:[%s1606_s5 + $0xa8] sm:$0xff] %vm652_vm2, %v545_v43 }
  0xb9   :  { %v507_v51 = vpop.f32.mrf.mxu0 }
  0xba   :  { %v584_v47 = vpop.f32.mrf.mxu2  ;;  %v508_v53 = vadd.f32 %v507_v51, %v324_v46  ;;  %v547_v54 = vpop.f32.mrf.mxu1 }
  0xbb   :  { %v585_v49 = vadd.f32 %v584_v47, %v355_v44  ;;  %v624_v50 = vpop.f32.mrf.mxu3  ;;  %v548_v55 = vadd.f32 %v547_v54, %v340_v48  ;;  %v345_v44 = vld [vmem:[%s1605_s4 + $0xd8] sm:$0xff]  ;;  %v330_v54 = vld [vmem:[%s1605_s4 + $0x60] sm:$0xff] }
  0xbc   :  { %v625_v52 = vadd.f32 %v624_v50, %v371_v45  ;;  %659 = vst.msk [vmem:[%s1606_s5 + $0x30] sm:$0xff] %vm652_vm2, %v508_v53  ;;  %v377_v53 = vld [vmem:[%s1605_s4 + $0x1d8] sm:$0xff] }
  0xbd   :  { %690 = vst.msk [vmem:[%s1606_s5 + $0x128] sm:$0xff] %vm652_vm2, %v585_v49 }
  0xbe   :  { %706 = vst.msk [vmem:[%s1606_s5 + $0x1a8] sm:$0xff] %vm652_vm2, %v625_v52  ;;  %v361_v52 = vld [vmem:[%s1605_s4 + $0x158] sm:$0xff] }
  0xbf   :  { %675 = vst.msk [vmem:[%s1606_s5 + $0xb0] sm:$0xff] %vm652_vm2, %v548_v55 }
  0xc1   :  { %v509_v63 = vpop.f32.mrf.mxu0 }
  0xc2   :  { %v587_v59 = vpop.f32.mrf.mxu2  ;;  %v510_v1 = vadd.f32 %v509_v63, %v325_v58  ;;  %v549_v2 = vpop.f32.mrf.mxu1 }
  0xc3   :  { %v588_v61 = vadd.f32 %v587_v59, %v356_v56  ;;  %v627_v62 = vpop.f32.mrf.mxu3  ;;  %v550_v3 = vadd.f32 %v549_v2, %v341_v60  ;;  %v346_v56 = vld [vmem:[%s1605_s4 + $0xe0] sm:$0xff]  ;;  %v331_v2 = vld [vmem:[%s1605_s4 + $0x68] sm:$0xff] }
  0xc4   :  { %v628_v0 = vadd.f32 %v627_v62, %v372_v57  ;;  %660 = vst.msk [vmem:[%s1606_s5 + $0x38] sm:$0xff] %vm652_vm2, %v510_v1  ;;  %v378_v1 = vld [vmem:[%s1605_s4 + $0x1e0] sm:$0xff] }
  0xc5   :  { %691 = vst.msk [vmem:[%s1606_s5 + $0x130] sm:$0xff] %vm652_vm2, %v588_v61 }
  0xc6   :  { %707 = vst.msk [vmem:[%s1606_s5 + $0x1b0] sm:$0xff] %vm652_vm2, %v628_v0  ;;  %v362_v0 = vld [vmem:[%s1605_s4 + $0x160] sm:$0xff] }
  0xc7   :  { %676 = vst.msk [vmem:[%s1606_s5 + $0xb8] sm:$0xff] %vm652_vm2, %v550_v3 }
  0xc9   :  { %v512_v13 = vpop.f32.mrf.mxu0 }
  0xca   :  { %v589_v9 = vpop.f32.mrf.mxu2  ;;  %v513_v15 = vadd.f32 %v512_v13, %v326_v8  ;;  %v552_v16 = vpop.f32.mrf.mxu1 }
  0xcb   :  { %v590_v11 = vadd.f32 %v589_v9, %v357_v5  ;;  %v629_v12 = vpop.f32.mrf.mxu3  ;;  %v553_v17 = vadd.f32 %v552_v16, %v342_v10  ;;  %v347_v5 = vld [vmem:[%s1605_s4 + $0xe8] sm:$0xff]  ;;  %v332_v16 = vld [vmem:[%s1605_s4 + $0x70] sm:$0xff] }
  0xcc   :  { %v630_v14 = vadd.f32 %v629_v12, %v373_v7  ;;  %661 = vst.msk [vmem:[%s1606_s5 + $0x40] sm:$0xff] %vm652_vm2, %v513_v15  ;;  %v379_v15 = vld [vmem:[%s1605_s4 + $0x1e8] sm:$0xff] }
  0xcd   :  { %692 = vst.msk [vmem:[%s1606_s5 + $0x138] sm:$0xff] %vm652_vm2, %v590_v11 }
  0xce   :  { %708 = vst.msk [vmem:[%s1606_s5 + $0x1b8] sm:$0xff] %vm652_vm2, %v630_v14  ;;  %v363_v14 = vld [vmem:[%s1605_s4 + $0x168] sm:$0xff] }
  0xcf   :  { %677 = vst.msk [vmem:[%s1606_s5 + $0xc0] sm:$0xff] %vm652_vm2, %v553_v17 }
  0xd1   :  { %v514_v25 = vpop.f32.mrf.mxu0 }
  0xd2   :  { %v592_v21 = vpop.f32.mrf.mxu2  ;;  %v515_v27 = vadd.f32 %v514_v25, %v327_v20  ;;  %v554_v28 = vpop.f32.mrf.mxu1 }
  0xd3   :  { %v593_v23 = vadd.f32 %v592_v21, %v358_v18  ;;  %v632_v24 = vpop.f32.mrf.mxu3  ;;  %v555_v29 = vadd.f32 %v554_v28, %v343_v22  ;;  %v348_v18 = vld [vmem:[%s1605_s4 + $0xf0] sm:$0xff]  ;;  %v333_v28 = vld [vmem:[%s1605_s4 + $0x78] sm:$0xff] }
  0xd4   :  { %v633_v26 = vadd.f32 %v632_v24, %v374_v19  ;;  %662 = vst.msk [vmem:[%s1606_s5 + $0x48] sm:$0xff] %vm652_vm2, %v515_v27  ;;  %v380_v27 = vld [vmem:[%s1605_s4 + $0x1f0] sm:$0xff] }
  0xd5   :  { %693 = vst.msk [vmem:[%s1606_s5 + $0x140] sm:$0xff] %vm652_vm2, %v593_v23 }
  0xd6   :  { %709 = vst.msk [vmem:[%s1606_s5 + $0x1c0] sm:$0xff] %vm652_vm2, %v633_v26  ;;  %v364_v26 = vld [vmem:[%s1605_s4 + $0x170] sm:$0xff] }
  0xd7   :  { %678 = vst.msk [vmem:[%s1606_s5 + $0xc8] sm:$0xff] %vm652_vm2, %v555_v29 }
  0xd9   :  { %v517_v36 = vpop.f32.mrf.mxu0 }
  0xda   :  { %v594_v33 = vpop.f32.mrf.mxu2  ;;  %v518_v38 = vadd.f32 %v517_v36, %v328_v32  ;;  %v557_v39 = vpop.f32.mrf.mxu1 }
  0xdb   :  { %v595_v4 = vadd.f32 %v594_v33, %v359_v30  ;;  %v634_v35 = vpop.f32.mrf.mxu3  ;;  %v558_v40 = vadd.f32 %v557_v39, %v344_v34  ;;  %v349_v30 = vld [vmem:[%s1605_s4 + $0xf8] sm:$0xff] }
  0xdc   :  { %v635_v37 = vadd.f32 %v634_v35, %v375_v31  ;;  %663 = vst.msk [vmem:[%s1606_s5 + $0x50] sm:$0xff] %vm652_vm2, %v518_v38  ;;  %v381_v38 = vld [vmem:[%s1605_s4 + $0x1f8] sm:$0xff] }
  0xdd   :  { %694 = vst.msk [vmem:[%s1606_s5 + $0x148] sm:$0xff] %vm652_vm2, %v595_v4 }
  0xde   :  { %710 = vst.msk [vmem:[%s1606_s5 + $0x1c8] sm:$0xff] %vm652_vm2, %v635_v37  ;;  %v365_v37 = vld [vmem:[%s1605_s4 + $0x178] sm:$0xff] }
  0xdf   :  { %679 = vst.msk [vmem:[%s1606_s5 + $0xd0] sm:$0xff] %vm652_vm2, %v558_v40 }
  0xe1   :  { %v519_v47 = vpop.f32.mrf.mxu0 }
  0xe2   :  { %v597_v43 = vpop.f32.mrf.mxu2  ;;  %v520_v49 = vadd.f32 %v519_v47, %v329_v6  ;;  %v559_v50 = vpop.f32.mrf.mxu1 }
  0xe3   :  { %v598_v45 = vadd.f32 %v597_v43, %v360_v41  ;;  %v637_v46 = vpop.f32.mrf.mxu3  ;;  %v560_v51 = vadd.f32 %v559_v50, %v345_v44 }
  0xe4   :  { %v638_v48 = vadd.f32 %v637_v46, %v376_v42  ;;  %664 = vst.msk [vmem:[%s1606_s5 + $0x58] sm:$0xff] %vm652_vm2, %v520_v49 }
  0xe5   :  { %695 = vst.msk [vmem:[%s1606_s5 + $0x150] sm:$0xff] %vm652_vm2, %v598_v45 }
  0xe6   :  { %711 = vst.msk [vmem:[%s1606_s5 + $0x1d0] sm:$0xff] %vm652_vm2, %v638_v48 }
  0xe7   :  { %680 = vst.msk [vmem:[%s1606_s5 + $0xd8] sm:$0xff] %vm652_vm2, %v560_v51 }
  0xe9   :  { %v522_v59 = vpop.f32.mrf.mxu0 }
  0xea   :  { %v599_v55 = vpop.f32.mrf.mxu2  ;;  %v523_v61 = vadd.f32 %v522_v59, %v330_v54  ;;  %v562_v62 = vpop.f32.mrf.mxu1 }
  0xeb   :  { %v600_v57 = vadd.f32 %v599_v55, %v361_v52  ;;  %v639_v58 = vpop.f32.mrf.mxu3  ;;  %v563_v63 = vadd.f32 %v562_v62, %v346_v56 }
  0xec   :  { %v640_v60 = vadd.f32 %v639_v58, %v377_v53  ;;  %665 = vst.msk [vmem:[%s1606_s5 + $0x60] sm:$0xff] %vm652_vm2, %v523_v61 }
  0xed   :  { %696 = vst.msk [vmem:[%s1606_s5 + $0x158] sm:$0xff] %vm652_vm2, %v600_v57 }
  0xee   :  { %712 = vst.msk [vmem:[%s1606_s5 + $0x1d8] sm:$0xff] %vm652_vm2, %v640_v60 }
  0xef   :  { %681 = vst.msk [vmem:[%s1606_s5 + $0xe0] sm:$0xff] %vm652_vm2, %v563_v63 }
  0xf1   :  { %v524_v9 = vpop.f32.mrf.mxu0 }
  0xf2   :  { %v602_v3 = vpop.f32.mrf.mxu2  ;;  %v525_v11 = vadd.f32 %v524_v9, %v331_v2  ;;  %v564_v12 = vpop.f32.mrf.mxu1 }
  0xf3   :  { %v603_v7 = vadd.f32 %v602_v3, %v362_v0  ;;  %v642_v8 = vpop.f32.mrf.mxu3  ;;  %v565_v13 = vadd.f32 %v564_v12, %v347_v5 }
  0xf4   :  { %v643_v10 = vadd.f32 %v642_v8, %v378_v1  ;;  %666 = vst.msk [vmem:[%s1606_s5 + $0x68] sm:$0xff] %vm652_vm2, %v525_v11 }
  0xf5   :  { %697 = vst.msk [vmem:[%s1606_s5 + $0x160] sm:$0xff] %vm652_vm2, %v603_v7 }
  0xf6   :  { %713 = vst.msk [vmem:[%s1606_s5 + $0x1e0] sm:$0xff] %vm652_vm2, %v643_v10 }
  0xf7   :  { %682 = vst.msk [vmem:[%s1606_s5 + $0xe8] sm:$0xff] %vm652_vm2, %v565_v13 }
  0xf9   :  { %v527_v21 = vpop.f32.mrf.mxu0 }
  0xfa   :  { %v604_v17 = vpop.f32.mrf.mxu2  ;;  %v528_v23 = vadd.f32 %v527_v21, %v332_v16  ;;  %v567_v24 = vpop.f32.mrf.mxu1 }
  0xfb   :  { %v605_v19 = vadd.f32 %v604_v17, %v363_v14  ;;  %v644_v20 = vpop.f32.mrf.mxu3  ;;  %v568_v25 = vadd.f32 %v567_v24, %v348_v18 }
  0xfc   :  { %v645_v22 = vadd.f32 %v644_v20, %v379_v15  ;;  %667 = vst.msk [vmem:[%s1606_s5 + $0x70] sm:$0xff] %vm652_vm2, %v528_v23 }
  0xfd   :  { %698 = vst.msk [vmem:[%s1606_s5 + $0x168] sm:$0xff] %vm652_vm2, %v605_v19 }
  0xfe   :  { %714 = vst.msk [vmem:[%s1606_s5 + $0x1e8] sm:$0xff] %vm652_vm2, %v645_v22 }
  0xff   :  { %683 = vst.msk [vmem:[%s1606_s5 + $0xf0] sm:$0xff] %vm652_vm2, %v568_v25 }
 0x101   :  { %v529_v33 = vpop.f32.mrf.mxu0 }
 0x102   :  { %v607_v29 = vpop.f32.mrf.mxu2  ;;  %v530_v4 = vadd.f32 %v529_v33, %v333_v28  ;;  %v569_v35 = vpop.f32.mrf.mxu1 }
 0x103   :  { %v608_v31 = vadd.f32 %v607_v29, %v364_v26  ;;  %v647_v32 = vpop.f32.mrf.mxu3  ;;  %v570_v36 = vadd.f32 %v569_v35, %v349_v30 }
 0x104   :  { %v648_v34 = vadd.f32 %v647_v32, %v380_v27  ;;  %668 = vst.msk [vmem:[%s1606_s5 + $0x78] sm:$0xff] %vm652_vm2, %v530_v4 }
 0x105   :  { %699 = vst.msk [vmem:[%s1606_s5 + $0x170] sm:$0xff] %vm652_vm2, %v608_v31 }
 0x106   :  { %715 = vst.msk [vmem:[%s1606_s5 + $0x1f0] sm:$0xff] %vm652_vm2, %v648_v34 }
 0x107   :  { %684 = vst.msk [vmem:[%s1606_s5 + $0xf8] sm:$0xff] %vm652_vm2, %v570_v36 }
 0x10a   :  { %v609_v39 = vpop.f32.mrf.mxu2 }
 0x10b   :  { %v610_v40 = vadd.f32 %v609_v39, %v365_v37  ;;  %v649_v41 = vpop.f32.mrf.mxu3 }
 0x10c   :  { %v650_v42 = vadd.f32 %v649_v41, %v381_v38 }
 0x10d   :  { %700 = vst.msk [vmem:[%s1606_s5 + $0x178] sm:$0xff] %vm652_vm2, %v610_v40 }
 0x10e   :  { %716 = vst.msk [vmem:[%s1606_s5 + $0x1f8] sm:$0xff] %vm652_vm2, %v650_v42 }

// kernel: bottleneck_forward.5
= control target key start
LH: loop header
LB: loop body
LE: loop exit
PB: predicated region body
PF: predicated region fallthrough
CT: control target
= control target key end

     0   :  { %s3224_s18 = smov 0   ;;  %s4804_s0 = inlined_call_operand.vmem [shape: f32[2,18,18,4], index: 0, kind: input, shape index: {}]   ;;  %s4805_s1 = inlined_call_operand.vmem [shape: f32[18,18,1], index: 1, kind: input, shape index: {}]   ;;  %s4806_s2 = inlined_call_operand.vmem [shape: f32[1,4], index: 2, kind: input, shape index: {}]   ;;  %s4807_s3 = inlined_call_operand.vmem [shape: f32[1,4], index: 3, kind: input, shape index: {}]   ;;  %s4808_s4 = inlined_call_operand.vmem [shape: bf16[9,4,4], index: 4, kind: input, shape index: {}]   ;;  %s4809_s5 = inlined_call_operand.vmem [shape: f32[2,256,4], index: 5, kind: output, shape index: {}]  }
   0x1 LB: > { %s2982_s19 = sadd.s32 4294967295, %s3191_s18   ;;  %p2986_p0 = scmp.ge.s32.totalorder %s3191_s18, 1  ;;  %s3191_s18 = sphi %s3224_s18, %s15_s18  }
   0x2   : > { %p187_p1 = scmp.lt.s32.totalorder %s3191_s18, 3 }
   0x4   : > { %p188_p2 = pnand %p2986_p0, %p187_p1 }
   0x6   : > { %191 = sbr.rel (%p188_p2) target bundleno = 927 (0x39f), region = 40 }
   0xb   : > { %v486_v0 = vld [vmem:[%s4805_s1 + $0x120] sm:$0xff]  ;;  %v3193_v3 = vmov 0   ;;  %v487_v4 = vld [vmem:[%s4805_s1 + $0x128] sm:$0xff]  ;;  %v488_v7 = vld [vmem:[%s4805_s1 + $0x130] sm:$0x3]  ;;  %p215_p3 = scmp.lt.s32.totalorder %s2982_s19, 1 }
   0xc   : > { %v474_v1 = vld [vmem:[%s4805_s1 + $0xc0] sm:$0xff]  ;;  %3178 = vset.pattern.permute.xlu2 %v3193_v3  ;;  %3177 = vset.pattern.permute.xlu1 %v3193_v3  ;;  %v475_v5 = vld [vmem:[%s4805_s1 + $0xc8] sm:$0xff]  ;;  %v476_v8 = vld [vmem:[%s4805_s1 + $0xd0] sm:$0x3]  ;;  %vm1369_vm0 = vcmask 1041408   ;;  %vm1320_vm4 = vcmask 31744  }
   0xd   : > { %v462_v2 = vld [vmem:[%s4805_s1 + $0x60] sm:$0xff]  ;;  %3176 = vset.pattern.permute.xlu0 %v3193_v3  ;;  %686 = vperm.xlu1 %3177, %v486_v0   ;;  %v463_v6 = vld [vmem:[%s4805_s1 + $0x68] sm:$0xff]  ;;  %v464_v9 = vld [vmem:[%s4805_s1 + $0x70] sm:$0x3]  ;;  %s5038_s19 = smov (!%p215_p3, %s2982_s19), 1  ;;  %vm1698_vm5 = vcmask 1042432  }
   0xe   : > { %626 = vperm.xlu0 %3176, %v474_v1   ;;  %566 = vperm.xlu2 %3178, %v462_v2   ;;  %v451_v10 = vld [vmem:[%s4805_s1 + $0x8] sm:$0xff]  ;;  %v452_v11 = vld [vmem:[%s4805_s1 + $0x10] sm:$0x3]  ;;  %v450_v12 = vld [vmem:[%s4805_s1] sm:$0xff]  ;;  %s3166_s9 = smul.u32 432, %s5038_s19  ;;  %vm1699_vm6 = vcmask 1046532  }
   0xf   : > { %v478_v13 = vld [vmem:[%s4805_s1 + $0xe0] sm:$0xff]  ;;  %v489_v14 = vld [vmem:[%s4805_s1 + $0x138] sm:$0xff]  ;;  %v491_v19 = vld [vmem:[%s4805_s1 + $0x148] sm:$0x3]  ;;  %vm883_vm1 = vsmask.f32 3328 }
  0x10   : > { %v477_v15 = vld [vmem:[%s4805_s1 + $0xd8] sm:$0xff]  ;;  %v466_v17 = vld [vmem:[%s4805_s1 + $0x80] sm:$0xff]  ;;  %v467_v20 = vld [vmem:[%s4805_s1 + $0x88] sm:$0x3]  ;;  %s3332_s12 = scalar_lea.vmem %s4804_s0, %s3166_s9  ;;  %vm884_vm2 = vsmask.f32 7440 }
  0x11   : > { %v465_v16 = vld [vmem:[%s4805_s1 + $0x78] sm:$0xff]  ;;  %v490_v18 = vld [vmem:[%s4805_s1 + $0x140] sm:$0xff]  ;;  %v479_v21 = vld [vmem:[%s4805_s1 + $0xe8] sm:$0x3]  ;;  %s3162_s23 = sshll.u32 %s5038_s19, 8 }
  0x12   : > { %v454_v22 = vld [vmem:[%s4805_s1 + $0x20] sm:$0xff]  ;;  %v455_v23 = vld [vmem:[%s4805_s1 + $0x28] sm:$0x3]  ;;  %v453_v24 = vld [vmem:[%s4805_s1 + $0x18] sm:$0xff]  ;;  %s4620_s26 = scalar_lea.vmem %s4809_s5, %s3162_s23 }
  0x13   : > { %v481_v25 = vld [vmem:[%s4805_s1 + $0xf8] sm:$0xff]  ;;  %v492_v26 = vld [vmem:[%s4805_s1 + $0x150] sm:$0xff]  ;;  %v3337_v31 = vld [vmem:[%s4806_s2] ss:$0 sm:$0xff] }
  0x14   : > { %v480_v27 = vld [vmem:[%s4805_s1 + $0xf0] sm:$0xff]  ;;  %v469_v29 = vld [vmem:[%s4805_s1 + $0x98] sm:$0xff]  ;;  %v494_v32 = vld [vmem:[%s4805_s1 + $0x160] sm:$0x3] }
  0x15   : > { %691 = vperm.xlu1 %3177, %v487_v4   ;;  %v468_v28 = vld [vmem:[%s4805_s1 + $0x90] sm:$0xff]  ;;  %v493_v30 = vld [vmem:[%s4805_s1 + $0x158] sm:$0xff]  ;;  %v238_v33 = vld [vmem:[%s3332_s12 + $0x60] sm:$0xff] }
  0x16   : > { %631 = vperm.xlu0 %3176, %v475_v5   ;;  %571 = vperm.xlu2 %3178, %v463_v6   ;;  %v470_v34 = vld [vmem:[%s4805_s1 + $0xa0] sm:$0x3]  ;;  %v296_v36 = vmul.f32 %v3337_v31, %v238_v33  ;;  %v457_v39 = vld [vmem:[%s4805_s1 + $0x38] sm:$0xff]  ;;  %v239_v40 = vld [vmem:[%s3332_s12 + $0x68] sm:$0xff] }
  0x17   : > { %v482_v35 = vld [vmem:[%s4805_s1 + $0x100] sm:$0x3]  ;;  %v456_v42 = vld [vmem:[%s4805_s1 + $0x30] sm:$0xff]  ;;  %v297_v44 = vmul.f32 %v3337_v31, %v239_v40  ;;  %v2990_v45 = vld [vmem:[%s4808_s4 + $0x2] sm:$0x3] }
  0x18   : > { %v3353_v37 = vld [vmem:[%s4807_s3] ss:$0 sm:$0xff]  ;;  %v1371_v46 = vsel %vm1369_vm0, %v2990_v45, 0  ;;  %v484_v50 = vld [vmem:[%s4805_s1 + $0x110] sm:$0xff]  ;;  %v495_v53 = vld [vmem:[%s4805_s1 + $0x168] sm:$0xff] }
  0x19   : > { %v354_v38 = vadd.f32 %v3353_v37, %v296_v36  ;;  %v458_v41 = vld [vmem:[%s4805_s1 + $0x40] sm:$0x3]  ;;  %3163 = vmatpush.bf16.msra.mxu1 %v1371_v46  ;;  %3164 = vmatpush.bf16.msra.mxu2 %v1371_v46  ;;  %v355_v49 = vadd.f32 %v3353_v37, %v297_v44  ;;  %v240_v51 = vld [vmem:[%s3332_s12 + $0x70] sm:$0x3]  ;;  %v483_v54 = vld [vmem:[%s4805_s1 + $0x108] sm:$0xff] }
  0x1a   : > { %3165 = vmatpush.bf16.msra.mxu3 %v1371_v46  ;;  %1380 = vmatpush.bf16.msra.mxu0 %v1371_v46  ;;  %v298_v56 = vmul.f32 %v3337_v31, %v240_v51  ;;  %v262_v62 = vld [vmem:[%s3332_s12 + $0x120] sm:$0xff]  ;;  %v471_v63 = vld [vmem:[%s4805_s1 + $0xa8] sm:$0xff]  ;;  %v472_v3 = vld [vmem:[%s4805_s1 + $0xb0] sm:$0xff] }
  0x1b   : > { %v408_v43 = vmax.f32 %v354_v38, 0.0  ;;  %v409_v55 = vmax.f32 %v355_v49, 0.0  ;;  %v496_v4 = vld [vmem:[%s4805_s1 + $0x170] sm:$0xff]  ;;  %v320_v5 = vmul.f32 %v3337_v31, %v262_v62  ;;  %v250_v6 = vld [vmem:[%s3332_s12 + $0xc0] sm:$0xff]  ;;  %vm3421_vm3 = vmor %vm883_vm1, %vm884_vm2 }
  0x1c   : > { %v356_v61 = vadd.f32 %v3353_v37, %v298_v56  ;;  %v460_v45 = vld [vmem:[%s4805_s1 + $0x50] sm:$0xff]  ;;  %v459_v51 = vld [vmem:[%s4805_s1 + $0x48] sm:$0xff]  ;;  %v265_v62 = vld [vmem:[%s3332_s12 + $0x138] sm:$0xff] }
  0x1d   : > { %696 = vperm.xlu1 %3177, %v488_v7   ;;  %vm3517_vm7 = vmor %vm1698_vm5, %vm1699_vm6 }
  0x1e   : > { %636 = vperm.xlu0 %3176, %v476_v8   ;;  %576 = vperm.xlu2 %3178, %v464_v9   ;;  %v410_v9 = vmax.f32 %v356_v61, 0.0 }
  0x25   : > { %511 = vperm.xlu1 %3177, %v451_v10  }
  0x26   : > { %516 = vperm.xlu2 %3178, %v452_v11   ;;  %506 = vperm.xlu0 %3176, %v450_v12   ;;  %v308_v12 = vmul.f32 %v3337_v31, %v250_v6 }
  0x2d   : > { %646 = vperm.xlu1 %3177, %v478_v13  }
  0x2e   : > { %701 = vperm.xlu2 %3178, %v489_v14   ;;  %641 = vperm.xlu0 %3176, %v477_v15   ;;  %v378_v15 = vadd.f32 %v3353_v37, %v320_v5 }
  0x35   : > { %581 = vperm.xlu1 %3177, %v465_v16  }
  0x36   : > { %586 = vperm.xlu2 %3178, %v466_v17   ;;  %706 = vperm.xlu0 %3176, %v490_v18   ;;  %v263_v17 = vld [vmem:[%s3332_s12 + $0x128] sm:$0xff] }
  0x3d   : > { %711 = vperm.xlu1 %3177, %v491_v19   ;;  %v497_v19 = vld [vmem:[%s4805_s1 + $0x178] sm:$0x3] }
  0x3e   : > { %591 = vperm.xlu2 %3178, %v467_v20   ;;  %651 = vperm.xlu0 %3176, %v479_v21   ;;  %v251_v20 = vld [vmem:[%s3332_s12 + $0xc8] sm:$0xff] }
  0x45   : > { %526 = vperm.xlu1 %3177, %v454_v22   ;;  %v473_v22 = vld [vmem:[%s4805_s1 + $0xb8] sm:$0x3] }
  0x46   : > { %531 = vperm.xlu2 %3178, %v455_v23   ;;  %521 = vperm.xlu0 %3176, %v453_v24   ;;  %v485_v23 = vld [vmem:[%s4805_s1 + $0x118] sm:$0x3]  ;;  %v366_v24 = vadd.f32 %v3353_v37, %v308_v12  ;;  %v499_v12 = vld [vmem:[%s4805_s1 + $0x188] sm:$0xff] }
  0x4d   : > { %661 = vperm.xlu1 %3177, %v481_v25  }
  0x4e   : > { %716 = vperm.xlu2 %3178, %v492_v26   ;;  %656 = vperm.xlu0 %3176, %v480_v27   ;;  %v432_v26 = vmax.f32 %v378_v15, 0.0  ;;  %v321_v27 = vmul.f32 %v3337_v31, %v263_v17 }
  0x55   : > { %596 = vperm.xlu1 %3177, %v468_v28  }
  0x56   : > { %601 = vperm.xlu2 %3178, %v469_v29   ;;  %721 = vperm.xlu0 %3176, %v493_v30   ;;  %v309_v30 = vmul.f32 %v3337_v31, %v251_v20 }
  0x5d   : > { %726 = vperm.xlu1 %3177, %v494_v32  }
  0x5e   : > { %606 = vperm.xlu2 %3178, %v470_v34   ;;  %666 = vperm.xlu0 %3176, %v482_v35   ;;  %v420_v35 = vmax.f32 %v366_v24, 0.0 }
  0x65   : > { %541 = vperm.xlu1 %3177, %v457_v39  }
  0x66   : > { %546 = vperm.xlu2 %3178, %v458_v41   ;;  %536 = vperm.xlu0 %3176, %v456_v42   ;;  %v379_v41 = vadd.f32 %v3353_v37, %v321_v27  ;;  %v264_v42 = vld [vmem:[%s3332_s12 + $0x130] sm:$0x3] }
  0x68   : > { %v567_v47 = vpop.permute.xlu2 %566 }
  0x69   : > { %v786_v48 = vmul.f32 %v567_v47, %v408_v43  ;;  %v367_v43 = vadd.f32 %v3353_v37, %v309_v30 }
  0x6b   : > { %v3376_v52 = vpack.c.bf16 %v786_v48, %v786_v48  ;;  %v252_v48 = vld [vmem:[%s3332_s12 + $0xd0] sm:$0x3]  ;;  %v421_v56 = vmax.f32 %v367_v43, 0.0 }
  0x6d   : > { %676 = vperm.xlu1 %3177, %v484_v50   ;;  %v983_v57 = vshrl.u32 %v3376_v52, 16  ;;  %v986_v58 = vshll.u32 %v3376_v52, 16  ;;  %v461_v50 = vld [vmem:[%s4805_s1 + $0x58] sm:$0x3] }
  0x6e   : > { %731 = vperm.xlu2 %3178, %v495_v53   ;;  %671 = vperm.xlu0 %3176, %v483_v54   ;;  %v322_v53 = vmul.f32 %v3337_v31, %v264_v42 }
  0x6f   : > { %v985_v0 = vrot.slane %v983_v57, 4  ;;  %v988_v1 = vrot.slane %v986_v58, 5  ;;  %v310_v57 = vmul.f32 %v3337_v31, %v252_v48 }
  0x70   : > { %v572_v59 = vpop.permute.xlu2 %571 }
  0x71   : > { %v787_v60 = vmul.f32 %v572_v59, %v409_v55  ;;  %v989_v13 = vor.u32 %v988_v1, %v985_v0  ;;  %v433_v55 = vmax.f32 %v379_v41, 0.0  ;;  %v227_v0 = vld [vmem:[%s3332_s12 + $0x8] sm:$0xff] }
  0x73   : > { %v3392_v2 = vpack.c.bf16 %v787_v60, %v787_v60  ;;  %v990_v25 = vrot.slane %v989_v13, 4  ;;  %v228_v60 = vld [vmem:[%s3332_s12 + $0x10] sm:$0x3]  ;;  %v285_v13 = vmul.f32 %v3337_v31, %v227_v0 }
  0x75   : > { %v992_v7 = vshll.u32 %v3392_v2, 16  ;;  %v996_v8 = vshrl.u32 %v3392_v2, 16  ;;  %611 = vperm.xlu1 %3177, %v471_v63   ;;  %v380_v63 = vadd.f32 %v3353_v37, %v322_v53  ;;  %v242_v53 = vld [vmem:[%s3332_s12 + $0x80] sm:$0xff] }
  0x76   : > { %616 = vperm.xlu2 %3178, %v472_v3   ;;  %736 = vperm.xlu0 %3176, %v496_v4  }
  0x77   : > { %v994_v10 = vrot.slane %v992_v7, 5  ;;  %v998_v11 = vrot.slane %v996_v8, 4  ;;  %v368_v8 = vadd.f32 %v3353_v37, %v310_v57  ;;  %v434_v20 = vmax.f32 %v380_v63, 0.0 }
  0x78   : > { %v577_v14 = vpop.permute.xlu2 %576 }
  0x79   : > { %v788_v16 = vmul.f32 %v577_v14, %v410_v9  ;;  %v999_v18 = vor.u32 %v998_v11, %v994_v10  ;;  %v995_v36 = vsel %vm3421_vm3, %v990_v25, %v994_v10  ;;  %v286_v9 = vmul.f32 %v3337_v31, %v228_v60  ;;  %v226_v14 = vld [vmem:[%s3332_s12] sm:$0xff]  ;;  %v503_v60 = vld [vmem:[%s4805_s1 + $0x1a8] sm:$0x3] }
  0x7a   : > { %v1280_v46 = vunpack.c.l.b16 %v995_v36  ;;  %v323_v11 = vmul.f32 %v3337_v31, %v265_v62  ;;  %v284_v30 = vmul.f32 %v3337_v31, %v226_v14 }
  0x7b   : > { %v3411_v21 = vpack.c.bf16 %v788_v16, %v788_v16  ;;  %v1000_v32 = vrot.slane %v999_v18, 4  ;;  %v500_v18 = vld [vmem:[%s4805_s1 + $0x190] sm:$0x3] }
  0x7d   : > { %4891 = vst [vmem:[#allocation2_spill] sm:$0xff] %v3411_v21  ;;  %v1002_v29 = vshll.u32 %v3411_v21, 16  ;;  %741 = vperm.xlu1 %3177, %v497_v19   ;;  %v498_v19 = vld [vmem:[%s4805_s1 + $0x180] sm:$0xff] }
  0x7e   : > { %621 = vperm.xlu2 %3178, %v473_v22   ;;  %681 = vperm.xlu0 %3176, %v485_v23  }
  0x7f   : > { %v1004_v33 = vrot.slane %v1002_v29, 5  ;;  %v687_v34 = vpop.permute.xlu1 %686  ;;  %v422_v29 = vmax.f32 %v368_v8, 0.0  ;;  %v4898_v8 = vmov 0 }
  0x80   : > { %v810_v38 = vmul.f32 %v687_v34, %v432_v26  ;;  %v627_v39 = vpop.permute.xlu0 %626  ;;  %v3429_v40 = vpop.permute.xlu2 %516  ;;  %v343_v34 = vadd.f32 %v3353_v37, %v285_v13  ;;  %v4899_v8 = vsel %vm3517_vm7, 4294967295, %v4898_v8 }
  0x81   : > { %v1005_v44 = vsel %vm3421_vm3, %v1000_v32, %v1004_v33  ;;  %v798_v49 = vmul.f32 %v627_v39, %v420_v35  ;;  %4900 = vst [vmem:[#allocation7_spill] sm:$0xff] %v4899_v8 }
  0x82   : > { %v1281_v47 = vunpack.c.l.b16 %v1005_v44  ;;  %v3447_v54 = vpack.c.bf16 %v810_v38, %v810_v38  ;;  %v397_v62 = vmax.f32 %v343_v34, 0.0 }
  0x83   : > { %v3452_v59 = vpack.c.bf16 %v798_v49, %v798_v49  ;;  %v342_v49 = vadd.f32 %v3353_v37, %v284_v30 }
  0x84   : > { %v3450_v58 = vpack.c.b16 %v1281_v47, %v1280_v46  ;;  %v1175_v1 = vshrl.u32 %v3447_v54, 16  ;;  %v1178_v3 = vshll.u32 %v3447_v54, 16  ;;  %v344_v46 = vadd.f32 %v3353_v37, %v286_v9 }
  0x85   : > { %556 = vperm.xlu1 %3177, %v460_v45   ;;  %4895 = vst [vmem:[#allocation4_spill] sm:$0xff] %v3452_v59  ;;  %v1079_v15 = vshrl.u32 %v3452_v59, 16  ;;  %v1082_v16 = vshll.u32 %v3452_v59, 16  ;;  %v3495_v47 = vadd.f32 %v3353_v37, %v323_v11  ;;  %v300_v11 = vmul.f32 %v3337_v31, %v242_v53  ;;  %v233_v59 = vld [vmem:[%s3332_s12 + $0x38] sm:$0xff] }
  0x86   : > { %561 = vperm.xlu2 %3178, %v461_v50   ;;  %551 = vperm.xlu0 %3176, %v459_v51   ;;  %4894 = vst [vmem:[#allocation3_spill] sm:$0xff] %v3450_v58  ;;  %v1177_v22 = vrot.slane %v1175_v1, 4  ;;  %v1180_v23 = vrot.slane %v1178_v3, 5 }
  0x87   : > { %v692_v61 = vpop.permute.xlu1 %691  ;;  %2995 = vmatmul.msk.bf16.vlgmr.msra.gmra.mxu1 %vm1320_vm4, %v3450_v58  ;;  %v1081_v35 = vrot.slane %v1079_v15, 4  ;;  %v1084_v36 = vrot.slane %v1082_v16, 5  ;;  %v247_v58 = vld [vmem:[%s3332_s12 + $0xa8] sm:$0xff] }
  0x88   : > { %v811_v4 = vmul.f32 %v692_v61, %v433_v55  ;;  %v632_v5 = vpop.permute.xlu0 %631  ;;  %v3460_v6 = vpop.permute.xlu2 %701  ;;  %v1181_v45 = vor.u32 %v1180_v23, %v1177_v22  ;;  %v502_v55 = vld [vmem:[%s4805_s1 + $0x1a0] sm:$0xff]  ;;  %v501_v61 = vld [vmem:[%s4805_s1 + $0x198] sm:$0xff]  ;;  %v435_v23 = vmax.f32 %v3495_v47, 0.0 }
  0x89   : > { %v799_v7 = vmul.f32 %v632_v5, %v421_v56  ;;  %v1085_v63 = vor.u32 %v1084_v36, %v1081_v35  ;;  %v241_v35 = vld [vmem:[%s3332_s12 + $0x78] sm:$0xff] }
  0x8a   : > { %v3466_v10 = vpack.c.bf16 %v811_v4, %v811_v4  ;;  %v1182_v5 = vrot.slane %v1181_v45, 4  ;;  %v266_v45 = vld [vmem:[%s3332_s12 + $0x140] sm:$0xff] }
  0x8b   : > { %v3476_v17 = vpack.c.bf16 %v799_v7, %v799_v7  ;;  %v398_v7 = vmax.f32 %v344_v46, 0.0 }
  0x8c   : > { %v1184_v24 = vshll.u32 %v3466_v10, 16  ;;  %v1188_v25 = vshrl.u32 %v3466_v10, 16  ;;  %v4811_v42 = vrot.slane %v3466_v10, 5 }
  0x8d   : > { %4896 = vst [vmem:[#allocation5_spill] sm:$0xff] %v3476_v17  ;;  %v1088_v26 = vshll.u32 %v3476_v17, 16  ;;  %v1092_v27 = vshrl.u32 %v3476_v17, 16  ;;  %751 = vperm.xlu1 %3177, %v499_v12   ;;  %v396_v12 = vmax.f32 %v342_v49, 0.0  ;;  %v776_v36 = vmul.f32 %v3429_v40, %v398_v7 }
  0x8e   : > { %v1186_v32 = vrot.slane %v1184_v24, 5  ;;  %v1190_v33 = vrot.slane %v1188_v25, 4  ;;  %756 = vperm.xlu2 %3178, %v500_v18   ;;  %746 = vperm.xlu0 %3176, %v498_v19   ;;  %v1789_v1 = vrot.slane %v4811_v42, 4  ;;  %v243_v19 = vld [vmem:[%s3332_s12 + $0x88] sm:$0x3] }
  0x8f   : > { %v3490_v38 = vrot.slane %v1088_v26, 5  ;;  %v1094_v39 = vrot.slane %v1092_v27, 4  ;;  %v697_v41 = vpop.permute.xlu1 %696  ;;  %v1086_v26 = vrot.slane %v1085_v63, 4  ;;  %v3561_v63 = vpack.c.bf16 %v776_v36, %v776_v36 }
  0x90   : > { %v812_v43 = vmul.f32 %v697_v41, %v434_v20  ;;  %v637_v44 = vpop.permute.xlu0 %636  ;;  %v3498_v51 = vpop.permute.xlu2 %586  ;;  %v1191_v56 = vor.u32 %v1190_v33, %v1186_v32  ;;  %v1187_v15 = vsel %vm3421_vm3, %v1182_v5, %v1186_v32  ;;  %v301_v41 = vmul.f32 %v3337_v31, %v243_v19 }
  0x91   : > { %v800_v48 = vmul.f32 %v637_v44, %v422_v29  ;;  %v1095_v0 = vor.u32 %v1094_v39, %v3490_v38  ;;  %v254_v29 = vld [vmem:[%s3332_s12 + $0xe0] sm:$0xff]  ;;  %v1296_v33 = vunpack.c.l.b16 %v1187_v15  ;;  %v358_v39 = vadd.f32 %v3353_v37, %v300_v11  ;;  %v253_v44 = vld [vmem:[%s3332_s12 + $0xd8] sm:$0xff] }
  0x92   : > { %v866_v50 = vpack.c.bf16 %v812_v43, %v812_v43  ;;  %v1192_v16 = vrot.slane %v1191_v56, 4  ;;  %v1091_v47 = vsel %vm3421_vm3, %v1086_v26, %v3490_v38  ;;  %v312_v49 = vmul.f32 %v3337_v31, %v254_v29 }
  0x93   : > { %v3504_v57 = vpack.c.bf16 %v800_v48, %v800_v48  ;;  %v1096_v22 = vrot.slane %v1095_v0, 4  ;;  %v299_v56 = vmul.f32 %v3337_v31, %v241_v35  ;;  %v311_v38 = vmul.f32 %v3337_v31, %v253_v44 }
  0x94   : > { %v1194_v3 = vshll.u32 %v866_v50, 16  ;;  %v1790_v4 = vrot.slane %v866_v50, 5  ;;  %v359_v5 = vadd.f32 %v3353_v37, %v301_v41  ;;  %v370_v26 = vadd.f32 %v3353_v37, %v312_v49 }
  0x95   : > { %4897 = vst [vmem:[#allocation6_spill] sm:$0xff] %v3504_v57  ;;  %v1098_v9 = vshll.u32 %v3504_v57, 16  ;;  %766 = vperm.xlu1 %3177, %v502_v55   ;;  %v357_v15 = vadd.f32 %v3353_v37, %v299_v56 }
  0x96   : > { %v1196_v13 = vrot.slane %v1194_v3, 5  ;;  %v3525_v14 = vsel %vm3517_vm7, %v1789_v1, %v1790_v4  ;;  %771 = vperm.xlu2 %3178, %v503_v60   ;;  %761 = vperm.xlu0 %3176, %v501_v61   ;;  %v1288_v3 = vunpack.c.l.b16 %v1091_v47  ;;  %v412_v4 = vmax.f32 %v358_v39, 0.0 }
  0x97   : > { %v1100_v18 = vrot.slane %v1098_v9, 5  ;;  %v512_v20 = vpop.permute.xlu1 %511  ;;  %v413_v29 = vmax.f32 %v359_v5, 0.0 }
  0x98   : > { %v775_v24 = vmul.f32 %v512_v20, %v397_v62  ;;  %v507_v25 = vpop.permute.xlu0 %506  ;;  %v1197_v27 = vsel %vm3421_vm3, %v1192_v16, %v1196_v13  ;;  %v592_v50 = vpop.permute.xlu2 %591  ;;  %v324_v62 = vmul.f32 %v3337_v31, %v266_v45 }
  0x99   : > { %v774_v30 = vmul.f32 %v507_v25, %v396_v12  ;;  %v1101_v32 = vsel %vm3421_vm3, %v1096_v22, %v1100_v18  ;;  %v1297_v34 = vunpack.c.l.b16 %v1197_v27  ;;  %v369_v18 = vadd.f32 %v3353_v37, %v311_v38  ;;  %v267_v22 = vld [vmem:[%s3332_s12 + $0x148] sm:$0x3] }
  0x9a   : > { %v3540_v43 = vpack.c.bf16 %v775_v24, %v775_v24  ;;  %v1289_v55 = vunpack.c.l.b16 %v1101_v32  ;;  %v382_v19 = vadd.f32 %v3353_v37, %v324_v62  ;;  %v906_v24 = vshll.u32 %v3561_v63, 16  ;;  %v231_v32 = vld [vmem:[%s3332_s12 + $0x28] sm:$0x3] }
  0x9b   : > { %v3544_v46 = vpack.c.bf16 %v774_v30, %v774_v30  ;;  %v3549_v48 = vpack.c.b16 %v1297_v34, %v1296_v33  ;;  %v813_v25 = vmul.f32 %v3460_v6, %v435_v23  ;;  %v790_v27 = vmul.f32 %v3498_v51, %v412_v4  ;;  %v255_v30 = vld [vmem:[%s3332_s12 + $0xe8] sm:$0x3] }
  0x9c   : > { %v896_v40 = vshll.u32 %v3540_v43, 16  ;;  %v900_v53 = vshrl.u32 %v3540_v43, 16  ;;  %v3564_v12 = vpack.c.b16 %v1289_v55, %v1288_v3  ;;  %v411_v33 = vmax.f32 %v357_v15, 0.0  ;;  %v230_v15 = vld [vmem:[%s3332_s12 + $0x20] sm:$0xff] }
  0x9d   : > { %4901 = vst [vmem:[#allocation8_spill] sm:$0xff] %v3549_v48  ;;  %v887_v60 = vshrl.u32 %v3544_v46, 16  ;;  %v890_v61 = vshll.u32 %v3544_v46, 16  ;;  %3003 = vmatmul.msk.bf16.vlgmr.msra.gmra.mxu3 %vm1320_vm4, %v3549_v48  ;;  %v325_v36 = vmul.f32 %v3337_v31, %v267_v22  ;;  %v423_v39 = vmax.f32 %v369_v18, 0.0  ;;  %v268_v22 = vld [vmem:[%s3332_s12 + $0x150] sm:$0xff] }
  0x9e   : > { %v898_v0 = vrot.slane %v896_v40, 5  ;;  %v902_v1 = vrot.slane %v900_v53, 4  ;;  %4902 = vst [vmem:[#allocation9_spill] sm:$0xff] %v3564_v12  ;;  %2999 = vmatmul.msk.bf16.vlgmr.msra.gmra.mxu2 %vm1320_vm4, %v3564_v12  ;;  %v436_v41 = vmax.f32 %v382_v19, 0.0  ;;  %v908_v44 = vrot.slane %v906_v24, 5 }
  0x9f   : > { %v889_v7 = vrot.slane %v887_v60, 4  ;;  %v892_v9 = vrot.slane %v890_v61, 5  ;;  %v647_v11 = vpop.permute.xlu1 %646  ;;  %v3579_v45 = vpack.c.bf16 %v813_v25, %v813_v25  ;;  %v424_v23 = vmax.f32 %v370_v26, 0.0 }
  0xa0   : > { %v642_v13 = vpop.permute.xlu0 %641  ;;  %v903_v16 = vor.u32 %v902_v1, %v898_v0  ;;  %v3581_v6 = vpop.permute.xlu2 %531  ;;  %v313_v47 = vmul.f32 %v3337_v31, %v255_v30  ;;  %v3584_v49 = vpack.c.bf16 %v790_v27, %v790_v27  ;;  %v791_v51 = vmul.f32 %v592_v50, %v413_v29 }
  0xa1   : > { %v893_v20 = vor.u32 %v892_v9, %v889_v7  ;;  %v289_v40 = vmul.f32 %v3337_v31, %v231_v32  ;;  %v383_v38 = vadd.f32 %v3353_v37, %v325_v36  ;;  %v801_v62 = vmul.f32 %v642_v13, %v423_v39 }
  0xa2   : > { %v904_v35 = vrot.slane %v903_v16, 4  ;;  %4903 = vst [vmem:[#allocation10_spill] sm:$0xff] %v3584_v49  ;;  %v1199_v4 = vshrl.u32 %v3579_v45, 16  ;;  %v802_v5 = vmul.f32 %v647_v11, %v424_v23  ;;  %v371_v9 = vadd.f32 %v3353_v37, %v313_v47 }
  0xa3   : > { %v894_v34 = vrot.slane %v893_v20, 4  ;;  %v1020_v16 = vshrl.u32 %v3584_v49, 16  ;;  %v229_v20 = vld [vmem:[%s3332_s12 + $0x18] sm:$0xff]  ;;  %v3602_v13 = vpack.c.bf16 %v791_v51, %v791_v51  ;;  %v437_v25 = vmax.f32 %v383_v38, 0.0 }
  0xa4   : > { %v909_v61 = vsel %vm3421_vm3, %v904_v35, %v908_v44  ;;  %v3608_v26 = vadd.f32 %v3353_v37, %v289_v40  ;;  %v3610_v27 = vpack.c.bf16 %v801_v62, %v801_v62  ;;  %v425_v29 = vmax.f32 %v371_v9, 0.0 }
  0xa5   : > { %v899_v60 = vsel %vm3421_vm3, %v894_v34, %v898_v0  ;;  %v1273_v50 = vunpack.c.l.b16 %v909_v61  ;;  %v1016_v0 = vshll.u32 %v3584_v49, 16  ;;  %4905 = vst [vmem:[#allocation12_spill] sm:$0xff] %v3602_v13  ;;  %v288_v30 = vmul.f32 %v3337_v31, %v230_v15 }
  0xa6   : > { %v1272_v3 = vunpack.c.l.b16 %v899_v60  ;;  %v3614_v32 = vpack.c.bf16 %v802_v5, %v802_v5  ;;  %v287_v35 = vmul.f32 %v3337_v31, %v229_v20  ;;  %v3617_v36 = vrot.slane %v1199_v4, 4 }
  0xa7   : > { %v582_v53 = vpop.permute.xlu1 %581  ;;  %v1202_v39 = vshll.u32 %v3579_v45, 16  ;;  %v1018_v47 = vrot.slane %v1016_v0, 5  ;;  %v1022_v51 = vrot.slane %v1020_v16, 4  ;;  %v1026_v40 = vshll.u32 %v3602_v13, 16  ;;  %v249_v13 = vld [vmem:[%s3332_s12 + $0xb8] sm:$0x3] }
  0xa8   : > { %v789_v55 = vmul.f32 %v582_v53, %v411_v33  ;;  %v707_v56 = vpop.permute.xlu0 %706  ;;  %v1304_v19 = vpack.c.b16 %v1273_v50, %v1272_v3  ;;  %v3623_v53 = vpop.permute.xlu2 %716  ;;  %v1103_v60 = vshrl.u32 %v3610_v27, 16  ;;  %v1106_v61 = vshll.u32 %v3610_v27, 16 }
  0xa9   : > { %v814_v1 = vmul.f32 %v707_v56, %v436_v41  ;;  %v326_v41 = vmul.f32 %v3337_v31, %v268_v22  ;;  %v346_v62 = vadd.f32 %v3353_v37, %v288_v30  ;;  %v345_v50 = vadd.f32 %v3353_v37, %v287_v35 }
  0xaa   : > { %v3593_v7 = vpack.c.bf16 %v789_v55, %v789_v55  ;;  %2991 = vmatmul.msk.bf16.vlgmr.msra.gmra.mxu0 %vm1320_vm4, %v1304_v19  ;;  %v1112_v5 = vshll.u32 %v3614_v32, 16  ;;  %v1116_v9 = vshrl.u32 %v3614_v32, 16  ;;  %v1023_v22 = vor.u32 %v1022_v51, %v1018_v47 }
  0xab   : > { %v3599_v18 = vpack.c.bf16 %v814_v1, %v814_v1  ;;  %v4812_v1 = vrot.slane %v3614_v32, 5  ;;  %v400_v19 = vmax.f32 %v346_v62, 0.0  ;;  %v1028_v30 = vrot.slane %v1026_v40, 5 }
  0xac   : > { %4904 = vst [vmem:[#allocation11_spill] sm:$0xff] %v3593_v7  ;;  %v1007_v24 = vshrl.u32 %v3593_v7, 16  ;;  %v1010_v11 = vshll.u32 %v3593_v7, 16 }
  0xad   : > { %v4810_v44 = vrot.slane %v3599_v18, 5  ;;  %v1208_v62 = vshll.u32 %v3599_v18, 16 }
  0xae   : > { %v1009_v33 = vrot.slane %v1007_v24, 4  ;;  %v1012_v34 = vrot.slane %v1010_v11, 5  ;;  %v1204_v24 = vrot.slane %v1202_v39, 5  ;;  %v1105_v11 = vrot.slane %v1103_v60, 4 }
  0xaf   : > { %v712_v23 = vpop.permute.xlu1 %711  ;;  %v1796_v15 = vrot.slane %v4810_v44, 4  ;;  %v1212_v39 = vshrl.u32 %v3599_v18, 16 }
  0xb0   : > { %v815_v55 = vmul.f32 %v712_v23, %v437_v25  ;;  %v652_v56 = vpop.permute.xlu0 %651  ;;  %v1013_v4 = vor.u32 %v1012_v34, %v1009_v33  ;;  %v1108_v25 = vrot.slane %v1106_v61, 5  ;;  %v1768_v33 = vrot.slane %v4812_v1, 4  ;;  %v245_v34 = vld [vmem:[%s3332_s12 + $0x98] sm:$0xff]  ;;  %v602_v44 = vpop.permute.xlu2 %601 }
  0xb1   : > { %v803_v38 = vmul.f32 %v652_v56, %v425_v29  ;;  %v399_v29 = vmax.f32 %v345_v50, 0.0  ;;  %v1114_v56 = vrot.slane %v1112_v5, 5 }
  0xb2   : > { %v869_v3 = vpack.c.bf16 %v815_v55, %v815_v55  ;;  %v1014_v20 = vrot.slane %v1013_v4, 4  ;;  %v246_v55 = vld [vmem:[%s3332_s12 + $0xa0] sm:$0x3]  ;;  %v1024_v4 = vrot.slane %v1023_v22, 4 }
  0xb3   : > { %v857_v0 = vpack.c.bf16 %v803_v38, %v803_v38  ;;  %v1118_v38 = vrot.slane %v1116_v9, 4  ;;  %v304_v5 = vmul.f32 %v3337_v31, %v246_v55 }
  0xb4   : > { %v1797_v16 = vrot.slane %v869_v3, 5  ;;  %v1019_v50 = vsel %vm3421_vm3, %v1014_v20, %v1018_v47  ;;  %v1218_v42 = vshll.u32 %v869_v3, 16  ;;  %v1214_v20 = vrot.slane %v1212_v39, 4 }
  0xb5   : > { %v1769_v23 = vrot.slane %v857_v0, 5  ;;  %v1122_v1 = vshll.u32 %v857_v0, 16  ;;  %v1282_v47 = vunpack.c.l.b16 %v1019_v50  ;;  %v362_v0 = vadd.f32 %v3353_v37, %v304_v5 }
  0xb6   : > { %v3639_v35 = vsel %vm3517_vm7, %v1796_v15, %v1797_v16  ;;  %v303_v15 = vmul.f32 %v3337_v31, %v245_v34  ;;  %v1109_v16 = vor.u32 %v1108_v25, %v1105_v11  ;;  %v1119_v34 = vor.u32 %v1118_v38, %v1114_v56 }
  0xb7   : > { %v527_v51 = vpop.permute.xlu1 %526  ;;  %v3646_v40 = vsel %vm3517_vm7, %v1768_v33, %v1769_v23  ;;  %v1029_v33 = vsel %vm3421_vm3, %v1024_v4, %v1028_v30  ;;  %v1210_v23 = vrot.slane %v1208_v62, 5  ;;  %v384_v11 = vadd.f32 %v3353_v37, %v326_v41 }
  0xb8   : > { %v778_v60 = vmul.f32 %v527_v51, %v400_v19  ;;  %v522_v61 = vpop.permute.xlu0 %521  ;;  %v401_v19 = vmax.f32 %v3608_v26, 0.0  ;;  %v1110_v22 = vrot.slane %v1109_v16, 4  ;;  %v361_v3 = vadd.f32 %v3353_v37, %v303_v15  ;;  %v244_v16 = vld [vmem:[%s3332_s12 + $0x90] sm:$0xff] }
  0xb9   : > { %v777_v9 = vmul.f32 %v522_v61, %v399_v29  ;;  %v1205_v29 = vor.u32 %v1204_v24, %v3617_v36  ;;  %v1283_v25 = vunpack.c.l.b16 %v1029_v33  ;;  %v1220_v55 = vrot.slane %v1218_v42, 5 }
  0xba   : > { %v3652_v48 = vpack.c.bf16 %v778_v60, %v778_v60  ;;  %v1124_v30 = vrot.slane %v1122_v1, 5  ;;  %v1115_v24 = vsel %vm3421_vm3, %v1110_v22, %v1114_v56  ;;  %v1120_v42 = vrot.slane %v1119_v34, 4  ;;  %v257_v22 = vld [vmem:[%s3332_s12 + $0xf8] sm:$0xff] }
  0xbb   : > { %v3657_v51 = vpack.c.bf16 %v777_v9, %v777_v9  ;;  %v3667_v36 = vpack.c.b16 %v1283_v25, %v1282_v47  ;;  %v1206_v1 = vrot.slane %v1205_v29, 4  ;;  %v1215_v60 = vor.u32 %v1214_v20, %v1210_v23  ;;  %v256_v9 = vld [vmem:[%s3332_s12 + $0xf0] sm:$0xff] }
  0xbc   : > { %v920_v26 = vshll.u32 %v3652_v48, 16  ;;  %v924_v62 = vshrl.u32 %v3652_v48, 16  ;;  %v779_v50 = vmul.f32 %v3581_v6, %v401_v19  ;;  %v438_v4 = vmax.f32 %v384_v11, 0.0  ;;  %v607_v11 = vpop.permute.xlu2 %606 }
  0xbd   : > { %v911_v39 = vshrl.u32 %v3657_v51, 16  ;;  %v914_v38 = vshll.u32 %v3657_v51, 16  ;;  %4906 = vst [vmem:[#allocation13_spill] sm:$0xff] %v3667_v36  ;;  %v415_v15 = vmax.f32 %v361_v3, 0.0  ;;  %v416_v5 = vmax.f32 %v362_v0, 0.0  ;;  %2996 = vmatmul.msk.bf16.gmra.mxu1 %vm1320_vm4, %v3667_v36 }
  0xbe   : > { %v3680_v33 = vrot.slane %v920_v26, 5  ;;  %v1125_v56 = vsel %vm3421_vm3, %v1120_v42, %v1124_v30  ;;  %v1211_v47 = vsel %vm3421_vm3, %v1206_v1, %v1210_v23  ;;  %v1216_v20 = vrot.slane %v1215_v60, 4  ;;  %v269_v30 = vld [vmem:[%s3332_s12 + $0x158] sm:$0xff] }
  0xbf   : > { %v3669_v41 = vpop.permute.xlu1 %661  ;;  %v913_v6 = vrot.slane %v911_v39, 4  ;;  %v916_v19 = vrot.slane %v914_v38, 5  ;;  %v1290_v34 = vunpack.c.l.b16 %v1115_v24  ;;  %v1291_v29 = vunpack.c.l.b16 %v1125_v56 }
  0xc0   : > { %v3673_v61 = vpop.permute.xlu0 %656  ;;  %v926_v3 = vrot.slane %v924_v62, 4  ;;  %v1221_v0 = vsel %vm3421_vm3, %v1216_v20, %v1220_v55  ;;  %v314_v25 = vmul.f32 %v3337_v31, %v256_v9  ;;  %v302_v26 = vmul.f32 %v3337_v31, %v244_v16 }
  0xc1   : > { %v3692_v42 = vpack.c.b16 %v1291_v29, %v1290_v34  ;;  %v1298_v23 = vunpack.c.l.b16 %v1211_v47  ;;  %v1299_v1 = vunpack.c.l.b16 %v1221_v0  ;;  %v315_v39 = vmul.f32 %v3337_v31, %v257_v22  ;;  %v234_v47 = vld [vmem:[%s3332_s12 + $0x40] sm:$0x3] }
  0xc2   : > { %v3695_v38 = vpack.c.bf16 %v779_v50, %v779_v50  ;;  %v816_v24 = vmul.f32 %v3623_v53, %v438_v4  ;;  %v793_v62 = vmul.f32 %v602_v44, %v415_v15  ;;  %v360_v60 = vadd.f32 %v3353_v37, %v302_v26 }
  0xc3   : > { %4907 = vst [vmem:[#allocation14_spill] sm:$0xff] %v3692_v42  ;;  %3000 = vmatmul.msk.bf16.gmra.mxu2 %vm1320_vm4, %v3692_v42  ;;  %v3701_v55 = vpack.c.b16 %v1299_v1, %v1298_v23  ;;  %v327_v16 = vmul.f32 %v3337_v31, %v269_v30  ;;  %v917_v56 = vor.u32 %v916_v19, %v913_v6  ;;  %v271_v6 = vld [vmem:[%s3332_s12 + $0x168] sm:$0xff]  ;;  %v3039_v1 = vld [vmem:[%s4808_s4 + $0x4] sm:$0x3]  ;;  %v248_v42 = vld [vmem:[%s3332_s12 + $0xb0] sm:$0xff] }
  0xc4   : > { %v372_v20 = vadd.f32 %v3353_v37, %v314_v25  ;;  %v414_v50 = vmax.f32 %v360_v60, 0.0  ;;  %v927_v53 = vor.u32 %v926_v3, %v3680_v33  ;;  %v794_v44 = vmul.f32 %v607_v11, %v416_v5 }
  0xc5   : > { %4908 = vst [vmem:[#allocation15_spill] sm:$0xff] %v3701_v55  ;;  %3004 = vmatmul.msk.bf16.gmra.mxu3 %vm1320_vm4, %v3701_v55  ;;  %v373_v4 = vadd.f32 %v3353_v37, %v315_v39  ;;  %v930_v15 = vshll.u32 %v3695_v38, 16  ;;  %v3711_v34 = vpack.c.bf16 %v816_v24, %v816_v24  ;;  %v3713_v29 = vpack.c.bf16 %v793_v62, %v793_v62 }
  0xc6   : > { %v292_v19 = vmul.f32 %v3337_v31, %v234_v47  ;;  %v385_v25 = vadd.f32 %v3353_v37, %v327_v16  ;;  %v918_v26 = vrot.slane %v917_v56, 4  ;;  %v426_v3 = vmax.f32 %v372_v20, 0.0 }
  0xc7   : > { %v597_v9 = vpop.permute.xlu1 %596  ;;  %4909 = vst [vmem:[#allocation16_spill] sm:$0xff] %v3711_v34  ;;  %v928_v5 = vrot.slane %v927_v53, 4  ;;  %v3718_v11 = vpack.c.bf16 %v794_v44, %v794_v44  ;;  %v427_v30 = vmax.f32 %v373_v4, 0.0  ;;  %v329_v23 = vmul.f32 %v3337_v31, %v271_v6 }
  0xc8   : > { %v722_v22 = vpop.permute.xlu0 %721  ;;  %4910 = vst [vmem:[#allocation17_spill] sm:$0xff] %v3713_v29  ;;  %v792_v0 = vmul.f32 %v597_v9, %v414_v50  ;;  %v932_v39 = vrot.slane %v930_v15, 5  ;;  %v1223_v24 = vshrl.u32 %v3711_v34, 16  ;;  %v1226_v62 = vshll.u32 %v3711_v34, 16  ;;  %v547_v9 = vpop.permute.xlu2 %546 }
  0xc9   : > { %4911 = vst [vmem:[#allocation18_spill] sm:$0xff] %v3718_v11  ;;  %v1040_v60 = vshll.u32 %v3713_v29, 16  ;;  %v350_v16 = vadd.f32 %v3353_v37, %v292_v19  ;;  %v439_v47 = vmax.f32 %v385_v25, 0.0  ;;  %v923_v20 = vsel %vm3421_vm3, %v918_v26, %v3680_v33 }
  0xca   : > { %v3728_v56 = vpack.c.bf16 %v792_v0, %v792_v0  ;;  %v1044_v50 = vshrl.u32 %v3713_v29, 16  ;;  %v804_v53 = vmul.f32 %v3673_v61, %v426_v3  ;;  %v933_v44 = vsel %vm3421_vm3, %v928_v5, %v932_v39 }
  0xcb   : > { %v1912_v4 = vsel %vm1369_vm0, %v3039_v1, 0  ;;  %v1050_v15 = vshll.u32 %v3718_v11, 16  ;;  %v805_v6 = vmul.f32 %v3669_v41, %v427_v30  ;;  %v3741_v19 = vadd.f32 %v3353_v37, %v329_v23  ;;  %v270_v41 = vld [vmem:[%s3332_s12 + $0x160] sm:$0x3] }
  0xcc   : > { %4912 = vst [vmem:[#allocation19_spill] sm:$0xff] %v3728_v56  ;;  %v1274_v0 = vunpack.c.l.b16 %v923_v20  ;;  %1921 = vmatpush.bf16.msrb.mxu2 %v1912_v4  ;;  %v3743_v26 = vrot.slane %v1223_v24, 4  ;;  %v1031_v61 = vshrl.u32 %v3728_v56, 16  ;;  %v1034_v3 = vshll.u32 %v3728_v56, 16  ;;  %v258_v30 = vld [vmem:[%s3332_s12 + $0x100] sm:$0x3] }
  0xcd   : > { %v3747_v5 = vrot.slane %v1226_v62, 5  ;;  %v404_v1 = vmax.f32 %v350_v16, 0.0  ;;  %v817_v39 = vmul.f32 %v722_v22, %v439_v47  ;;  %v1275_v55 = vunpack.c.l.b16 %v933_v44  ;;  %v3056_v4 = vld [vmem:[%s4808_s4 + $0x6] sm:$0x3]  ;;  %v882_v22 = vld [vmem:[%s4808_s4] sm:$0x3] }
  0xce   : > { %v3751_v23 = vrot.slane %v1040_v60, 5  ;;  %v3753_v20 = vrot.slane %v1044_v50, 4  ;;  %v3755_v24 = vpack.c.bf16 %v804_v53, %v804_v53  ;;  %v3763_v62 = vrot.slane %v1050_v15, 5  ;;  %v3073_v50 = vld [vmem:[%s4808_s4 + $0x8] sm:$0x3]  ;;  %v232_v15 = vld [vmem:[%s3332_s12 + $0x30] sm:$0xff] }
  0xcf   : > { %v727_v33 = vpop.permute.xlu1 %726  ;;  %v3765_v16 = vpack.c.bf16 %v805_v6, %v805_v6  ;;  %v3768_v47 = vpack.c.b16 %v1275_v55, %v1274_v0  ;;  %v1033_v53 = vrot.slane %v1031_v61, 4  ;;  %v1036_v44 = vrot.slane %v1034_v3, 5 }
  0xd0   : > { %v667_v25 = vpop.permute.xlu0 %666  ;;  %v328_v12 = vmul.f32 %v3337_v31, %v270_v41  ;;  %v316_v57 = vmul.f32 %v3337_v31, %v258_v30  ;;  %v3778_v17 = vmul.f32 %v547_v9, %v404_v1  ;;  %v3780_v6 = vpack.c.bf16 %v817_v39, %v817_v39  ;;  %v3787_v3 = vpop.permute.xlu2 %731 }
  0xd1   : > { %2992 = vmatmul.msk.bf16.gmra.mxu0 %vm1320_vm4, %v3768_v47  ;;  %v2046_v55 = vsel %vm1369_vm0, %v3056_v4, 0  ;;  %v1591_v0 = vsel %vm1369_vm0, %v882_v22, 0  ;;  %v1127_v61 = vshrl.u32 %v3755_v24, 16  ;;  %v2202_v9 = vsel %vm1369_vm0, %v3073_v50, 0 }
  0xd2   : > { %v386_v41 = vadd.f32 %v3353_v37, %v328_v12  ;;  %v374_v30 = vadd.f32 %v3353_v37, %v316_v57  ;;  %2055 = vmatpush.bf16.msrb.mxu3 %v2046_v55  ;;  %1600 = vmatpush.bf16.msrb.mxu1 %v1591_v0  ;;  %v1130_v1 = vshll.u32 %v3755_v24, 16  ;;  %v306_v39 = vmul.f32 %v3337_v31, %v248_v42 }
  0xd3   : > { %v291_v4 = vmul.f32 %v3337_v31, %v233_v59  ;;  %v290_v22 = vmul.f32 %v3337_v31, %v232_v15  ;;  %2211 = vmatpush.bf16.msrb.mxu0 %v2202_v9  ;;  %v1136_v60 = vshll.u32 %v3765_v16, 16  ;;  %v1037_v29 = vor.u32 %v1036_v44, %v1033_v53  ;;  %v3805_v31 = vld [vmem:[%s4807_s3] ss:$0 sm:$0xff] }
  0xd4   : > { %v440_v11 = vmax.f32 %v386_v41, 0.0  ;;  %v428_v12 = vmax.f32 %v374_v30, 0.0  ;;  %v1140_v57 = vshrl.u32 %v3765_v16, 16  ;;  %v4834_v55 = vrot.slane %v3765_v16, 5  ;;  %4913 = vst [vmem:[#allocation20_spill] sm:$0xff] %v3805_v31 }
  0xd5   : > { %v4837_v50 = vrot.slane %v3780_v6, 5  ;;  %v349_v42 = vadd.f32 %v3353_v37, %v291_v4  ;;  %v348_v53 = vadd.f32 %v3805_v31, %v290_v22  ;;  %v1047_v44 = vor.u32 %v3753_v20, %v3751_v23  ;;  %v3819_v20 = vld [vmem:[%s4806_s2] ss:$0 sm:$0xff] }
  0xd6   : > { %v818_v36 = vmul.f32 %v727_v33, %v440_v11  ;;  %v806_v59 = vmul.f32 %v667_v25, %v428_v12  ;;  %v1129_v15 = vrot.slane %v1127_v61, 4  ;;  %v1132_v41 = vrot.slane %v1130_v1, 5  ;;  %4914 = vst [vmem:[#allocation21_spill] sm:$0xff] %v3819_v20 }
  0xd7   : > { %v542_v0 = vpop.permute.xlu1 %541  ;;  %v364_v30 = vadd.f32 %v3805_v31, %v306_v39  ;;  %v403_v9 = vmax.f32 %v349_v42, 0.0  ;;  %v402_v11 = vmax.f32 %v348_v53, 0.0  ;;  %v1038_v33 = vrot.slane %v1037_v29, 4 }
  0xd8   : > { %v537_v56 = vpop.permute.xlu0 %536  ;;  %v872_v37 = vpack.c.bf16 %v818_v36, %v818_v36  ;;  %v860_v4 = vpack.c.bf16 %v806_v59, %v806_v59  ;;  %v1775_v25 = vrot.slane %v4834_v55, 4  ;;  %v1232_v12 = vshll.u32 %v3780_v6, 16  ;;  %v617_v49 = vpop.permute.xlu2 %616 }
  0xd9   : > { %v1803_v22 = vrot.slane %v4837_v50, 4  ;;  %v307_v61 = vmul.f32 %v3819_v20, %v249_v13  ;;  %v781_v39 = vmul.f32 %v542_v0, %v403_v9  ;;  %v1048_v42 = vrot.slane %v1047_v44, 4 }
  0xda   : > { %v1804_v1 = vrot.slane %v872_v37, 5  ;;  %v1776_v36 = vrot.slane %v860_v4, 5  ;;  %v1236_v29 = vshrl.u32 %v3780_v6, 16  ;;  %v418_v59 = vmax.f32 %v364_v30, 0.0 }
  0xdb   : > { %v780_v53 = vmul.f32 %v537_v56, %v402_v11  ;;  %v1133_v55 = vor.u32 %v1132_v41, %v1129_v15  ;;  %v1043_v13 = vsel %vm3421_vm3, %v1038_v33, %v3751_v23  ;;  %v1053_v0 = vsel %vm3421_vm3, %v1048_v42, %v3763_v62 }
  0xdc   : > { %v3825_v50 = vsel %vm3517_vm7, %v1803_v22, %v1804_v1  ;;  %v3829_v7 = vsel %vm3517_vm7, %v1775_v25, %v1776_v36  ;;  %v1138_v44 = vrot.slane %v1136_v60, 5  ;;  %v1142_v56 = vrot.slane %v1140_v57, 4 }
  0xdd   : > { %4915 = vst [vmem:[#allocation22_spill] sm:$0xff] %v3825_v50  ;;  %v1146_v15 = vshll.u32 %v860_v4, 16  ;;  %v365_v41 = vadd.f32 %v3805_v31, %v307_v61  ;;  %v1234_v30 = vrot.slane %v1232_v12, 5  ;;  %v1242_v9 = vshll.u32 %v872_v37, 16  ;;  %v260_v61 = vld [vmem:[%s3332_s12 + $0x110] sm:$0xff] }
  0xde   : > { %4916 = vst [vmem:[#allocation23_spill] sm:$0xff] %v3829_v7  ;;  %v3838_v11 = vpack.c.bf16 %v781_v39, %v781_v39  ;;  %v3840_v25 = vpack.c.bf16 %v780_v53, %v780_v53  ;;  %v1238_v22 = vrot.slane %v1236_v29, 4  ;;  %v1284_v1 = vunpack.c.l.b16 %v1043_v13  ;;  %v259_v53 = vld [vmem:[%s3332_s12 + $0x108] sm:$0xff] }
  0xdf   : > { %v1285_v23 = vunpack.c.l.b16 %v1053_v0  ;;  %v1134_v33 = vrot.slane %v1133_v55, 4  ;;  %v677_v36 = vpop.permute.xlu1 %676  ;;  %v3846_v60 = vpack.c.bf16 %v3778_v17, %v3778_v17  ;;  %v4917_v57 = vmax.f32 %v3741_v19, 0.0 }
  0xe0   : > { %v3842_v62 = vpop.permute.xlu0 %671  ;;  %v796_v4 = vmul.f32 %v617_v49, %v418_v59  ;;  %v935_v12 = vshrl.u32 %v3840_v25, 16  ;;  %v1148_v39 = vrot.slane %v1146_v15, 5  ;;  %v419_v42 = vmax.f32 %v365_v41, 0.0 }
  0xe1   : > { %v819_v37 = vmul.f32 %v3787_v3, %v4917_v57  ;;  %v3853_v29 = vpack.c.b16 %v1285_v23, %v1284_v1  ;;  %v1143_v55 = vor.u32 %v1142_v56, %v1138_v44  ;;  %v1244_v13 = vrot.slane %v1242_v9, 5 }
  0xe2   : > { %v944_v0 = vshll.u32 %v3838_v11, 16  ;;  %v938_v17 = vshll.u32 %v3840_v25, 16  ;;  %v1229_v19 = vor.u32 %v3747_v5, %v3743_v26  ;;  %v1139_v49 = vsel %vm3421_vm3, %v1134_v33, %v1138_v44  ;;  %v622_v44 = vpop.permute.xlu2 %621 }
  0xe3   : > { %4918 = vst [vmem:[#allocation24_spill] sm:$0xff] %v3853_v29  ;;  %2997 = vmatmul.msk.bf16.gmra.mxu1 %vm1320_vm4, %v3853_v29  ;;  %v1144_v3 = vrot.slane %v1143_v55, 4  ;;  %v1239_v59 = vor.u32 %v1238_v22, %v1234_v30  ;;  %v318_v56 = vmul.f32 %v3819_v20, %v260_v61  ;;  %v948_v15 = vshrl.u32 %v3838_v11, 16  ;;  %v272_v29 = vld [vmem:[%s3332_s12 + $0x170] sm:$0xff] }
  0xe4   : > { %v937_v41 = vrot.slane %v935_v12, 4  ;;  %v1230_v9 = vrot.slane %v1229_v19, 4  ;;  %v317_v1 = vmul.f32 %v3819_v20, %v259_v53  ;;  %v305_v57 = vmul.f32 %v3819_v20, %v247_v58 }
  0xe5   : > { %v1149_v26 = vsel %vm3421_vm3, %v1144_v3, %v1148_v39  ;;  %v1240_v5 = vrot.slane %v1239_v59, 4  ;;  %v376_v23 = vadd.f32 %v3805_v31, %v318_v56  ;;  %v940_v33 = vrot.slane %v938_v17, 5 }
  0xe6   : > { %v1292_v55 = vunpack.c.l.b16 %v1139_v49  ;;  %v1293_v22 = vunpack.c.l.b16 %v1149_v26  ;;  %v1235_v61 = vsel %vm3421_vm3, %v1230_v9, %v1234_v30  ;;  %v3875_v12 = vpack.c.bf16 %v819_v37, %v819_v37 }
  0xe7   : > { %v1245_v53 = vsel %vm3421_vm3, %v1240_v5, %v1244_v13  ;;  %v430_v19 = vmax.f32 %v376_v23, 0.0  ;;  %v375_v39 = vadd.f32 %v3805_v31, %v317_v1  ;;  %v3880_v3 = vpack.c.bf16 %v796_v4, %v796_v4  ;;  %v612_v56 = vpop.permute.xlu1 %611  ;;  %v237_v1 = vld [vmem:[%s3332_s12 + $0x58] sm:$0x3] }
  0xe8   : > { %4919 = vst [vmem:[#allocation25_spill] sm:$0xff] %v3875_v12  ;;  %v3882_v58 = vpack.c.b16 %v1293_v22, %v1292_v55  ;;  %v1300_v17 = vunpack.c.l.b16 %v1235_v61  ;;  %v1301_v49 = vunpack.c.l.b16 %v1245_v53  ;;  %v797_v59 = vmul.f32 %v622_v44, %v419_v42  ;;  %v737_v9 = vpop.permute.xlu0 %736 }
  0xe9   : > { %4920 = vst [vmem:[#allocation26_spill] sm:$0xff] %v3880_v3  ;;  %v363_v30 = vadd.f32 %v3805_v31, %v305_v57  ;;  %v330_v37 = vmul.f32 %v3819_v20, %v272_v29  ;;  %v946_v26 = vrot.slane %v944_v0, 5  ;;  %v950_v7 = vrot.slane %v948_v15, 4 }
  0xea   : > { %4921 = vst [vmem:[#allocation27_spill] sm:$0xff] %v3882_v58  ;;  %3001 = vmatmul.msk.bf16.gmra.mxu2 %vm1320_vm4, %v3882_v58  ;;  %v3888_v13 = vpack.c.b16 %v1301_v49, %v1300_v17  ;;  %v941_v4 = vor.u32 %v940_v33, %v937_v41  ;;  %v808_v5 = vmul.f32 %v677_v36, %v430_v19  ;;  %v429_v23 = vmax.f32 %v375_v39, 0.0  ;;  %v273_v39 = vld [vmem:[%s3332_s12 + $0x178] sm:$0x3] }
  0xeb   : > { %v954_v42 = vshll.u32 %v3846_v60, 16  ;;  %v1247_v44 = vshrl.u32 %v3875_v12, 16  ;;  %v1250_v57 = vshll.u32 %v3875_v12, 16  ;;  %v1064_v29 = vshll.u32 %v3880_v3, 16 }
  0xec   : > { %4922 = vst [vmem:[#allocation28_spill] sm:$0xff] %v3888_v13  ;;  %3005 = vmatmul.msk.bf16.gmra.mxu3 %vm1320_vm4, %v3888_v13  ;;  %v1068_v0 = vshrl.u32 %v3880_v3, 16  ;;  %v3898_v15 = vpack.c.bf16 %v797_v59, %v797_v59  ;;  %v417_v41 = vmax.f32 %v363_v30, 0.0  ;;  %v388_v36 = vadd.f32 %v3805_v31, %v330_v37  ;;  %v261_v13 = vld [vmem:[%s3332_s12 + $0x118] sm:$0x3] }
  0xed   : > { %v295_v33 = vmul.f32 %v3819_v20, %v237_v1  ;;  %v942_v55 = vrot.slane %v941_v4, 4  ;;  %v951_v22 = vor.u32 %v950_v7, %v946_v26  ;;  %v3903_v53 = vpack.c.bf16 %v808_v5, %v808_v5 }
  0xee   : > { %4923 = vst [vmem:[#allocation29_spill] sm:$0xff] %v3898_v15  ;;  %v807_v19 = vmul.f32 %v3842_v62, %v429_v23  ;;  %v956_v17 = vrot.slane %v954_v42, 5  ;;  %v3907_v49 = vrot.slane %v1247_v44, 4  ;;  %v3909_v59 = vrot.slane %v1250_v57, 5 }
  0xef   : > { %4924 = vst [vmem:[#allocation30_spill] sm:$0xff] %v3903_v53  ;;  %v3911_v30 = vrot.slane %v1064_v29, 5  ;;  %v3913_v37 = vrot.slane %v1068_v0, 4  ;;  %v1074_v1 = vshll.u32 %v3898_v15, 16  ;;  %v795_v4 = vmul.f32 %v612_v56, %v417_v41  ;;  %v742_v61 = vpop.permute.xlu1 %741  ;;  %v235_v15 = vld [vmem:[%s3332_s12 + $0x48] sm:$0xff] }
  0xf0   : > { %v442_v7 = vmax.f32 %v388_v36, 0.0  ;;  %v3918_v5 = vadd.f32 %v3805_v31, %v295_v33  ;;  %v947_v62 = vsel %vm3421_vm3, %v942_v55, %v946_v26  ;;  %v952_v23 = vrot.slane %v951_v22, 4  ;;  %v682_v56 = vpop.permute.xlu0 %681 }
  0xf1   : > { %v331_v42 = vmul.f32 %v3819_v20, %v273_v39  ;;  %v1160_v44 = vshll.u32 %v3903_v53, 16  ;;  %v3924_v57 = vpack.c.bf16 %v807_v19, %v807_v19  ;;  %v3926_v29 = vpack.c.bf16 %v795_v4, %v795_v4 }
  0xf2   : > { %v820_v0 = vmul.f32 %v737_v9, %v442_v7  ;;  %v957_v41 = vsel %vm3421_vm3, %v952_v23, %v956_v17  ;;  %v1276_v36 = vunpack.c.l.b16 %v947_v62  ;;  %v319_v33 = vmul.f32 %v3819_v20, %v261_v13  ;;  %v236_v13 = vld [vmem:[%s3332_s12 + $0x50] sm:$0xff] }
  0xf3   : > { %4925 = vst [vmem:[#allocation31_spill] sm:$0xff] %v3924_v57  ;;  %v389_v26 = vadd.f32 %v3805_v31, %v331_v42  ;;  %v1164_v55 = vshrl.u32 %v3903_v53, 16  ;;  %v1055_v22 = vshrl.u32 %v3926_v29, 16  ;;  %v1058_v19 = vshll.u32 %v3926_v29, 16 }
  0xf4   : > { %4926 = vst [vmem:[#allocation32_spill] sm:$0xff] %v3926_v29  ;;  %v3935_v39 = vpack.c.bf16 %v820_v0, %v820_v0  ;;  %v1076_v9 = vrot.slane %v1074_v1, 5  ;;  %v1277_v4 = vunpack.c.l.b16 %v957_v41  ;;  %v377_v17 = vadd.f32 %v3805_v31, %v319_v33 }
  0xf5   : > { %v443_v7 = vmax.f32 %v389_v26, 0.0  ;;  %v407_v62 = vmax.f32 %v3918_v5, 0.0  ;;  %v1057_v42 = vrot.slane %v1055_v22, 4  ;;  %v1060_v58 = vrot.slane %v1058_v19, 5 }
  0xf6   : > { %v3942_v3 = vrot.slane %v1160_v44, 5  ;;  %v1151_v12 = vshrl.u32 %v3924_v57, 16  ;;  %v1154_v0 = vshll.u32 %v3924_v57, 16  ;;  %v3946_v29 = vpack.c.b16 %v1277_v4, %v1276_v36 }
  0xf7   : > { %v1166_v1 = vrot.slane %v1164_v55, 4  ;;  %v821_v26 = vmul.f32 %v742_v61, %v443_v7  ;;  %v431_v33 = vmax.f32 %v377_v17, 0.0  ;;  %v1256_v5 = vshll.u32 %v3935_v39, 16 }
  0xf8   : > { %v1260_v22 = vshrl.u32 %v3935_v39, 16  ;;  %2993 = vmatmul.msk.bf16.gmra.mxu0 %vm1320_vm4, %v3946_v29  ;;  %v294_v44 = vmul.f32 %v3819_v20, %v236_v13  ;;  %v293_v19 = vmul.f32 %v3819_v20, %v235_v15  ;;  %v1061_v36 = vor.u32 %v1060_v58, %v1057_v42  ;;  %v557_v15 = vpop.permute.xlu1 %556  ;;  %v562_v20 = vpop.permute.xlu2 %561 }
  0xf9   : > { %v875_v23 = vpack.c.bf16 %v821_v26, %v821_v26  ;;  %v809_v57 = vmul.f32 %v682_v56, %v431_v33  ;;  %v1071_v55 = vor.u32 %v3913_v37, %v3911_v30  ;;  %v4927_v61 = vrot.slane %v3903_v53, 5  ;;  %v552_v26 = vpop.permute.xlu0 %551 }
  0xfa   : > { %v1153_v7 = vrot.slane %v1151_v12, 4  ;;  %v352_v17 = vadd.f32 %v3805_v31, %v294_v44  ;;  %v351_v41 = vadd.f32 %v3805_v31, %v293_v19  ;;  %v4928_v50 = vrot.slane %v3935_v39, 5 }
  0xfb   : > { %v1782_v4 = vrot.slane %v4927_v61, 4  ;;  %v1811_v13 = vrot.slane %v875_v23, 5  ;;  %v863_v34 = vpack.c.bf16 %v809_v57, %v809_v57  ;;  %v1062_v56 = vrot.slane %v1061_v36, 4 }
  0xfc   : > { %v1810_v21 = vrot.slane %v4928_v50, 4  ;;  %v1156_v58 = vrot.slane %v1154_v0, 5  ;;  %v1258_v42 = vrot.slane %v1256_v5, 5  ;;  %v406_v33 = vmax.f32 %v352_v17, 0.0 }
  0xfd   : > { %v405_v37 = vmax.f32 %v351_v41, 0.0  ;;  %v1262_v53 = vrot.slane %v1260_v22, 4  ;;  %v1783_v44 = vrot.slane %v863_v34, 5  ;;  %v1072_v19 = vrot.slane %v1071_v55, 4 }
  0xfe   : > { %v3965_v12 = vsel %vm3517_vm7, %v1810_v21, %v1811_v13  ;;  %v1170_v61 = vshll.u32 %v863_v34, 16  ;;  %v784_v31 = vmul.f32 %v557_v15, %v406_v33  ;;  %v1067_v57 = vsel %vm3421_vm3, %v1062_v56, %v3911_v30 }
  0xff   : > { %v783_v50 = vmul.f32 %v552_v26, %v405_v37  ;;  %v1266_v36 = vshll.u32 %v875_v23, 16  ;;  %v3972_v0 = vsel %vm3517_vm7, %v1782_v4, %v1783_v44  ;;  %v1077_v41 = vsel %vm3421_vm3, %v1072_v19, %v1076_v9 }
 0x100   : > { %v1286_v5 = vunpack.c.l.b16 %v1067_v57  ;;  %v785_v21 = vmul.f32 %v562_v20, %v407_v62  ;;  %v3976_v22 = vpack.c.bf16 %v784_v31, %v784_v31  ;;  %v1287_v34 = vunpack.c.l.b16 %v1077_v41 }
 0x101   : > { %v3978_v55 = vpack.c.bf16 %v783_v50, %v783_v50  ;;  %v1157_v17 = vor.u32 %v1156_v58, %v1153_v7  ;;  %v1167_v13 = vor.u32 %v1166_v1, %v3942_v3  ;;  %v1253_v30 = vor.u32 %v3909_v59, %v3907_v49 }
 0x102   : > { %v1263_v23 = vor.u32 %v1262_v53, %v1258_v42  ;;  %v1172_v15 = vrot.slane %v1170_v61, 5  ;;  %v968_v4 = vshll.u32 %v3976_v22, 16  ;;  %v972_v26 = vshrl.u32 %v3976_v22, 16 }
 0x103   : > { %v959_v9 = vshrl.u32 %v3978_v55, 16  ;;  %v1268_v20 = vrot.slane %v1266_v36, 5  ;;  %v962_v31 = vshll.u32 %v3978_v55, 16  ;;  %v3987_v62 = vpack.c.b16 %v1287_v34, %v1286_v5 }
 0x104   : > { %v1158_v56 = vrot.slane %v1157_v17, 4  ;;  %v1703_v7 = vrot.slane %v3540_v43, 5  ;;  %v3990_v1 = vpack.c.bf16 %v785_v21, %v785_v21  ;;  %v1168_v49 = vrot.slane %v1167_v13, 4 }
 0x105   : > { %4929 = vst [vmem:[#allocation33_spill] sm:$0xff] %v3987_v62  ;;  %v961_v58 = vrot.slane %v959_v9, 4  ;;  %v964_v53 = vrot.slane %v962_v31, 5  ;;  %2998 = vmatmul.msk.bf16.gmra.mxu1 %vm1320_vm4, %v3987_v62  ;;  %v1254_v33 = vrot.slane %v1253_v30, 4  ;;  %v1264_v37 = vrot.slane %v1263_v23, 4 }
 0x106   : > { %v1163_v59 = vsel %vm3421_vm3, %v1158_v56, %v3942_v3  ;;  %v1494_v44 = vunpack.c.l.b16 %v3544_v46  ;;  %v970_v19 = vrot.slane %v968_v4, 5  ;;  %v974_v61 = vrot.slane %v972_v26, 4 }
 0x107   : > { %v1173_v50 = vsel %vm3421_vm3, %v1168_v49, %v1172_v15  ;;  %v1294_v57 = vunpack.c.l.b16 %v1163_v59  ;;  %v1259_v41 = vsel %vm3421_vm3, %v1254_v33, %v1258_v42  ;;  %v1269_v5 = vsel %vm3421_vm3, %v1264_v37, %v1268_v20 }
 0x108   : > { %v1295_v36 = vunpack.c.l.b16 %v1173_v50  ;;  %v3023_v21 = vrot.slane %v3544_v46, 9  ;;  %v978_v3 = vshll.u32 %v3990_v1, 16  ;;  %v1302_v34 = vunpack.c.l.b16 %v1259_v41 }
 0x109   : > { %v1303_v17 = vunpack.c.l.b16 %v1269_v5  ;;  %v1705_v13 = vrot.slane %v1703_v7, 4  ;;  %v965_v23 = vor.u32 %v964_v53, %v961_v58  ;;  %v975_v15 = vor.u32 %v974_v61, %v970_v19 }
 0x10a   : > { %v4006_v30 = vpack.c.b16 %v1295_v36, %v1294_v57  ;;  %v1706_v26 = vrot.slane %v3561_v63, 5  ;;  %v4930_v9 = vunpack.c.l.b16 %v3540_v43  ;;  %v980_v20 = vrot.slane %v978_v3, 5  ;;  %v3125_v57 = vld [vmem:[%s4808_s4 + $0xe] sm:$0x3]  ;;  %v3091_v36 = vld [vmem:[%s4808_s4 + $0xa] sm:$0x3] }
 0x10b   : > { %v4008_v4 = vpack.c.b16 %v1303_v17, %v1302_v34  ;;  %v966_v42 = vrot.slane %v965_v23, 4  ;;  %v976_v31 = vrot.slane %v975_v15, 4  ;;  %v1704_v56 = vsel %vm3517_vm7, %v3023_v21, %v1703_v7 }
 0x10c   : > { %3002 = vmatmul.msk.bf16.gmra.mxu2 %vm1320_vm4, %v4006_v30  ;;  %v1526_v46 = vpack.c.b16 %v4930_v9, %v1494_v44  ;;  %v1707_v63 = vsel %vm3517_vm7, %v1705_v13, %v1706_v26  ;;  %v1497_v59 = vunpack.c.l.b16 %v3652_v48  ;;  %v1496_v33 = vunpack.c.l.b16 %v3657_v51  ;;  %v3108_v44 = vld [vmem:[%s4808_s4 + $0xc] sm:$0x3] }
 0x10d   : > { %3006 = vmatmul.msk.bf16.gmra.mxu3 %vm1320_vm4, %v4008_v4  ;;  %v971_v58 = vsel %vm3421_vm3, %v966_v42, %v970_v19  ;;  %v981_v49 = vsel %vm3421_vm3, %v976_v31, %v980_v20  ;;  %v1816_v7 = vunpack.c.l.b16 %v1707_v63  ;;  %v1710_v19 = vrot.slane %v3652_v48, 5  ;;  %v3143_v48 = vld [vmem:[%s4808_s4 + $0x10] sm:$0x3] }
 0x10e   : > { %v1278_v53 = vunpack.c.l.b16 %v971_v58  ;;  %v1279_v43 = vunpack.c.l.b16 %v981_v49  ;;  %v3024_v61 = vrot.slane %v3657_v51, 9  ;;  %v1815_v50 = vunpack.c.l.b16 %v1704_v56 }
 0x10f   : > { %v1717_v41 = vrot.slane %v3838_v11, 5  ;;  %v3025_v5 = vrot.slane %v3840_v25, 9  ;;  %v1527_v21 = vpack.c.b16 %v1497_v59, %v1496_v33  ;;  %v2476_v3 = vsel %vm1369_vm0, %v3108_v44, 0 }
 0x110   : > { %v4027_v37 = vpack.c.b16 %v1279_v43, %v1278_v53  ;;  %v1847_v51 = vpack.c.b16 %v1816_v7, %v1815_v50  ;;  %2485 = vmatpush.bf16.msra.mxu2 %v2476_v3  ;;  %v2632_v34 = vsel %vm1369_vm0, %v3125_v57, 0  ;;  %v2342_v17 = vsel %vm1369_vm0, %v3091_v36, 0 }
 0x111   : > { %v1713_v13 = vrot.slane %v3695_v38, 5  ;;  %2641 = vmatpush.bf16.msra.mxu3 %v2632_v34  ;;  %2351 = vmatpush.bf16.msra.mxu1 %v2342_v17  ;;  %v2772_v23 = vsel %vm1369_vm0, %v3143_v48, 0  ;;  %v1711_v15 = vsel %vm3517_vm7, %v3024_v61, %v1710_v19  ;;  %v1712_v26 = vrot.slane %v1710_v19, 4 }
 0x112   : > { %2994 = vmatmul.msk.bf16.gmra.mxu0 %vm1320_vm4, %v4027_v37  ;;  %v1718_v42 = vsel %vm3517_vm7, %v3025_v5, %v1717_v41  ;;  %v1720_v9 = vrot.slane %v3846_v60, 5  ;;  %v1817_v20 = vunpack.c.l.b16 %v1711_v15  ;;  %v1519_v56 = vunpack.c.l.b16 %v3466_v10 }
 0x113   : > { %2781 = vmatpush.bf16.msra.mxu0 %v2772_v23  ;;  %v1714_v38 = vsel %vm3517_vm7, %v1712_v26, %v1713_v13  ;;  %v1819_v49 = vunpack.c.l.b16 %v1718_v42  ;;  %v1518_v43 = vunpack.c.l.b16 %v3447_v54  ;;  %v1513_v60 = vunpack.c.l.b16 %v3614_v32 }
 0x114   : > { %v1818_v31 = vunpack.c.l.b16 %v1714_v38  ;;  %v1512_v59 = vunpack.c.l.b16 %v3610_v27  ;;  %v3032_v33 = vrot.slane %v3610_v27, 9  ;;  %v3035_v44 = vrot.slane %v3447_v54, 9 }
 0x115   : > { %3007 = vmatmul.msk.bf16.vlgmr.msrb.gmra.mxu1 %vm1320_vm4, %v1526_v46  ;;  %v1719_v46 = vrot.slane %v1717_v41, 4  ;;  %v4074_v19 = vpack.c.b16 %v1519_v56, %v1518_v43  ;;  %v1840_v61 = vunpack.c.l.b16 %v3525_v14  ;;  %v4931_v57 = vrot.slane %v3614_v32, 5  ;;  %v4937_v43 = vld [vmem:[#allocation16_spill] sm:$0xff] }
 0x116   : > { %v4065_v63 = vpack.c.b16 %v1818_v31, %v1817_v20  ;;  %v4077_v50 = vpack.c.b16 %v1513_v60, %v1512_v59  ;;  %v4932_v41 = vrot.slane %v3466_v10, 5  ;;  %v1498_v54 = vunpack.c.l.b16 %v3840_v25 }
 0x117   : > { %v1721_v58 = vsel %vm3517_vm7, %v1719_v46, %v1720_v9  ;;  %v1767_v36 = vsel %vm3517_vm7, %v3032_v33, %v4931_v57  ;;  %v1499_v14 = vunpack.c.l.b16 %v3838_v11  ;;  %v1521_v32 = vunpack.c.l.b16 %v3599_v18 }
 0x118   : > { %v1820_v53 = vunpack.c.l.b16 %v1721_v58  ;;  %v1788_v27 = vsel %vm3517_vm7, %v3035_v44, %v4932_v41  ;;  %v3036_v10 = vrot.slane %v3579_v45, 9  ;;  %v1842_v25 = vunpack.c.l.b16 %v3639_v35 }
 0x119   : > { %v1839_v5 = vunpack.c.l.b16 %v1788_v27  ;;  %v4097_v3 = vpack.c.b16 %v1499_v14, %v1498_v54  ;;  %v1834_v34 = vunpack.c.l.b16 %v3646_v40  ;;  %v1501_v13 = vunpack.c.l.b16 %v3976_v22  ;;  %v4165_v27 = vpop.f32.mrf.mxu1 }
 0x11a   : > { %v4071_v7 = vpack.c.b16 %v1820_v53, %v1819_v49  ;;  %v1724_v35 = vrot.slane %v3976_v22, 5  ;;  %v1515_v42 = vunpack.c.l.b16 %v3765_v16  ;;  %v1514_v9 = vunpack.c.l.b16 %v3755_v24 }
 0x11b   : > { %v4093_v48 = vpack.c.b16 %v1840_v61, %v1839_v5  ;;  %v3033_v38 = vrot.slane %v3755_v24, 9  ;;  %v1727_v46 = vrot.slane %v3990_v1, 5  ;;  %v3026_v20 = vrot.slane %v3978_v55, 9 }
 0x11c   : > { %3040 = vmatmul.msk.bf16.vlgmr.msrb.gmra.mxu2 %vm1320_vm4, %v1847_v51  ;;  %v1520_v51 = vunpack.c.l.b16 %v3579_v45  ;;  %v1833_v45 = vunpack.c.l.b16 %v1767_v36  ;;  %v1726_v40 = vrot.slane %v1724_v35, 4  ;;  %v4135_v31 = vpack.c.b16 %v1515_v42, %v1514_v9 }
 0x11d   : > { %3057 = vmatmul.msk.bf16.vlgmr.msrb.gmra.mxu3 %vm1320_vm4, %v1527_v21  ;;  %4933 = vst [vmem:[#allocation34_spill] sm:$0xff] %v4093_v48  ;;  %v4936_v56 = vrot.slane %v3765_v16, 5  ;;  %v1725_v49 = vsel %vm3517_vm7, %v3026_v20, %v1724_v35  ;;  %v1503_v1 = vunpack.c.l.b16 %v3392_v2  ;;  %v1523_v53 = vunpack.c.l.b16 %v3780_v6 }
 0x11e   : > { %v4117_v23 = vpack.c.b16 %v1834_v34, %v1833_v45  ;;  %v1728_v22 = vsel %vm3517_vm7, %v1726_v40, %v1727_v46  ;;  %v1821_v16 = vunpack.c.l.b16 %v1725_v49  ;;  %v1522_v60 = vunpack.c.l.b16 %v4937_v43 }
 0x11f   : > { %v1774_v58 = vsel %vm3517_vm7, %v3033_v38, %v4936_v56  ;;  %v1822_v24 = vunpack.c.l.b16 %v1728_v22  ;;  %v3037_v59 = vrot.slane %v4937_v43, 9  ;;  %v1731_v44 = vrot.slane %v3392_v2, 5  ;;  %v4940_v2 = vld [vmem:[#allocation2_spill] sm:$0xff] }
 0x120   : > { %v4159_v57 = vpack.c.b16 %v1523_v53, %v1522_v60  ;;  %v4939_v36 = vrot.slane %v3780_v6, 5  ;;  %v3027_v54 = vrot.slane %v3376_v52, 9  ;;  %v1734_v14 = vrot.slane %v4940_v2, 5  ;;  %v4946_v38 = vld [vmem:[#allocation10_spill] sm:$0xff]  ;;  %v4191_v20 = vpop.f32.mrf.mxu3 }
 0x121   : > { %v4152_v33 = vpack.c.b16 %v1822_v24, %v1821_v16  ;;  %v1733_v5 = vrot.slane %v1731_v44, 4  ;;  %v4188_v9 = vpop.f32.mrf.mxu2  ;;  %v1505_v46 = vunpack.c.l.b16 %v4946_v38  ;;  %v1738_v49 = vrot.slane %v4946_v38, 5  ;;  %v4951_v16 = vld [vmem:[#allocation31_spill] sm:$0xff]  ;;  %v4957_v38 = vld [vmem:[#allocation17_spill] sm:$0xff] }
 0x122   : > { %3074 = vmatmul.msk.bf16.vlgmr.msrb.gmra.mxu0 %vm1320_vm4, %v3768_v47  ;;  %v4934_v47 = vrot.slane %v3599_v18, 5  ;;  %v1500_v18 = vunpack.c.l.b16 %v3978_v55  ;;  %v1502_v55 = vunpack.c.l.b16 %v3376_v52  ;;  %4938 = vst [vmem:[#allocation16_spill] sm:$0xff] %v4159_v57  ;;  %v1802_v41 = vsel %vm3517_vm7, %v3037_v59, %v4939_v36  ;;  %v4952_v59 = vld [vmem:[#allocation12_spill] sm:$0xff] }
 0x123   : > { %v1732_v6 = vsel %vm3517_vm7, %v3027_v54, %v1731_v44  ;;  %v1843_v34 = vunpack.c.l.b16 %v1802_v41  ;;  %v1516_v43 = vunpack.c.l.b16 %v4951_v16  ;;  %v3034_v60 = vrot.slane %v4951_v16, 9 }
 0x124   : > { %v1795_v11 = vsel %vm3517_vm7, %v3036_v10, %v4934_v47  ;;  %v4122_v26 = vpack.c.b16 %v1501_v13, %v1500_v18  ;;  %v4155_v61 = vpack.c.b16 %v1503_v1, %v1502_v55  ;;  %v4942_v10 = vld [vmem:[#allocation23_spill] sm:$0xff]  ;;  %v1823_v45 = vunpack.c.l.b16 %v1732_v6  ;;  %v4950_v1 = vld [vmem:[#allocation30_spill] sm:$0xff]  ;;  %v4955_v6 = vld [vmem:[#allocation13_spill] sm:$0xff] }
 0x125   : > { %3008 = vmatmul.msk.bf16.gmra.mxu1 %vm1320_vm4, %v1527_v21  ;;  %v4101_v21 = vpack.c.b16 %v1521_v32, %v1520_v51  ;;  %v1841_v17 = vunpack.c.l.b16 %v1795_v11  ;;  %v4941_v32 = vld [vmem:[#allocation22_spill] sm:$0xff]  ;;  %v1836_v47 = vunpack.c.l.b16 %v4942_v10  ;;  %v1735_v11 = vsel %vm3517_vm7, %v1733_v5, %v1734_v14  ;;  %v4943_v18 = vld [vmem:[#allocation3_spill] sm:$0xff] }
 0x126   : > { %v1844_v51 = vunpack.c.l.b16 %v4941_v32  ;;  %v1824_v52 = vunpack.c.l.b16 %v1735_v11  ;;  %v4944_v13 = vld [vmem:[#allocation11_spill] sm:$0xff]  ;;  %4947 = vst [vmem:[#allocation22_spill] sm:$0xff] %v4191_v20  ;;  %v1517_v53 = vunpack.c.l.b16 %v4950_v1  ;;  %v1741_v44 = vrot.slane %v4952_v59, 5 }
 0x127   : > { %v4119_v15 = vpack.c.b16 %v1842_v25, %v1841_v17  ;;  %v1835_v25 = vunpack.c.l.b16 %v1774_v58  ;;  %v4179_v17 = vpop.f32.mrf.mxu1  ;;  %v1504_v35 = vunpack.c.l.b16 %v4944_v13  ;;  %v4201_v58 = vpop.f32.mrf.mxu0  ;;  %v3028_v24 = vrot.slane %v4944_v13, 9  ;;  %v4956_v11 = vld [vmem:[#allocation19_spill] sm:$0xff]  ;;  %v274_v13 = vld [vmem:[%s3332_s12 + $0x180] sm:$0xff] }
 0x128   : > { %v4186_v42 = vpack.c.b16 %v1844_v51, %v1843_v34  ;;  %v4193_v22 = vpack.c.b16 %v1824_v52, %v1823_v45  ;;  %v1740_v54 = vrot.slane %v1738_v49, 4  ;;  %v4215_v2 = vpop.f32.mrf.mxu3  ;;  %v4217_v14 = vpack.c.b16 %v1517_v53, %v1516_v43  ;;  %v4959_v53 = vld [vmem:[#allocation21_spill] sm:$0xff] }
 0x129   : > { %4935 = vst [vmem:[#allocation35_spill] sm:$0xff] %v4119_v15  ;;  %v4184_v40 = vpack.c.b16 %v1836_v47, %v1835_v25  ;;  %v4195_v56 = vpack.c.b16 %v1505_v46, %v1504_v35  ;;  %v4211_v36 = vpop.f32.mrf.mxu2  ;;  %v1739_v41 = vsel %vm3517_vm7, %v3028_v24, %v1738_v49  ;;  %v4954_v5 = vrot.slane %v4950_v1, 5  ;;  %v275_v47 = vld [vmem:[%s3332_s12 + $0x188] sm:$0xff]  ;;  %v4958_v49 = vld [vmem:[#allocation25_spill] sm:$0xff] }
 0x12a   : > { %4945 = vst [vmem:[#allocation2_spill] sm:$0xff] %v4186_v42  ;;  %v1742_v51 = vsel %vm3517_vm7, %v1740_v54, %v1741_v44  ;;  %v1825_v10 = vunpack.c.l.b16 %v1739_v41  ;;  %v1506_v25 = vunpack.c.l.b16 %v4956_v11  ;;  %v1525_v34 = vunpack.c.l.b16 %v3935_v39 }
 0x12b   : > { %4948 = vst [vmem:[#allocation23_spill] sm:$0xff] %v4193_v22  ;;  %v1781_v32 = vsel %vm3517_vm7, %v3034_v60, %v4954_v5  ;;  %v1826_v52 = vunpack.c.l.b16 %v1742_v51  ;;  %v1507_v46 = vunpack.c.l.b16 %v4957_v38  ;;  %v1524_v24 = vunpack.c.l.b16 %v4958_v49 }
 0x12c   : > { %3041 = vmatmul.msk.bf16.gmra.mxu2 %vm1320_vm4, %v4065_v63  ;;  %4949 = vst [vmem:[#allocation11_spill] sm:$0xff] %v4195_v56  ;;  %v3038_v1 = vrot.slane %v4958_v49, 9  ;;  %v333_v16 = vmul.f32 %v4959_v53, %v275_v47  ;;  %v332_v44 = vmul.f32 %v4959_v53, %v274_v13  ;;  %v4963_v5 = vrot.slane %v3935_v39, 5  ;;  %v4964_v47 = vld [vmem:[#allocation20_spill] sm:$0xff]  ;;  %v4965_v39 = vld [vmem:[#allocation18_spill] sm:$0xff] }
 0x12d   : > { %3058 = vmatmul.msk.bf16.gmra.mxu3 %vm1320_vm4, %v4097_v3  ;;  %4953 = vst [vmem:[#allocation10_spill] sm:$0xff] %v4215_v2  ;;  %v4241_v43 = vpack.c.b16 %v1826_v52, %v1825_v10  ;;  %v4245_v59 = vpack.c.b16 %v1507_v46, %v1506_v25  ;;  %v4252_v54 = vpack.c.b16 %v1525_v34, %v1524_v24  ;;  %v276_v10 = vld [vmem:[%s3332_s12 + $0x190] sm:$0x3]  ;;  %v1745_v52 = vrot.slane %v4957_v38, 5 }
 0x12e   : > { %v1809_v51 = vsel %vm3517_vm7, %v3038_v1, %v4963_v5  ;;  %v391_v25 = vadd.f32 %v4964_v47, %v333_v16  ;;  %v3029_v13 = vrot.slane %v4956_v11, 9  ;;  %v334_v46 = vmul.f32 %v4959_v53, %v276_v10  ;;  %v752_v16 = vpop.permute.xlu1 %751 }
 0x12f   : > { %v4232_v45 = vpop.f32.mrf.mxu0  ;;  %4960 = vst [vmem:[#allocation30_spill] sm:$0xff] %v4241_v43  ;;  %v390_v34 = vadd.f32 %v4964_v47, %v332_v44  ;;  %v1748_v24 = vrot.slane %v4965_v39, 5  ;;  %v1846_v5 = vunpack.c.l.b16 %v3965_v12  ;;  %v1838_v2 = vunpack.c.l.b16 %v3972_v0  ;;  %v747_v44 = vpop.permute.xlu0 %746 }
 0x130   : > { %4961 = vst [vmem:[#allocation31_spill] sm:$0xff] %v4245_v59  ;;  %v445_v1 = vmax.f32 %v391_v25, 0.0  ;;  %v1746_v38 = vsel %vm3517_vm7, %v3029_v13, %v1745_v52  ;;  %v1747_v11 = vrot.slane %v1745_v52, 4  ;;  %v392_v53 = vadd.f32 %v4964_v47, %v334_v46  ;;  %v4967_v13 = vld [vmem:[#allocation24_spill] sm:$0xff] }
 0x131   : > { %v444_v10 = vmax.f32 %v390_v34, 0.0  ;;  %v1845_v25 = vunpack.c.l.b16 %v1809_v51  ;;  %v1827_v0 = vunpack.c.l.b16 %v1746_v38  ;;  %v4968_v47 = vld [vmem:[#allocation32_spill] sm:$0xff]  ;;  %v757_v51 = vpop.permute.xlu2 %756 }
 0x132   : > { %3075 = vmatmul.msk.bf16.gmra.mxu0 %vm1320_vm4, %v3946_v29  ;;  %v1749_v39 = vsel %vm3517_vm7, %v1747_v11, %v1748_v24  ;;  %v1508_v52 = vunpack.c.l.b16 %v4968_v47 }
 0x133   : > { %v4289_v34 = vpack.c.b16 %v1846_v5, %v1845_v25  ;;  %v822_v24 = vmul.f32 %v747_v44, %v444_v10  ;;  %v3030_v44 = vrot.slane %v4968_v47, 9  ;;  %v4974_v25 = vld [vmem:[#allocation29_spill] sm:$0xff] }
 0x135   : > { %3009 = vmatmul.msk.bf16.gmra.mxu1 %vm1320_vm4, %v4097_v3 }
 0x13a   : > { %v4205_v55 = vpop.f32.mrf.mxu1 }
 0x13c   : > { %3042 = vmatmul.msk.bf16.gmra.mxu2 %vm1320_vm4, %v4071_v7 }
 0x13d   : > { %3059 = vmatmul.msk.bf16.gmra.mxu3 %vm1320_vm4, %v4122_v26 }
 0x142   : > { %3076 = vmatmul.msk.bf16.gmra.mxu0 %vm1320_vm4, %v4027_v37  ;;  %v4235_v35 = vpop.f32.mrf.mxu1 }
 0x145   : > { %3010 = vmatmul.msk.bf16.gmra.mxu1 %vm1320_vm4, %v4122_v26 }
 0x146   : > { %v4243_v60 = vpop.f32.mrf.mxu2 }
 0x148   : > { %v4248_v41 = vpop.f32.mrf.mxu3 }
 0x149   : > { %4962 = vst [vmem:[#allocation12_spill] sm:$0xff] %v4248_v41 }
 0x14c   : > { %3043 = vmatmul.msk.bf16.gmra.mxu2 %vm1320_vm4, %v4152_v33 }
 0x14d   : > { %3060 = vmatmul.msk.bf16.gmra.mxu3 %vm1320_vm4, %v4155_v61 }
 0x14e   : > { %v4266_v49 = vpop.f32.mrf.mxu0  ;;  %v4276_v20 = vpop.f32.mrf.mxu2 }
 0x150   : > { %v4280_v12 = vpop.f32.mrf.mxu3 }
 0x151   : > { %4966 = vst [vmem:[#allocation19_spill] sm:$0xff] %v4280_v12 }
 0x152   : > { %3077 = vmatmul.msk.bf16.gmra.mxu0 %vm1320_vm4, %v4943_v18 }
 0x155   : > { %3011 = vmatmul.msk.bf16.gmra.mxu1 %vm1320_vm4, %v4155_v61 }
 0x156   : > { %v4294_v12 = vpop.f32.mrf.mxu0 }
 0x15c   : > { %3044 = vmatmul.msk.bf16.gmra.mxu2 %vm1320_vm4, %v4193_v22 }
 0x15d   : > { %3061 = vmatmul.msk.bf16.gmra.mxu3 %vm1320_vm4, %v4195_v56 }
 0x160   : > { %v4269_v41 = vpop.f32.mrf.mxu1 }
 0x162   : > { %3078 = vmatmul.msk.bf16.gmra.mxu0 %vm1320_vm4, %v4955_v6  ;;  %v823_v6 = vmul.f32 %v752_v16, %v445_v1  ;;  %v4969_v1 = vld [vmem:[#allocation26_spill] sm:$0xff] }
 0x163   : > { %v1509_v16 = vunpack.c.l.b16 %v4969_v1  ;;  %v1752_v10 = vrot.slane %v4969_v1, 5 }
 0x164   : > { %v4292_v11 = vpack.c.bf16 %v823_v6, %v823_v6 }
 0x165   : > { %3012 = vmatmul.msk.bf16.gmra.mxu1 %vm1320_vm4, %v4195_v56  ;;  %v446_v56 = vmax.f32 %v392_v53, 0.0 }
 0x166   : > { %v2328_v6 = vrot.slane %v4292_v11, 5 }
 0x16c   : > { %3045 = vmatmul.msk.bf16.gmra.mxu2 %vm1320_vm4, %v4241_v43  ;;  %v1837_v43 = vunpack.c.l.b16 %v1781_v32  ;;  %v1828_v32 = vunpack.c.l.b16 %v1749_v39 }
 0x16d   : > { %3062 = vmatmul.msk.bf16.gmra.mxu3 %vm1320_vm4, %v4245_v59  ;;  %v4306_v5 = vpop.f32.mrf.mxu2 }
 0x16e   : > { %v4287_v46 = vpack.c.b16 %v1838_v2, %v1837_v43  ;;  %v4296_v38 = vpack.c.b16 %v1828_v32, %v1827_v0  ;;  %v824_v2 = vmul.f32 %v757_v51, %v446_v56  ;;  %v4302_v43 = vpack.c.bf16 %v822_v24, %v822_v24  ;;  %4972 = vst [vmem:[#allocation21_spill] sm:$0xff] %v4306_v5 }
 0x16f   : > { %v4311_v53 = vpop.f32.mrf.mxu3  ;;  %v1755_v0 = vrot.slane %v4974_v25, 5  ;;  %v1753_v51 = vsel %vm3517_vm7, %v3030_v44, %v1752_v10 }
 0x170   : > { %4970 = vst [vmem:[#allocation17_spill] sm:$0xff] %v4296_v38  ;;  %v4315_v39 = vpack.c.bf16 %v824_v2, %v824_v2  ;;  %v3090_v56 = vrot.slane %v4302_v43, 9  ;;  %v1829_v2 = vunpack.c.l.b16 %v1753_v51 }
 0x171   : > { %4973 = vst [vmem:[#allocation20_spill] sm:$0xff] %v4311_v53 }
 0x172   : > { %3079 = vmatmul.msk.bf16.gmra.mxu0 %vm1320_vm4, %v4967_v13  ;;  %v4300_v13 = vpack.c.b16 %v1509_v16, %v1508_v52  ;;  %v2330_v52 = vrot.slane %v2328_v6, 4  ;;  %v1754_v16 = vrot.slane %v1752_v10, 4  ;;  %v2331_v53 = vrot.slane %v4315_v39, 5  ;;  %v4975_v10 = vld [vmem:[#allocation5_spill] sm:$0xff] }
 0x173   : > { %v2329_v47 = vsel %vm3517_vm7, %v3090_v56, %v2328_v6  ;;  %v1511_v44 = vunpack.c.l.b16 %v4975_v10 }
 0x174   : > { %4971 = vst [vmem:[#allocation25_spill] sm:$0xff] %v4300_v13  ;;  %v1756_v1 = vsel %vm3517_vm7, %v1754_v16, %v1755_v0  ;;  %v2332_v25 = vsel %vm3517_vm7, %v2330_v52, %v2331_v53  ;;  %v2335_v22 = vunpack.c.l.b16 %v2329_v47  ;;  %v4977_v0 = vld [vmem:[#allocation4_spill] sm:$0xff]  ;;  %v1759_v47 = vrot.slane %v4975_v10, 5 }
 0x175   : > { %3013 = vmatmul.msk.bf16.gmra.mxu1 %vm1320_vm4, %v4245_v59  ;;  %v4298_v59 = vpop.f32.mrf.mxu1  ;;  %v4319_v24 = vpop.f32.mrf.mxu0  ;;  %v2336_v5 = vunpack.c.l.b16 %v2332_v25  ;;  %v1830_v56 = vunpack.c.l.b16 %v1756_v1  ;;  %v1510_v16 = vunpack.c.l.b16 %v4977_v0  ;;  %v4981_v1 = vld [vmem:[#allocation6_spill] sm:$0xff] }
 0x176   : > { %v1762_v25 = vrot.slane %v4981_v1, 5 }
 0x177   : > { %v4339_v6 = vpop.f32.mrf.mxu3  ;;  %v4342_v18 = vpack.c.b16 %v2336_v5, %v2335_v22  ;;  %v4344_v51 = vpack.c.b16 %v1830_v56, %v1829_v2  ;;  %v1761_v5 = vrot.slane %v1759_v47, 4  ;;  %v3031_v2 = vrot.slane %v4977_v0, 9 }
 0x178   : > { %4976 = vst [vmem:[#allocation18_spill] sm:$0xff] %v4339_v6 }
 0x179   : > { %4978 = vst [vmem:[#allocation32_spill] sm:$0xff] %v4342_v18  ;;  %v1760_v10 = vsel %vm3517_vm7, %v3031_v2, %v1759_v47 }
 0x17a   : > { %4979 = vst [vmem:[#allocation26_spill] sm:$0xff] %v4344_v51  ;;  %v1831_v0 = vunpack.c.l.b16 %v1760_v10 }
 0x17c   : > { %3046 = vmatmul.msk.bf16.gmra.mxu2 %vm1320_vm4, %v4296_v38  ;;  %v4334_v38 = vpop.f32.mrf.mxu2 }
 0x17d   : > { %3063 = vmatmul.msk.bf16.gmra.mxu3 %vm1320_vm4, %v4300_v13  ;;  %v1394_v52 = vpop.f32.mrf.mxu0 }
 0x182   : > { %v4321_v32 = vpop.f32.mrf.mxu1  ;;  %3080 = vmatmul.msk.bf16.gmra.mxu0 %vm1320_vm4, %v3987_v62 }
 0x185   : > { %3014 = vmatmul.msk.bf16.gmra.mxu1 %vm1320_vm4, %v4300_v13  ;;  %v4346_v13 = vpack.c.b16 %v1511_v44, %v1510_v16  ;;  %v1763_v44 = vsel %vm3517_vm7, %v1761_v5, %v1762_v25 }
 0x186   : > { %v1832_v18 = vunpack.c.l.b16 %v1763_v44 }
 0x187   : > { %4980 = vst [vmem:[#allocation29_spill] sm:$0xff] %v4346_v13 }
 0x188   : > { %v4373_v62 = vpack.c.b16 %v1832_v18, %v1831_v0  ;;  %v4989_v0 = vld [vmem:[#allocation14_spill] sm:$0xff] }
 0x18a   : > { %v4348_v53 = vpop.f32.mrf.mxu1  ;;  %4987 = vst [vmem:[#allocation37_spill] sm:$0xff] %v4373_v62 }
 0x18c   : > { %3047 = vmatmul.msk.bf16.gmra.mxu2 %vm1320_vm4, %v4344_v51  ;;  %v4985_v51 = vld [vmem:[#allocation9_spill] sm:$0xff] }
 0x18d   : > { %3064 = vmatmul.msk.bf16.gmra.mxu3 %vm1320_vm4, %v4346_v13 }
 0x18f   : > { %v4356_v6 = vpop.f32.mrf.mxu2  ;;  %v1397_v16 = vpop.f32.mrf.mxu0 }
 0x190   : > { %4982 = vst [vmem:[#allocation5_spill] sm:$0xff] %v4356_v6  ;;  %v4358_v22 = vpop.f32.mrf.mxu3 }
 0x191   : > { %4983 = vst [vmem:[#allocation4_spill] sm:$0xff] %v4358_v22 }
 0x192   : > { %v1602_v56 = vpop.f32.mrf.mxu1  ;;  %3081 = vmatmul.msk.bf16.gmra.mxu0 %vm1320_vm4, %v4985_v51 }
 0x193   : > { %v1603_v47 = vadd.f32 %v1602_v56, %v4201_v58 }
 0x195   : > { %3015 = vmatmul.msk.bf16.gmra.mxu1 %vm1320_vm4, %v4346_v13 }
 0x197   : > { %v4367_v1 = vpop.f32.mrf.mxu2  ;;  %v1399_v5 = vpop.f32.mrf.mxu0 }
 0x198   : > { %4984 = vst [vmem:[#allocation6_spill] sm:$0xff] %v4367_v1  ;;  %v4371_v22 = vpop.f32.mrf.mxu3 }
 0x199   : > { %4986 = vst [vmem:[#allocation36_spill] sm:$0xff] %v4371_v22 }
 0x19a   : > { %v1604_v25 = vpop.f32.mrf.mxu1 }
 0x19b   : > { %v1605_v18 = vadd.f32 %v1604_v25, %v4232_v45 }
 0x19c   : > { %3048 = vmatmul.msk.bf16.gmra.mxu2 %vm1320_vm4, %v4373_v62 }
 0x19d   : > { %3065 = vmatmul.msk.bf16.gmra.mxu3 %vm1320_vm4, %v4077_v50 }
 0x19f   : > { %v1923_v2 = vpop.f32.mrf.mxu2  ;;  %v2213_v1 = vpop.f32.mrf.mxu0 }
 0x1a0   : > { %v2003_v44 = vadd.f32 %v1923_v2, %v1603_v47  ;;  %v2057_v8 = vpop.f32.mrf.mxu3 }
 0x1a2   : > { %v2137_v13 = vadd.f32 %v2057_v8, %v2003_v44  ;;  %v1607_v51 = vpop.f32.mrf.mxu1  ;;  %3082 = vmatmul.msk.bf16.gmra.mxu0 %vm1320_vm4, %v4989_v0 }
 0x1a3   : > { %v1608_v45 = vadd.f32 %v1607_v51, %v4266_v49 }
 0x1a4   : > { %v4380_v22 = vadd.f32 %v2213_v1, %v2137_v13 }
 0x1a5   : > { %3016 = vmatmul.msk.bf16.gmra.mxu1 %vm1320_vm4, %v4077_v50 }
 0x1a6   : > { %4988 = vst [vmem:[#allocation38_spill] sm:$0xff] %v4380_v22 }
 0x1a7   : > { %v1925_v10 = vpop.f32.mrf.mxu2  ;;  %v2215_v8 = vpop.f32.mrf.mxu0 }
 0x1a8   : > { %v2004_v62 = vadd.f32 %v1925_v10, %v1605_v18  ;;  %v2059_v6 = vpop.f32.mrf.mxu3 }
 0x1aa   : > { %v2138_v58 = vadd.f32 %v2059_v6, %v2004_v62  ;;  %v1609_v56 = vpop.f32.mrf.mxu1 }
 0x1ab   : > { %v1610_v10 = vadd.f32 %v1609_v56, %v4294_v12 }
 0x1ac   : > { %3049 = vmatmul.msk.bf16.gmra.mxu2 %vm1320_vm4, %v4117_v23  ;;  %v4391_v13 = vadd.f32 %v2215_v8, %v2138_v58  ;;  %v4990_v58 = vld [vmem:[#allocation27_spill] sm:$0xff] }
 0x1ad   : > { %3066 = vmatmul.msk.bf16.gmra.mxu3 %vm1320_vm4, %v4135_v31 }
 0x1af   : > { %v1928_v1 = vpop.f32.mrf.mxu2  ;;  %v2218_v62 = vpop.f32.mrf.mxu0 }
 0x1b0   : > { %v2005_v25 = vadd.f32 %v1928_v1, %v1608_v45  ;;  %v2062_v47 = vpop.f32.mrf.mxu3 }
 0x1b2   : > { %v2139_v2 = vadd.f32 %v2062_v47, %v2005_v25  ;;  %v1612_v44 = vpop.f32.mrf.mxu1  ;;  %3083 = vmatmul.msk.bf16.gmra.mxu0 %vm1320_vm4, %v4990_v58 }
 0x1b3   : > { %v1613_v18 = vadd.f32 %v1612_v44, %v4319_v24 }
 0x1b4   : > { %v4395_v6 = vadd.f32 %v2218_v62, %v2139_v2 }
 0x1b5   : > { %3017 = vmatmul.msk.bf16.gmra.mxu1 %vm1320_vm4, %v4135_v31 }
 0x1b7   : > { %v1930_v22 = vpop.f32.mrf.mxu2  ;;  %v2220_v1 = vpop.f32.mrf.mxu0 }
 0x1b8   : > { %v2006_v49 = vadd.f32 %v1930_v22, %v1610_v10  ;;  %v2064_v51 = vpop.f32.mrf.mxu3 }
 0x1ba   : > { %v2140_v8 = vadd.f32 %v2064_v51, %v2006_v49  ;;  %v1614_v45 = vpop.f32.mrf.mxu1 }
 0x1bb   : > { %v1615_v24 = vadd.f32 %v1614_v45, %v1394_v52 }
 0x1bc   : > { %3050 = vmatmul.msk.bf16.gmra.mxu2 %vm1320_vm4, %v4184_v40  ;;  %v4406_v12 = vadd.f32 %v2220_v1, %v2140_v8 }
 0x1bd   : > { %3067 = vmatmul.msk.bf16.gmra.mxu3 %vm1320_vm4, %v4217_v14 }
 0x1bf   : > { %v1933_v56 = vpop.f32.mrf.mxu2  ;;  %v2223_v22 = vpop.f32.mrf.mxu0 }
 0x1c0   : > { %v2007_v25 = vadd.f32 %v1933_v56, %v1613_v18  ;;  %v2067_v47 = vpop.f32.mrf.mxu3 }
 0x1c2   : > { %v2141_v2 = vadd.f32 %v2067_v47, %v2007_v25  ;;  %v1617_v44 = vpop.f32.mrf.mxu1  ;;  %3084 = vmatmul.msk.bf16.gmra.mxu0 %vm1320_vm4, %v4006_v30 }
 0x1c3   : > { %v1618_v62 = vadd.f32 %v1617_v44, %v1397_v16 }
 0x1c4   : > { %v4408_v10 = vadd.f32 %v2223_v22, %v2141_v2 }
 0x1c5   : > { %3018 = vmatmul.msk.bf16.gmra.mxu1 %vm1320_vm4, %v4217_v14 }
 0x1c7   : > { %v1935_v49 = vpop.f32.mrf.mxu2  ;;  %v2225_v1 = vpop.f32.mrf.mxu0 }
 0x1c8   : > { %v2008_v52 = vadd.f32 %v1935_v49, %v1615_v24  ;;  %v2069_v51 = vpop.f32.mrf.mxu3 }
 0x1ca   : > { %v2142_v8 = vadd.f32 %v2069_v51, %v2008_v52  ;;  %v1619_v45 = vpop.f32.mrf.mxu1  ;;  %v4992_v52 = vld [vmem:[#allocation8_spill] sm:$0xff] }
 0x1cb   : > { %v1620_v18 = vadd.f32 %v1619_v45, %v1399_v5 }
 0x1cc   : > { %3051 = vmatmul.msk.bf16.gmra.mxu2 %vm1320_vm4, %v4287_v46  ;;  %v4418_v16 = vadd.f32 %v2225_v1, %v2142_v8 }
 0x1cd   : > { %3068 = vmatmul.msk.bf16.gmra.mxu3 %vm1320_vm4, %v4074_v19 }
 0x1cf   : > { %v1938_v56 = vpop.f32.mrf.mxu2  ;;  %v2228_v22 = vpop.f32.mrf.mxu0 }
 0x1d0   : > { %v2009_v25 = vadd.f32 %v1938_v56, %v1618_v62  ;;  %v2072_v47 = vpop.f32.mrf.mxu3 }
 0x1d2   : > { %v2143_v2 = vadd.f32 %v2072_v47, %v2009_v25  ;;  %v1622_v44 = vpop.f32.mrf.mxu1  ;;  %3085 = vmatmul.msk.bf16.gmra.mxu0 %vm1320_vm4, %v4992_v52 }
 0x1d3   : > { %v1623_v56 = vadd.f32 %v1622_v44, %v4165_v27 }
 0x1d4   : > { %v4420_v24 = vadd.f32 %v2228_v22, %v2143_v2 }
 0x1d5   : > { %3019 = vmatmul.msk.bf16.gmra.mxu1 %vm1320_vm4, %v4074_v19 }
 0x1d6   : > { %4991 = vst [vmem:[#allocation14_spill] sm:$0xff] %v4420_v24 }
 0x1d7   : > { %v1940_v49 = vpop.f32.mrf.mxu2  ;;  %v2230_v62 = vpop.f32.mrf.mxu0 }
 0x1d8   : > { %v2010_v5 = vadd.f32 %v1940_v49, %v1620_v18  ;;  %v2074_v51 = vpop.f32.mrf.mxu3 }
 0x1da   : > { %v2144_v45 = vadd.f32 %v2074_v51, %v2010_v5  ;;  %v1624_v8 = vpop.f32.mrf.mxu1 }
 0x1db   : > { %v1625_v5 = vadd.f32 %v1624_v8, %v4179_v17 }
 0x1dc   : > { %3052 = vmatmul.msk.bf16.gmra.mxu2 %vm1320_vm4, %v4093_v48  ;;  %v4430_v1 = vadd.f32 %v2230_v62, %v2144_v45  ;;  %v4994_v48 = vld [vmem:[#allocation15_spill] sm:$0xff] }
 0x1dd   : > { %3069 = vmatmul.msk.bf16.gmra.mxu3 %vm1320_vm4, %v4101_v21 }
 0x1df   : > { %v1943_v25 = vpop.f32.mrf.mxu2  ;;  %v2233_v18 = vpop.f32.mrf.mxu0 }
 0x1e0   : > { %v2011_v47 = vadd.f32 %v1943_v25, %v1623_v56  ;;  %v2077_v2 = vpop.f32.mrf.mxu3 }
 0x1e2   : > { %v2145_v22 = vadd.f32 %v2077_v2, %v2011_v47  ;;  %v1627_v24 = vpop.f32.mrf.mxu1  ;;  %3086 = vmatmul.msk.bf16.gmra.mxu0 %vm1320_vm4, %v4994_v48 }
 0x1e3   : > { %v1628_v17 = vadd.f32 %v1627_v24, %v4205_v55 }
 0x1e4   : > { %v4433_v49 = vadd.f32 %v2233_v18, %v2145_v22 }
 0x1e5   : > { %3020 = vmatmul.msk.bf16.gmra.mxu1 %vm1320_vm4, %v4101_v21 }
 0x1e6   : > { %4993 = vst [vmem:[#allocation27_spill] sm:$0xff] %v4433_v49  ;;  %v4997_v49 = vld [vmem:[#allocation28_spill] sm:$0xff] }
 0x1e7   : > { %v1945_v51 = vpop.f32.mrf.mxu2  ;;  %v2235_v56 = vpop.f32.mrf.mxu0 }
 0x1e8   : > { %v2012_v45 = vadd.f32 %v1945_v51, %v1625_v5  ;;  %v2079_v62 = vpop.f32.mrf.mxu3 }
 0x1ea   : > { %v2146_v27 = vadd.f32 %v2079_v62, %v2012_v45  ;;  %v1629_v44 = vpop.f32.mrf.mxu1 }
 0x1eb   : > { %v1630_v45 = vadd.f32 %v1629_v44, %v4235_v35  ;;  %v2183_v44 = vshrl.u32 %v4292_v11, 16 }
 0x1ec   : > { %3053 = vmatmul.msk.bf16.gmra.mxu2 %vm1320_vm4, %v4119_v15  ;;  %v4444_v25 = vadd.f32 %v2235_v56, %v2146_v27 }
 0x1ed   : > { %3070 = vmatmul.msk.bf16.gmra.mxu3 %vm1320_vm4, %v4159_v57 }
 0x1ee   : > { %4995 = vst [vmem:[#allocation8_spill] sm:$0xff] %v4444_v25 }
 0x1ef   : > { %v1948_v8 = vpop.f32.mrf.mxu2  ;;  %v2238_v5 = vpop.f32.mrf.mxu0 }
 0x1f0   : > { %v2013_v47 = vadd.f32 %v1948_v8, %v1628_v17  ;;  %v2082_v2 = vpop.f32.mrf.mxu3  ;;  %v2179_v8 = vshll.u32 %v4292_v11, 16 }
 0x1f2   : > { %v2147_v22 = vadd.f32 %v2082_v2, %v2013_v47  ;;  %v1632_v18 = vpop.f32.mrf.mxu1  ;;  %3087 = vmatmul.msk.bf16.gmra.mxu0 %vm1320_vm4, %v4997_v49  ;;  %v2170_v47 = vshrl.u32 %v4302_v43, 16  ;;  %v2173_v2 = vshll.u32 %v4302_v43, 16 }
 0x1f4   : > { %v4447_v51 = vadd.f32 %v2238_v5, %v2147_v22  ;;  %v1633_v22 = vadd.f32 %v1632_v18, %v4269_v41  ;;  %v2040_v41 = vunpack.c.l.b16 %v4292_v11  ;;  %v2039_v18 = vunpack.c.l.b16 %v4302_v43 }
 0x1f5   : > { %3021 = vmatmul.msk.bf16.gmra.mxu1 %vm1320_vm4, %v4159_v57 }
 0x1f6   : > { %4996 = vst [vmem:[#allocation15_spill] sm:$0xff] %v4447_v51  ;;  %v2172_v51 = vrot.slane %v2170_v47, 4 }
 0x1f7   : > { %v1950_v62 = vpop.f32.mrf.mxu2  ;;  %v2240_v17 = vpop.f32.mrf.mxu0 }
 0x1f8   : > { %v2014_v27 = vadd.f32 %v1950_v62, %v1630_v45  ;;  %v2084_v56 = vpop.f32.mrf.mxu3 }
 0x1fa   : > { %v2148_v55 = vadd.f32 %v2084_v56, %v2014_v27  ;;  %v1634_v24 = vpop.f32.mrf.mxu1  ;;  %v2181_v27 = vrot.slane %v2179_v8, 5  ;;  %v2185_v56 = vrot.slane %v2183_v44, 4  ;;  %v2189_v44 = vshll.u32 %v4315_v39, 16 }
 0x1fb   : > { %v1635_v15 = vadd.f32 %v1634_v24, %v4298_v59 }
 0x1fc   : > { %3054 = vmatmul.msk.bf16.gmra.mxu2 %vm1320_vm4, %v4186_v42  ;;  %v4459_v35 = vadd.f32 %v2240_v17, %v2148_v55  ;;  %v2175_v42 = vrot.slane %v2173_v2, 5  ;;  %v2186_v17 = vor.u32 %v2185_v56, %v2181_v27  ;;  %v2191_v24 = vrot.slane %v2189_v44, 5 }
 0x1fd   : > { %3071 = vmatmul.msk.bf16.gmra.mxu3 %vm1320_vm4, %v4252_v54 }
 0x1fe   : > { %4998 = vst [vmem:[#allocation39_spill] sm:$0xff] %v4459_v35  ;;  %v2176_v35 = vor.u32 %v2175_v42, %v2172_v51  ;;  %v4475_v51 = vpack.c.b16 %v2040_v41, %v2039_v18 }
 0x1ff   : > { %v1953_v5 = vpop.f32.mrf.mxu2  ;;  %v2243_v57 = vpop.f32.mrf.mxu0 }
 0x200   : > { %v2015_v45 = vadd.f32 %v1953_v5, %v1633_v22  ;;  %v2087_v62 = vpop.f32.mrf.mxu3  ;;  %v2177_v2 = vrot.slane %v2176_v35, 4 }
 0x202   : > { %v2149_v25 = vadd.f32 %v2087_v62, %v2015_v45  ;;  %v1637_v49 = vpop.f32.mrf.mxu1  ;;  %3088 = vmatmul.msk.bf16.gmra.mxu0 %vm1320_vm4, %v4008_v4 }
 0x203   : > { %v1638_v39 = vadd.f32 %v1637_v49, %v4321_v32 }
 0x204   : > { %v4465_v55 = vadd.f32 %v2243_v57, %v2149_v25  ;;  %v2187_v25 = vrot.slane %v2186_v17, 4 }
 0x205   : > { %3022 = vmatmul.msk.bf16.gmra.mxu1 %vm1320_vm4, %v4252_v54 }
 0x206   : > { %v2192_v35 = vsel %vm3421_vm3, %v2187_v25, %v2191_v24 }
 0x207   : > { %v1955_v8 = vpop.f32.mrf.mxu2  ;;  %v2245_v11 = vpop.f32.mrf.mxu0  ;;  %v2196_v56 = vunpack.c.l.b16 %v2192_v35 }
 0x208   : > { %v2016_v47 = vadd.f32 %v1955_v8, %v1635_v15  ;;  %v2089_v57 = vpop.f32.mrf.mxu3  ;;  %v2182_v15 = vsel %vm3421_vm3, %v2177_v2, %v2181_v27 }
 0x209   : > { %v2195_v62 = vunpack.c.l.b16 %v2182_v15 }
 0x20a   : > { %v2150_v42 = vadd.f32 %v2089_v57, %v2016_v47  ;;  %v1639_v59 = vpop.f32.mrf.mxu1 }
 0x20b   : > { %v4490_v44 = vpack.c.b16 %v2196_v56, %v2195_v62  ;;  %v1640_v32 = vadd.f32 %v1639_v59, %v4348_v53 }
 0x20c   : > { %3055 = vmatmul.msk.bf16.gmra.mxu2 %vm1320_vm4, %v4289_v34  ;;  %v4481_v43 = vadd.f32 %v2245_v11, %v2150_v42 }
 0x20d   : > { %3072 = vmatmul.msk.bf16.gmra.mxu3 %vm1320_vm4, %v4475_v51 }
 0x20f   : > { %v1958_v22 = vpop.f32.mrf.mxu2  ;;  %v2248_v18 = vpop.f32.mrf.mxu0 }
 0x210   : > { %v2017_v5 = vadd.f32 %v1958_v22, %v1638_v39  ;;  %v2092_v45 = vpop.f32.mrf.mxu3 }
 0x212   : > { %v2151_v17 = vadd.f32 %v2092_v45, %v2017_v5  ;;  %v1642_v41 = vpop.f32.mrf.mxu1  ;;  %3089 = vmatmul.msk.bf16.gmra.mxu0 %vm1320_vm4, %v4490_v44 }
 0x213   : > { %v1643_v53 = vadd.f32 %v1642_v41, %v4188_v9 }
 0x214   : > { %v4488_v8 = vadd.f32 %v2248_v18, %v2151_v17 }
 0x215   : > { %3092 = vmatmul.msk.bf16.vlgmr.msra.gmra.mxu1 %vm1320_vm4, %v4065_v63 }
 0x217   : > { %v1960_v49 = vpop.f32.mrf.mxu2  ;;  %v2250_v2 = vpop.f32.mrf.mxu0 }
 0x218   : > { %v2018_v27 = vadd.f32 %v1960_v49, %v1640_v32  ;;  %v2094_v47 = vpop.f32.mrf.mxu3 }
 0x21a   : > { %v2152_v57 = vadd.f32 %v2094_v47, %v2018_v27  ;;  %v1644_v25 = vpop.f32.mrf.mxu1 }
 0x21b   : > { %v1645_v22 = vadd.f32 %v1644_v25, %v4211_v36 }
 0x21c   : > { %3109 = vmatmul.msk.bf16.vlgmr.msra.gmra.mxu2 %vm1320_vm4, %v4097_v3  ;;  %v4501_v42 = vadd.f32 %v2250_v2, %v2152_v57 }
 0x21d   : > { %3126 = vmatmul.msk.bf16.vlgmr.msra.gmra.mxu3 %vm1320_vm4, %v3946_v29 }
 0x21f   : > { %v1963_v63 = vpop.f32.mrf.mxu2  ;;  %v2253_v15 = vpop.f32.mrf.mxu0 }
 0x220   : > { %v2019_v59 = vadd.f32 %v1963_v63, %v1643_v53  ;;  %v2097_v24 = vpop.f32.mrf.mxu3  ;;  %v4999_v53 = vld [vmem:[#allocation3_spill] sm:$0xff] }
 0x222   : > { %v2153_v11 = vadd.f32 %v2097_v24, %v2019_v59  ;;  %v1647_v39 = vpop.f32.mrf.mxu1  ;;  %3144 = vmatmul.msk.bf16.vlgmr.msra.gmra.mxu0 %vm1320_vm4, %v4071_v7 }
 0x223   : > { %v1648_v36 = vadd.f32 %v1647_v39, %v4243_v60 }
 0x224   : > { %v4504_v35 = vadd.f32 %v2253_v15, %v2153_v11 }
 0x225   : > { %3093 = vmatmul.msk.bf16.gmra.mxu1 %vm1320_vm4, %v4071_v7 }
 0x227   : > { %v1965_v3 = vpop.f32.mrf.mxu2  ;;  %v2255_v62 = vpop.f32.mrf.mxu0 }
 0x228   : > { %v2020_v29 = vadd.f32 %v1965_v3, %v1645_v22  ;;  %v2099_v5 = vpop.f32.mrf.mxu3 }
 0x22a   : > { %v2154_v9 = vadd.f32 %v2099_v5, %v2020_v29  ;;  %v1649_v45 = vpop.f32.mrf.mxu1  ;;  %v5001_v5 = vld [vmem:[#allocation23_spill] sm:$0xff] }
 0x22b   : > { %v1650_v47 = vadd.f32 %v1649_v45, %v4276_v20  ;;  %v5000_v20 = vld [vmem:[#allocation21_spill] sm:$0xff] }
 0x22c   : > { %3110 = vmatmul.msk.bf16.gmra.mxu2 %vm1320_vm4, %v4122_v26  ;;  %v4515_v56 = vadd.f32 %v2255_v62, %v2154_v9 }
 0x22d   : > { %3127 = vmatmul.msk.bf16.gmra.mxu3 %vm1320_vm4, %v4027_v37 }
 0x22f   : > { %v1968_v17 = vpop.f32.mrf.mxu2  ;;  %v2258_v49 = vpop.f32.mrf.mxu0 }
 0x230   : > { %v2021_v41 = vadd.f32 %v1968_v17, %v1648_v36  ;;  %v2102_v18 = vpop.f32.mrf.mxu3  ;;  %v5002_v17 = vld [vmem:[#allocation11_spill] sm:$0xff] }
 0x232   : > { %v2155_v32 = vadd.f32 %v2102_v18, %v2021_v41  ;;  %v1652_v7 = vpop.f32.mrf.mxu1  ;;  %3145 = vmatmul.msk.bf16.gmra.mxu0 %vm1320_vm4, %v4152_v33  ;;  %v5003_v18 = vld [vmem:[#allocation13_spill] sm:$0xff] }
 0x233   : > { %v1653_v59 = vadd.f32 %v1652_v7, %v5000_v20  ;;  %v5006_v20 = vld [vmem:[#allocation30_spill] sm:$0xff] }
 0x234   : > { %v4518_v27 = vadd.f32 %v2258_v49, %v2155_v32 }
 0x235   : > { %3094 = vmatmul.msk.bf16.gmra.mxu1 %vm1320_vm4, %v4152_v33 }
 0x237   : > { %v1970_v26 = vpop.f32.mrf.mxu2  ;;  %v2260_v2 = vpop.f32.mrf.mxu0 }
 0x238   : > { %v2022_v37 = vadd.f32 %v1970_v26, %v1650_v47  ;;  %v2104_v57 = vpop.f32.mrf.mxu3 }
 0x23a   : > { %v2156_v60 = vadd.f32 %v2104_v57, %v2022_v37  ;;  %v1654_v25 = vpop.f32.mrf.mxu1 }
 0x23b   : > { %v1655_v29 = vadd.f32 %v1654_v25, %v4334_v38  ;;  %v5004_v38 = vld [vmem:[#allocation5_spill] sm:$0xff] }
 0x23c   : > { %3111 = vmatmul.msk.bf16.gmra.mxu2 %vm1320_vm4, %v4155_v61  ;;  %v4529_v63 = vadd.f32 %v2260_v2, %v2156_v60  ;;  %v5005_v2 = vld [vmem:[#allocation6_spill] sm:$0xff] }
 0x23d   : > { %3128 = vmatmul.msk.bf16.gmra.mxu3 %vm1320_vm4, %v4999_v53 }
 0x23f   : > { %v1973_v24 = vpop.f32.mrf.mxu2  ;;  %v2263_v22 = vpop.f32.mrf.mxu0 }
 0x240   : > { %v2023_v11 = vadd.f32 %v1973_v24, %v1653_v59  ;;  %v2107_v39 = vpop.f32.mrf.mxu3 }
 0x242   : > { %v2157_v15 = vadd.f32 %v2107_v39, %v2023_v11  ;;  %v1657_v33 = vpop.f32.mrf.mxu1  ;;  %3146 = vmatmul.msk.bf16.gmra.mxu0 %vm1320_vm4, %v5001_v5 }
 0x243   : > { %v1658_v7 = vadd.f32 %v1657_v33, %v5004_v38  ;;  %v5007_v33 = vld [vmem:[#allocation31_spill] sm:$0xff] }
 0x244   : > { %v4532_v3 = vadd.f32 %v2263_v22, %v2157_v15 }
 0x245   : > { %3095 = vmatmul.msk.bf16.gmra.mxu1 %vm1320_vm4, %v5001_v5 }
 0x247   : > { %v1975_v61 = vpop.f32.mrf.mxu2  ;;  %v2265_v41 = vpop.f32.mrf.mxu0 }
 0x248   : > { %v2024_v9 = vadd.f32 %v1975_v61, %v1655_v29  ;;  %v2109_v45 = vpop.f32.mrf.mxu3  ;;  %v5008_v29 = vld [vmem:[#allocation24_spill] sm:$0xff]  ;;  %v5009_v61 = vld [vmem:[#allocation22_spill] sm:$0xff] }
 0x24a   : > { %v2158_v62 = vadd.f32 %v2109_v45, %v2024_v9  ;;  %v1659_v36 = vpop.f32.mrf.mxu1 }
 0x24b   : > { %v1660_v53 = vadd.f32 %v1659_v36, %v5005_v2 }
 0x24c   : > { %3112 = vmatmul.msk.bf16.gmra.mxu2 %vm1320_vm4, %v5002_v17  ;;  %v4543_v32 = vadd.f32 %v2265_v41, %v2158_v62 }
 0x24d   : > { %3129 = vmatmul.msk.bf16.gmra.mxu3 %vm1320_vm4, %v5003_v18 }
 0x24f   : > { %v1978_v49 = vpop.f32.mrf.mxu2  ;;  %v2268_v60 = vpop.f32.mrf.mxu0 }
 0x250   : > { %v2025_v47 = vadd.f32 %v1978_v49, %v1658_v7  ;;  %v2112_v26 = vpop.f32.mrf.mxu3  ;;  %v5010_v7 = vld [vmem:[#allocation10_spill] sm:$0xff] }
 0x252   : > { %v2159_v37 = vadd.f32 %v2112_v26, %v2025_v47  ;;  %v1662_v57 = vpop.f32.mrf.mxu1  ;;  %3147 = vmatmul.msk.bf16.gmra.mxu0 %vm1320_vm4, %v5006_v20  ;;  %v5011_v47 = vld [vmem:[#allocation17_spill] sm:$0xff] }
 0x253   : > { %v1663_v9 = vadd.f32 %v1662_v57, %v5009_v61 }
 0x254   : > { %v4546_v25 = vadd.f32 %v2268_v60, %v2159_v37 }
 0x255   : > { %3096 = vmatmul.msk.bf16.gmra.mxu1 %vm1320_vm4, %v5006_v20 }
 0x257   : > { %v1980_v59 = vpop.f32.mrf.mxu2  ;;  %v2270_v22 = vpop.f32.mrf.mxu0 }
 0x258   : > { %v2026_v24 = vadd.f32 %v1980_v59, %v1660_v53  ;;  %v2114_v11 = vpop.f32.mrf.mxu3  ;;  %v5012_v53 = vld [vmem:[#allocation25_spill] sm:$0xff] }
 0x259   : > { %v5013_v59 = vld [vmem:[#allocation33_spill] sm:$0xff] }
 0x25a   : > { %v2160_v39 = vadd.f32 %v2114_v11, %v2026_v24  ;;  %v1664_v15 = vpop.f32.mrf.mxu1  ;;  %v5014_v11 = vld [vmem:[#allocation12_spill] sm:$0xff] }
 0x25b   : > { %v1665_v49 = vadd.f32 %v1664_v15, %v5010_v7 }
 0x25c   : > { %3113 = vmatmul.msk.bf16.gmra.mxu2 %vm1320_vm4, %v5007_v33  ;;  %v4557_v5 = vadd.f32 %v2270_v22, %v2160_v39 }
 0x25d   : > { %3130 = vmatmul.msk.bf16.gmra.mxu3 %vm1320_vm4, %v5008_v29 }
 0x25f   : > { %v1983_v45 = vpop.f32.mrf.mxu2  ;;  %v2273_v18 = vpop.f32.mrf.mxu0 }
 0x260   : > { %v2027_v62 = vadd.f32 %v1983_v45, %v1663_v9  ;;  %v2117_v36 = vpop.f32.mrf.mxu3 }
 0x262   : > { %v2161_v17 = vadd.f32 %v2117_v36, %v2027_v62  ;;  %v1667_v41 = vpop.f32.mrf.mxu1  ;;  %3148 = vmatmul.msk.bf16.gmra.mxu0 %vm1320_vm4, %v5011_v47  ;;  %v5015_v62 = vld [vmem:[#allocation19_spill] sm:$0xff] }
 0x263   : > { %v1668_v39 = vadd.f32 %v1667_v41, %v5014_v11 }
 0x264   : > { %v4560_v38 = vadd.f32 %v2273_v18, %v2161_v17  ;;  %v5016_v17 = vld [vmem:[#allocation26_spill] sm:$0xff] }
 0x265   : > { %3097 = vmatmul.msk.bf16.gmra.mxu1 %vm1320_vm4, %v5011_v47 }
 0x267   : > { %v1985_v26 = vpop.f32.mrf.mxu2  ;;  %v2275_v20 = vpop.f32.mrf.mxu0 }
 0x268   : > { %v2028_v37 = vadd.f32 %v1985_v26, %v1665_v49  ;;  %v2119_v60 = vpop.f32.mrf.mxu3  ;;  %v5017_v26 = vld [vmem:[#allocation29_spill] sm:$0xff] }
 0x26a   : > { %v2162_v57 = vadd.f32 %v2119_v60, %v2028_v37  ;;  %v1669_v2 = vpop.f32.mrf.mxu1  ;;  %v5018_v60 = vld [vmem:[#allocation9_spill] sm:$0xff] }
 0x26b   : > { %v1670_v36 = vadd.f32 %v1669_v2, %v5015_v62  ;;  %v5019_v2 = vld [vmem:[#allocation20_spill] sm:$0xff]  ;;  %v5021_v62 = vld [vmem:[#allocation37_spill] sm:$0xff] }
 0x26c   : > { %3114 = vmatmul.msk.bf16.gmra.mxu2 %vm1320_vm4, %v5012_v53  ;;  %v4571_v24 = vadd.f32 %v2275_v20, %v2162_v57 }
 0x26d   : > { %3131 = vmatmul.msk.bf16.gmra.mxu3 %vm1320_vm4, %v5013_v59 }
 0x26f   : > { %v1988_v15 = vpop.f32.mrf.mxu2  ;;  %v2278_v9 = vpop.f32.mrf.mxu0 }
 0x270   : > { %v2029_v33 = vadd.f32 %v1988_v15, %v1668_v39  ;;  %v2122_v22 = vpop.f32.mrf.mxu3 }
 0x272   : > { %v2163_v29 = vadd.f32 %v2122_v22, %v2029_v33  ;;  %v1672_v61 = vpop.f32.mrf.mxu1  ;;  %3149 = vmatmul.msk.bf16.gmra.mxu0 %vm1320_vm4, %v5016_v17 }
 0x273   : > { %v1673_v53 = vadd.f32 %v1672_v61, %v5019_v2 }
 0x274   : > { %v4574_v45 = vadd.f32 %v2278_v9, %v2163_v29  ;;  %v5020_v29 = vld [vmem:[#allocation18_spill] sm:$0xff] }
 0x275   : > { %3098 = vmatmul.msk.bf16.gmra.mxu1 %vm1320_vm4, %v5016_v17 }
 0x277   : > { %v1990_v18 = vpop.f32.mrf.mxu2  ;;  %v2280_v37 = vpop.f32.mrf.mxu0 }
 0x278   : > { %v2030_v7 = vadd.f32 %v1990_v18, %v1670_v36  ;;  %v2124_v49 = vpop.f32.mrf.mxu3 }
 0x27a   : > { %v2164_v41 = vadd.f32 %v2124_v49, %v2030_v7  ;;  %v1674_v47 = vpop.f32.mrf.mxu1 }
 0x27b   : > { %v1675_v9 = vadd.f32 %v1674_v47, %v5020_v29  ;;  %v5022_v47 = vld [vmem:[#allocation4_spill] sm:$0xff] }
 0x27c   : > { %3115 = vmatmul.msk.bf16.gmra.mxu2 %vm1320_vm4, %v5017_v26  ;;  %v4585_v57 = vadd.f32 %v2280_v37, %v2164_v41 }
 0x27d   : > { %3132 = vmatmul.msk.bf16.gmra.mxu3 %vm1320_vm4, %v5018_v60 }
 0x27f   : > { %v1993_v20 = vpop.f32.mrf.mxu2  ;;  %v2283_v33 = vpop.f32.mrf.mxu0 }
 0x280   : > { %v2031_v59 = vadd.f32 %v1993_v20, %v1673_v53  ;;  %v2127_v11 = vpop.f32.mrf.mxu3 }
 0x282   : > { %v2165_v39 = vadd.f32 %v2127_v11, %v2031_v59  ;;  %v1677_v15 = vpop.f32.mrf.mxu1  ;;  %3150 = vmatmul.msk.bf16.gmra.mxu0 %vm1320_vm4, %v5021_v62 }
 0x283   : > { %v1678_v26 = vadd.f32 %v1677_v15, %v5022_v47 }
 0x284   : > { %v4588_v22 = vadd.f32 %v2283_v33, %v2165_v39  ;;  %v5023_v39 = vld [vmem:[#allocation36_spill] sm:$0xff] }
 0x285   : > { %3099 = vmatmul.msk.bf16.gmra.mxu1 %vm1320_vm4, %v5021_v62 }
 0x287   : > { %v1995_v36 = vpop.f32.mrf.mxu2  ;;  %v2285_v49 = vpop.f32.mrf.mxu0 }
 0x288   : > { %v2032_v17 = vadd.f32 %v1995_v36, %v1675_v9  ;;  %v2129_v18 = vpop.f32.mrf.mxu3 }
 0x28a   : > { %v2166_v61 = vadd.f32 %v2129_v18, %v2032_v17  ;;  %v1679_v7 = vpop.f32.mrf.mxu1  ;;  %v5024_v17 = vld [vmem:[#allocation38_spill] sm:$0xff] }
 0x28b   : > { %v1680_v33 = vadd.f32 %v1679_v7, %v5023_v39 }
 0x28c   : > { %3116 = vmatmul.msk.bf16.gmra.mxu2 %vm1320_vm4, %v4077_v50  ;;  %v4599_v41 = vadd.f32 %v2285_v49, %v2166_v61 }
 0x28d   : > { %3133 = vmatmul.msk.bf16.gmra.mxu3 %vm1320_vm4, %v4989_v0 }
 0x28f   : > { %v1998_v37 = vpop.f32.mrf.mxu2  ;;  %v2288_v59 = vpop.f32.mrf.mxu0 }
 0x290   : > { %v2033_v60 = vadd.f32 %v1998_v37, %v1678_v26  ;;  %v2132_v2 = vpop.f32.mrf.mxu3 }
 0x292   : > { %v2167_v53 = vadd.f32 %v2132_v2, %v2033_v60  ;;  %v2353_v20 = vpop.f32.mrf.mxu1  ;;  %3151 = vmatmul.msk.bf16.gmra.mxu0 %vm1320_vm4, %v4117_v23 }
 0x293   : > { %v2433_v18 = vadd.f32 %v2353_v20, %v5024_v17 }
 0x294   : > { %v4602_v11 = vadd.f32 %v2288_v59, %v2167_v53 }
 0x295   : > { %3100 = vmatmul.msk.bf16.gmra.mxu1 %vm1320_vm4, %v4117_v23 }
 0x297   : > { %v2000_v50 = vpop.f32.mrf.mxu2  ;;  %v2290_v62 = vpop.f32.mrf.mxu0 }
 0x298   : > { %v2034_v0 = vadd.f32 %v2000_v50, %v1680_v33  ;;  %v2134_v15 = vpop.f32.mrf.mxu3 }
 0x29a   : > { %v2168_v29 = vadd.f32 %v2134_v15, %v2034_v0  ;;  %v2355_v9 = vpop.f32.mrf.mxu1 }
 0x29c   : > { %3117 = vmatmul.msk.bf16.gmra.mxu2 %vm1320_vm4, %v4135_v31  ;;  %v4613_v36 = vadd.f32 %v2290_v62, %v2168_v29 }
 0x29d   : > { %3134 = vmatmul.msk.bf16.gmra.mxu3 %vm1320_vm4, %v4990_v58  ;;  %v2434_v58 = vadd.f32 %v2355_v9, %v4391_v13 }
 0x29f   : > { %v2487_v61 = vpop.f32.mrf.mxu2  ;;  %v2783_v31 = vpop.f32.mrf.mxu0 }
 0x2a0   : > { %v2567_v7 = vadd.f32 %v2487_v61, %v2433_v18  ;;  %v2643_v49 = vpop.f32.mrf.mxu3 }
 0x2a2   : > { %v2723_v23 = vadd.f32 %v2643_v49, %v2567_v7  ;;  %v2358_v47 = vpop.f32.mrf.mxu1  ;;  %3152 = vmatmul.msk.bf16.gmra.mxu0 %vm1320_vm4, %v4184_v40 }
 0x2a3   : > { %v2435_v39 = vadd.f32 %v2358_v47, %v4395_v6 }
 0x2a4   : > { %v2863_v26 = vadd.f32 %v2783_v31, %v2723_v23 }
 0x2a5   : > { %3101 = vmatmul.msk.bf16.gmra.mxu1 %vm1320_vm4, %v4184_v40 }
 0x2a6   : > { %2895 = vst.msk [vmem:[%s4620_s26] sm:$0xff] %vm1320_vm4, %v2863_v26 }
 0x2a7   : > { %v2489_v37 = vpop.f32.mrf.mxu2  ;;  %v2785_v59 = vpop.f32.mrf.mxu0 }
 0x2a8   : > { %v2568_v60 = vadd.f32 %v2489_v37, %v2434_v58  ;;  %v2645_v2 = vpop.f32.mrf.mxu3 }
 0x2aa   : > { %v2724_v53 = vadd.f32 %v2645_v2, %v2568_v60  ;;  %v2360_v20 = vpop.f32.mrf.mxu1 }
 0x2ab   : > { %v2436_v62 = vadd.f32 %v2360_v20, %v4406_v12 }
 0x2ac   : > { %3118 = vmatmul.msk.bf16.gmra.mxu2 %vm1320_vm4, %v4217_v14  ;;  %v2864_v13 = vadd.f32 %v2785_v59, %v2724_v53  ;;  %v5026_v59 = vld [vmem:[#allocation14_spill] sm:$0xff] }
 0x2ad   : > { %3135 = vmatmul.msk.bf16.gmra.mxu3 %vm1320_vm4, %v4006_v30 }
 0x2ae   : > { %2896 = vst.msk [vmem:[%s4620_s26 + $0x8] sm:$0xff] %vm1320_vm4, %v2864_v13 }
 0x2af   : > { %v2492_v33 = vpop.f32.mrf.mxu2  ;;  %v2788_v29 = vpop.f32.mrf.mxu0 }
 0x2b0   : > { %v2569_v50 = vadd.f32 %v2492_v33, %v2435_v39  ;;  %v2648_v40 = vpop.f32.mrf.mxu3 }
 0x2b2   : > { %v2725_v0 = vadd.f32 %v2648_v40, %v2569_v50  ;;  %v2363_v15 = vpop.f32.mrf.mxu1  ;;  %3153 = vmatmul.msk.bf16.gmra.mxu0 %vm1320_vm4, %v4287_v46 }
 0x2b3   : > { %v2437_v7 = vadd.f32 %v2363_v15, %v4408_v10 }
 0x2b4   : > { %v2865_v9 = vadd.f32 %v2788_v29, %v2725_v0 }
 0x2b5   : > { %3102 = vmatmul.msk.bf16.gmra.mxu1 %vm1320_vm4, %v4287_v46 }
 0x2b6   : > { %2897 = vst.msk [vmem:[%s4620_s26 + $0x10] sm:$0xff] %vm1320_vm4, %v2865_v9  ;;  %v5027_v9 = vld [vmem:[#allocation35_spill] sm:$0xff] }
 0x2b7   : > { %v2494_v30 = vpop.f32.mrf.mxu2  ;;  %v2790_v61 = vpop.f32.mrf.mxu0 }
 0x2b8   : > { %v2570_v14 = vadd.f32 %v2494_v30, %v2436_v62  ;;  %v2650_v6 = vpop.f32.mrf.mxu3 }
 0x2ba   : > { %v2726_v17 = vadd.f32 %v2650_v6, %v2570_v14  ;;  %v2365_v18 = vpop.f32.mrf.mxu1 }
 0x2bb   : > { %v2438_v37 = vadd.f32 %v2365_v18, %v4418_v16  ;;  %v5028_v18 = vld [vmem:[#allocation16_spill] sm:$0xff] }
 0x2bc   : > { %3119 = vmatmul.msk.bf16.gmra.mxu2 %vm1320_vm4, %v4074_v19  ;;  %v2866_v12 = vadd.f32 %v2790_v61, %v2726_v17  ;;  %v5025_v19 = vld [vmem:[#allocation34_spill] sm:$0xff] }
 0x2bd   : > { %3136 = vmatmul.msk.bf16.gmra.mxu3 %vm1320_vm4, %v4992_v52  ;;  %v278_v17 = vld [vmem:[%s3332_s12 + $0x1a0] sm:$0xff] }
 0x2be   : > { %2898 = vst.msk [vmem:[%s4620_s26 + $0x18] sm:$0xff] %vm1320_vm4, %v2866_v12  ;;  %v5029_v12 = vld [vmem:[#allocation28_spill] sm:$0xff] }
 0x2bf   : > { %v2497_v49 = vpop.f32.mrf.mxu2  ;;  %v2793_v26 = vpop.f32.mrf.mxu0 }
 0x2c0   : > { %v2571_v23 = vadd.f32 %v2497_v49, %v2437_v7  ;;  %v2653_v46 = vpop.f32.mrf.mxu3  ;;  %v5030_v49 = vld [vmem:[#allocation27_spill] sm:$0xff] }
 0x2c2   : > { %v2727_v47 = vadd.f32 %v2653_v46, %v2571_v23  ;;  %v2368_v31 = vpop.f32.mrf.mxu1  ;;  %3154 = vmatmul.msk.bf16.gmra.mxu0 %vm1320_vm4, %v5025_v19  ;;  %v3183_v46 = vld [vmem:[%s4806_s2] ss:$0 sm:$0xff] }
 0x2c3   : > { %v2439_v13 = vadd.f32 %v2368_v31, %v5026_v59 }
 0x2c4   : > { %v2867_v58 = vadd.f32 %v2793_v26, %v2727_v47  ;;  %v336_v47 = vmul.f32 %v3183_v46, %v278_v17 }
 0x2c5   : > { %3103 = vmatmul.msk.bf16.gmra.mxu1 %vm1320_vm4, %v5025_v19  ;;  %v3184_v19 = vld [vmem:[%s4807_s3] ss:$0 sm:$0xff] }
 0x2c6   : > { %2899 = vst.msk [vmem:[%s4620_s26 + $0x20] sm:$0xff] %vm1320_vm4, %v2867_v58 }
 0x2c7   : > { %v2499_v52 = vpop.f32.mrf.mxu2  ;;  %v2795_v20 = vpop.f32.mrf.mxu0 }
 0x2c8   : > { %v2572_v10 = vadd.f32 %v2499_v52, %v2438_v37  ;;  %v2655_v60 = vpop.f32.mrf.mxu3  ;;  %v394_v52 = vadd.f32 %v3184_v19, %v336_v47 }
 0x2ca   : > { %v2728_v2 = vadd.f32 %v2655_v60, %v2572_v10  ;;  %v2370_v53 = vpop.f32.mrf.mxu1 }
 0x2cc   : > { %3120 = vmatmul.msk.bf16.gmra.mxu2 %vm1320_vm4, %v4101_v21  ;;  %v2868_v16 = vadd.f32 %v2795_v20, %v2728_v2  ;;  %v2440_v21 = vadd.f32 %v2370_v53, %v4430_v1  ;;  %v277_v1 = vld [vmem:[%s3332_s12 + $0x198] sm:$0xff] }
 0x2cd   : > { %3137 = vmatmul.msk.bf16.gmra.mxu3 %vm1320_vm4, %v4994_v48  ;;  %v335_v26 = vmul.f32 %v3183_v46, %v277_v1 }
 0x2ce   : > { %2900 = vst.msk [vmem:[%s4620_s26 + $0x28] sm:$0xff] %vm1320_vm4, %v2868_v16  ;;  %v5031_v16 = vld [vmem:[#allocation8_spill] sm:$0xff] }
 0x2cf   : > { %v2502_v39 = vpop.f32.mrf.mxu2  ;;  %v2798_v15 = vpop.f32.mrf.mxu0  ;;  %v393_v2 = vadd.f32 %v3184_v19, %v335_v26 }
 0x2d0   : > { %v2573_v33 = vadd.f32 %v2502_v39, %v2439_v13  ;;  %v2658_v50 = vpop.f32.mrf.mxu3  ;;  %v5032_v13 = vld [vmem:[#allocation2_spill] sm:$0xff]  ;;  %v279_v39 = vld [vmem:[%s3332_s12 + $0x1a8] sm:$0x3] }
 0x2d2   : > { %v2729_v40 = vadd.f32 %v2658_v50, %v2573_v33  ;;  %v2373_v0 = vpop.f32.mrf.mxu1  ;;  %3155 = vmatmul.msk.bf16.gmra.mxu0 %vm1320_vm4, %v5027_v9  ;;  %v448_v33 = vmax.f32 %v394_v52, 0.0 }
 0x2d3   : > { %v2441_v23 = vadd.f32 %v2373_v0, %v5030_v49  ;;  %v447_v0 = vmax.f32 %v393_v2, 0.0  ;;  %v5034_v2 = vld [vmem:[#allocation39_spill] sm:$0xff] }
 0x2d4   : > { %v2869_v29 = vadd.f32 %v2798_v15, %v2729_v40  ;;  %v767_v40 = vpop.permute.xlu1 %766 }
 0x2d5   : > { %3104 = vmatmul.msk.bf16.gmra.mxu1 %vm1320_vm4, %v5027_v9  ;;  %v337_v9 = vmul.f32 %v3183_v46, %v279_v39 }
 0x2d6   : > { %2901 = vst.msk [vmem:[%s4620_s26 + $0x30] sm:$0xff] %vm1320_vm4, %v2869_v29 }
 0x2d7   : > { %v2504_v48 = vpop.f32.mrf.mxu2  ;;  %v2800_v61 = vpop.f32.mrf.mxu0 }
 0x2d8   : > { %v2574_v62 = vadd.f32 %v2504_v48, %v2440_v21  ;;  %v2660_v30 = vpop.f32.mrf.mxu3  ;;  %v762_v21 = vpop.permute.xlu0 %761  ;;  %v826_v48 = vmul.f32 %v767_v40, %v448_v33 }
 0x2da   : > { %v2730_v14 = vadd.f32 %v2660_v30, %v2574_v62  ;;  %v2375_v6 = vpop.f32.mrf.mxu1 }
 0x2db   : > { %v2442_v59 = vadd.f32 %v2375_v6, %v5031_v16 }
 0x2dc   : > { %3121 = vmatmul.msk.bf16.gmra.mxu2 %vm1320_vm4, %v5028_v18  ;;  %v2870_v7 = vadd.f32 %v2800_v61, %v2730_v14  ;;  %v825_v14 = vmul.f32 %v762_v21, %v447_v0  ;;  %v395_v18 = vadd.f32 %v3184_v19, %v337_v9  ;;  %v5033_v61 = vld [vmem:[#allocation15_spill] sm:$0xff] }
 0x2dd   : > { %3138 = vmatmul.msk.bf16.gmra.mxu3 %vm1320_vm4, %v5029_v12  ;;  %v4699_v12 = vpack.c.bf16 %v826_v48, %v826_v48 }
 0x2de   : > { %2902 = vst.msk [vmem:[%s4620_s26 + $0x38] sm:$0xff] %vm1320_vm4, %v2870_v7  ;;  %v4703_v49 = vpack.c.bf16 %v825_v14, %v825_v14  ;;  %v449_v47 = vmax.f32 %v395_v18, 0.0 }
 0x2df   : > { %v2507_v31 = vpop.f32.mrf.mxu2  ;;  %v2803_v53 = vpop.f32.mrf.mxu0 }
 0x2e0   : > { %v2575_v58 = vadd.f32 %v2507_v31, %v2441_v23  ;;  %v2663_v37 = vpop.f32.mrf.mxu3  ;;  %v2609_v31 = vshll.u32 %v4699_v12, 16  ;;  %v2603_v19 = vshll.u32 %v4703_v49, 16 }
 0x2e2   : > { %v2731_v10 = vadd.f32 %v2663_v37, %v2575_v58  ;;  %v2378_v60 = vpop.f32.mrf.mxu1  ;;  %3156 = vmatmul.msk.bf16.gmra.mxu0 %vm1320_vm4, %v5032_v13  ;;  %v2613_v58 = vshrl.u32 %v4699_v12, 16  ;;  %v2600_v37 = vshrl.u32 %v4703_v49, 16  ;;  %v2605_v39 = vrot.slane %v2603_v19, 5 }
 0x2e3   : > { %v2443_v1 = vadd.f32 %v2378_v60, %v5033_v61 }
 0x2e4   : > { %v2871_v20 = vadd.f32 %v2803_v53, %v2731_v10 }
 0x2e5   : > { %3105 = vmatmul.msk.bf16.gmra.mxu1 %vm1320_vm4, %v5032_v13  ;;  %v2602_v13 = vrot.slane %v2600_v37, 4 }
 0x2e6   : > { %2903 = vst.msk [vmem:[%s4620_s26 + $0x40] sm:$0xff] %vm1320_vm4, %v2871_v20  ;;  %v2611_v20 = vrot.slane %v2609_v31, 5 }
 0x2e7   : > { %v2509_v50 = vpop.f32.mrf.mxu2  ;;  %v2805_v6 = vpop.f32.mrf.mxu0  ;;  %v2606_v21 = vor.u32 %v2605_v39, %v2602_v13 }
 0x2e8   : > { %v2576_v15 = vadd.f32 %v2509_v50, %v2442_v59  ;;  %v2665_v29 = vpop.f32.mrf.mxu3  ;;  %v2615_v59 = vrot.slane %v2613_v58, 4 }
 0x2ea   : > { %v2732_v62 = vadd.f32 %v2665_v29, %v2576_v15  ;;  %v2380_v30 = vpop.f32.mrf.mxu1  ;;  %v2616_v29 = vor.u32 %v2615_v59, %v2611_v20 }
 0x2eb   : > { %v2444_v53 = vadd.f32 %v2380_v30, %v5034_v2 }
 0x2ec   : > { %3122 = vmatmul.msk.bf16.gmra.mxu2 %vm1320_vm4, %v4252_v54  ;;  %v2872_v17 = vadd.f32 %v2805_v6, %v2732_v62  ;;  %v772_v54 = vpop.permute.xlu2 %771  ;;  %v2617_v14 = vrot.slane %v2616_v29, 4  ;;  %v2607_v6 = vrot.slane %v2606_v21, 4 }
 0x2ed   : > { %3139 = vmatmul.msk.bf16.gmra.mxu3 %vm1320_vm4, %v4008_v4  ;;  %v827_v60 = vmul.f32 %v772_v54, %v449_v47  ;;  %v2758_v47 = vrot.slane %v4699_v12, 5  ;;  %v2469_v54 = vunpack.c.l.b16 %v4703_v49 }
 0x2ee   : > { %2904 = vst.msk [vmem:[%s4620_s26 + $0x48] sm:$0xff] %vm1320_vm4, %v2872_v17 }
 0x2ef   : > { %v2512_v7 = vpop.f32.mrf.mxu2  ;;  %v2808_v52 = vpop.f32.mrf.mxu0  ;;  %v881_v40 = vpack.c.bf16 %v827_v60, %v827_v60 }
 0x2f0   : > { %v2577_v23 = vadd.f32 %v2512_v7, %v2443_v1  ;;  %v2668_v46 = vpop.f32.mrf.mxu3 }
 0x2f2   : > { %v2733_v26 = vadd.f32 %v2668_v46, %v2577_v23  ;;  %v2383_v4 = vpop.f32.mrf.mxu1  ;;  %3157 = vmatmul.msk.bf16.gmra.mxu0 %vm1320_vm4, %v4289_v34  ;;  %v2612_v23 = vsel %vm3421_vm3, %v2607_v6, %v2611_v20 }
 0x2f3   : > { %v2445_v62 = vadd.f32 %v2383_v4, %v4465_v55  ;;  %v2470_v55 = vunpack.c.l.b16 %v4699_v12  ;;  %v2625_v28 = vunpack.c.l.b16 %v2612_v23 }
 0x2f4   : > { %v2873_v10 = vadd.f32 %v2808_v52, %v2733_v26  ;;  %v5035_v26 = vld [vmem:[#allocation32_spill] sm:$0xff]  ;;  %v2760_v52 = vrot.slane %v2758_v47, 4 }
 0x2f5   : > { %3106 = vmatmul.msk.bf16.gmra.mxu1 %vm1320_vm4, %v4289_v34  ;;  %v2619_v34 = vshll.u32 %v881_v40, 16  ;;  %v2471_v12 = vpack.c.b16 %v2470_v55, %v2469_v54 }
 0x2f6   : > { %2905 = vst.msk [vmem:[%s4620_s26 + $0x50] sm:$0xff] %vm1320_vm4, %v2873_v10 }
 0x2f7   : > { %v2514_v16 = vpop.f32.mrf.mxu2  ;;  %v2810_v9 = vpop.f32.mrf.mxu0  ;;  %v2621_v61 = vrot.slane %v2619_v34, 5 }
 0x2f8   : > { %v2578_v33 = vadd.f32 %v2514_v16, %v2444_v53  ;;  %v2670_v50 = vpop.f32.mrf.mxu3  ;;  %v3142_v53 = vrot.slane %v4703_v49, 9 }
 0x2fa   : > { %v2734_v0 = vadd.f32 %v2670_v50, %v2578_v33  ;;  %v2385_v15 = vpop.f32.mrf.mxu1  ;;  %v2759_v49 = vsel %vm3517_vm7, %v3142_v53, %v2758_v47 }
 0x2fb   : > { %v2446_v31 = vadd.f32 %v2385_v15, %v4481_v43  ;;  %v2761_v43 = vrot.slane %v881_v40, 5  ;;  %v2765_v21 = vunpack.c.l.b16 %v2759_v49 }
 0x2fc   : > { %3123 = vmatmul.msk.bf16.gmra.mxu2 %vm1320_vm4, %v4475_v51  ;;  %v2874_v48 = vadd.f32 %v2810_v9, %v2734_v0 }
 0x2fd   : > { %3140 = vmatmul.msk.bf16.gmra.mxu3 %vm1320_vm4, %v4490_v44  ;;  %v2622_v44 = vsel %vm3421_vm3, %v2617_v14, %v2621_v61  ;;  %v2762_v39 = vsel %vm3517_vm7, %v2760_v52, %v2761_v43 }
 0x2fe   : > { %2906 = vst.msk [vmem:[%s4620_s26 + $0x58] sm:$0xff] %vm1320_vm4, %v2874_v48  ;;  %v2626_v58 = vunpack.c.l.b16 %v2622_v44  ;;  %v2766_v40 = vunpack.c.l.b16 %v2762_v39 }
 0x2ff   : > { %v2517_v30 = vpop.f32.mrf.mxu2  ;;  %v2813_v51 = vpop.f32.mrf.mxu0 }
 0x300   : > { %v2579_v17 = vadd.f32 %v2517_v30, %v2445_v62  ;;  %v2673_v18 = vpop.f32.mrf.mxu3  ;;  %v2627_v60 = vpack.c.b16 %v2626_v58, %v2625_v28  ;;  %v2767_v34 = vpack.c.b16 %v2766_v40, %v2765_v21 }
 0x302   : > { %v2735_v1 = vadd.f32 %v2673_v18, %v2579_v17  ;;  %v2388_v7 = vpop.f32.mrf.mxu1  ;;  %3158 = vmatmul.msk.bf16.gmra.mxu0 %vm1320_vm4, %v5035_v26 }
 0x303   : > { %v2447_v59 = vadd.f32 %v2388_v7, %v4488_v8 }
 0x304   : > { %v2875_v46 = vadd.f32 %v2813_v51, %v2735_v1 }
 0x305   : > { %3107 = vmatmul.msk.bf16.gmra.mxu1 %vm1320_vm4, %v5035_v26 }
 0x306   : > { %2907 = vst.msk [vmem:[%s4620_s26 + $0x60] sm:$0xff] %vm1320_vm4, %v2875_v46 }
 0x307   : > { %v2519_v4 = vpop.f32.mrf.mxu2  ;;  %v2815_v20 = vpop.f32.mrf.mxu0 }
 0x308   : > { %v2580_v37 = vadd.f32 %v2519_v4, %v2446_v31  ;;  %v2675_v19 = vpop.f32.mrf.mxu3 }
 0x30a   : > { %v2736_v10 = vadd.f32 %v2675_v19, %v2580_v37  ;;  %v2390_v2 = vpop.f32.mrf.mxu1 }
 0x30b   : > { %v2448_v8 = vadd.f32 %v2390_v2, %v4501_v42 }
 0x30c   : > { %3124 = vmatmul.msk.bf16.gmra.mxu2 %vm1320_vm4, %v2471_v12  ;;  %v2876_v16 = vadd.f32 %v2815_v20, %v2736_v10 }
 0x30d   : > { %3141 = vmatmul.msk.bf16.gmra.mxu3 %vm1320_vm4, %v2627_v60 }
 0x30e   : > { %2908 = vst.msk [vmem:[%s4620_s26 + $0x68] sm:$0xff] %vm1320_vm4, %v2876_v16 }
 0x30f   : > { %v2522_v33 = vpop.f32.mrf.mxu2  ;;  %v2818_v9 = vpop.f32.mrf.mxu0 }
 0x310   : > { %v2581_v50 = vadd.f32 %v2522_v33, %v2447_v59  ;;  %v2678_v0 = vpop.f32.mrf.mxu3 }
 0x312   : > { %v2737_v15 = vadd.f32 %v2678_v0, %v2581_v50  ;;  %v2393_v29 = vpop.f32.mrf.mxu1  ;;  %3159 = vmatmul.msk.bf16.gmra.mxu0 %vm1320_vm4, %v2767_v34 }
 0x313   : > { %v2449_v1 = vadd.f32 %v2393_v29, %v4504_v35 }
 0x314   : > { %v2877_v48 = vadd.f32 %v2818_v9, %v2737_v15 }
 0x316   : > { %2909 = vst.msk [vmem:[%s4620_s26 + $0x70] sm:$0xff] %vm1320_vm4, %v2877_v48 }
 0x317   : > { %v2524_v62 = vpop.f32.mrf.mxu2  ;;  %v2820_v18 = vpop.f32.mrf.mxu0 }
 0x318   : > { %v2582_v30 = vadd.f32 %v2524_v62, %v2448_v8  ;;  %v2680_v14 = vpop.f32.mrf.mxu3 }
 0x31a   : > { %v2738_v6 = vadd.f32 %v2680_v14, %v2582_v30  ;;  %v2395_v17 = vpop.f32.mrf.mxu1 }
 0x31b   : > { %v2450_v47 = vadd.f32 %v2395_v17, %v4515_v56 }
 0x31c   : > { %v2878_v61 = vadd.f32 %v2820_v18, %v2738_v6 }
 0x31e   : > { %2910 = vst.msk [vmem:[%s4620_s26 + $0x78] sm:$0xff] %vm1320_vm4, %v2878_v61 }
 0x31f   : > { %v2527_v7 = vpop.f32.mrf.mxu2  ;;  %v2823_v46 = vpop.f32.mrf.mxu0 }
 0x320   : > { %v2583_v51 = vadd.f32 %v2527_v7, %v2449_v1  ;;  %v2683_v42 = vpop.f32.mrf.mxu3 }
 0x322   : > { %v2739_v23 = vadd.f32 %v2683_v42, %v2583_v51  ;;  %v2398_v44 = vpop.f32.mrf.mxu1 }
 0x323   : > { %v2451_v37 = vadd.f32 %v2398_v44, %v4518_v27 }
 0x324   : > { %v2879_v55 = vadd.f32 %v2823_v46, %v2739_v23 }
 0x326   : > { %2911 = vst.msk [vmem:[%s4620_s26 + $0x80] sm:$0xff] %vm1320_vm4, %v2879_v55 }
 0x327   : > { %v2529_v54 = vpop.f32.mrf.mxu2  ;;  %v2825_v28 = vpop.f32.mrf.mxu0 }
 0x328   : > { %v2584_v31 = vadd.f32 %v2529_v54, %v2450_v47  ;;  %v2685_v26 = vpop.f32.mrf.mxu3 }
 0x32a   : > { %v2740_v4 = vadd.f32 %v2685_v26, %v2584_v31  ;;  %v2400_v35 = vpop.f32.mrf.mxu1 }
 0x32b   : > { %v2452_v43 = vadd.f32 %v2400_v35, %v4529_v63 }
 0x32c   : > { %v2880_v58 = vadd.f32 %v2825_v28, %v2740_v4 }
 0x32e   : > { %2912 = vst.msk [vmem:[%s4620_s26 + $0x88] sm:$0xff] %vm1320_vm4, %v2880_v58 }
 0x32f   : > { %v2532_v19 = vpop.f32.mrf.mxu2  ;;  %v2828_v60 = vpop.f32.mrf.mxu0 }
 0x330   : > { %v2585_v52 = vadd.f32 %v2532_v19, %v2451_v37  ;;  %v2688_v12 = vpop.f32.mrf.mxu3 }
 0x332   : > { %v2741_v10 = vadd.f32 %v2688_v12, %v2585_v52  ;;  %v2403_v56 = vpop.f32.mrf.mxu1 }
 0x333   : > { %v2453_v33 = vadd.f32 %v2403_v56, %v4532_v3 }
 0x334   : > { %v2881_v2 = vadd.f32 %v2828_v60, %v2741_v10 }
 0x336   : > { %2913 = vst.msk [vmem:[%s4620_s26 + $0x90] sm:$0xff] %vm1320_vm4, %v2881_v2 }
 0x337   : > { %v2534_v53 = vpop.f32.mrf.mxu2  ;;  %v2830_v13 = vpop.f32.mrf.mxu0 }
 0x338   : > { %v2586_v20 = vadd.f32 %v2534_v53, %v2452_v43  ;;  %v2690_v16 = vpop.f32.mrf.mxu3 }
 0x33a   : > { %v2742_v59 = vadd.f32 %v2690_v16, %v2586_v20  ;;  %v2405_v27 = vpop.f32.mrf.mxu1 }
 0x33b   : > { %v2454_v21 = vadd.f32 %v2405_v27, %v4543_v32 }
 0x33c   : > { %v2882_v39 = vadd.f32 %v2830_v13, %v2742_v59 }
 0x33e   : > { %2914 = vst.msk [vmem:[%s4620_s26 + $0x98] sm:$0xff] %vm1320_vm4, %v2882_v39 }
 0x33f   : > { %v2537_v50 = vpop.f32.mrf.mxu2  ;;  %v2833_v15 = vpop.f32.mrf.mxu0 }
 0x340   : > { %v2587_v0 = vadd.f32 %v2537_v50, %v2453_v33  ;;  %v2693_v49 = vpop.f32.mrf.mxu3 }
 0x342   : > { %v2743_v40 = vadd.f32 %v2693_v49, %v2587_v0  ;;  %v2408_v63 = vpop.f32.mrf.mxu1 }
 0x343   : > { %v2455_v14 = vadd.f32 %v2408_v63, %v4546_v25 }
 0x344   : > { %v2883_v29 = vadd.f32 %v2833_v15, %v2743_v40 }
 0x346   : > { %2915 = vst.msk [vmem:[%s4620_s26 + $0xa0] sm:$0xff] %vm1320_vm4, %v2883_v29 }
 0x347   : > { %v2539_v9 = vpop.f32.mrf.mxu2  ;;  %v2835_v62 = vpop.f32.mrf.mxu0 }
 0x348   : > { %v2588_v48 = vadd.f32 %v2539_v9, %v2454_v21  ;;  %v2695_v34 = vpop.f32.mrf.mxu3 }
 0x34a   : > { %v2744_v8 = vadd.f32 %v2695_v34, %v2588_v48  ;;  %v2410_v3 = vpop.f32.mrf.mxu1 }
 0x34b   : > { %v2456_v51 = vadd.f32 %v2410_v3, %v4557_v5 }
 0x34c   : > { %v2884_v30 = vadd.f32 %v2835_v62, %v2744_v8 }
 0x34e   : > { %2916 = vst.msk [vmem:[%s4620_s26 + $0xa8] sm:$0xff] %vm1320_vm4, %v2884_v30 }
 0x34f   : > { %v2542_v6 = vpop.f32.mrf.mxu2  ;;  %v2838_v1 = vpop.f32.mrf.mxu0 }
 0x350   : > { %v2589_v17 = vadd.f32 %v2542_v6, %v2455_v14  ;;  %v2698_v18 = vpop.f32.mrf.mxu3 }
 0x352   : > { %v2745_v61 = vadd.f32 %v2698_v18, %v2589_v17  ;;  %v2413_v32 = vpop.f32.mrf.mxu1 }
 0x353   : > { %v2457_v54 = vadd.f32 %v2413_v32, %v4560_v38 }
 0x354   : > { %v2885_v7 = vadd.f32 %v2838_v1, %v2745_v61 }
 0x356   : > { %2917 = vst.msk [vmem:[%s4620_s26 + $0xb0] sm:$0xff] %vm1320_vm4, %v2885_v7 }
 0x357   : > { %v2544_v42 = vpop.f32.mrf.mxu2  ;;  %v2840_v55 = vpop.f32.mrf.mxu0 }
 0x358   : > { %v2590_v23 = vadd.f32 %v2544_v42, %v2456_v51  ;;  %v2700_v44 = vpop.f32.mrf.mxu3 }
 0x35a   : > { %v2746_v46 = vadd.f32 %v2700_v44, %v2590_v23  ;;  %v2415_v25 = vpop.f32.mrf.mxu1 }
 0x35b   : > { %v2458_v37 = vadd.f32 %v2415_v25, %v4571_v24 }
 0x35c   : > { %v2886_v47 = vadd.f32 %v2840_v55, %v2746_v46 }
 0x35e   : > { %2918 = vst.msk [vmem:[%s4620_s26 + $0xb8] sm:$0xff] %vm1320_vm4, %v2886_v47 }
 0x35f   : > { %v2547_v31 = vpop.f32.mrf.mxu2  ;;  %v2843_v28 = vpop.f32.mrf.mxu0 }
 0x360   : > { %v2591_v26 = vadd.f32 %v2547_v31, %v2457_v54  ;;  %v2703_v4 = vpop.f32.mrf.mxu3 }
 0x362   : > { %v2747_v35 = vadd.f32 %v2703_v4, %v2591_v26  ;;  %v2418_v5 = vpop.f32.mrf.mxu1 }
 0x363   : > { %v2459_v2 = vadd.f32 %v2418_v5, %v4574_v45 }
 0x364   : > { %v2887_v58 = vadd.f32 %v2843_v28, %v2747_v35 }
 0x366   : > { %2919 = vst.msk [vmem:[%s4620_s26 + $0xc0] sm:$0xff] %vm1320_vm4, %v2887_v58 }
 0x367   : > { %v2549_v19 = vpop.f32.mrf.mxu2  ;;  %v2845_v56 = vpop.f32.mrf.mxu0 }
 0x368   : > { %v2592_v52 = vadd.f32 %v2549_v19, %v2458_v37  ;;  %v2705_v12 = vpop.f32.mrf.mxu3 }
 0x36a   : > { %v2748_v10 = vadd.f32 %v2705_v12, %v2592_v52  ;;  %v2420_v38 = vpop.f32.mrf.mxu1 }
 0x36b   : > { %v2460_v13 = vadd.f32 %v2420_v38, %v4585_v57 }
 0x36c   : > { %v2888_v60 = vadd.f32 %v2845_v56, %v2748_v10 }
 0x36e   : > { %2920 = vst.msk [vmem:[%s4620_s26 + $0xc8] sm:$0xff] %vm1320_vm4, %v2888_v60 }
 0x36f   : > { %v2552_v43 = vpop.f32.mrf.mxu2  ;;  %v2848_v24 = vpop.f32.mrf.mxu0 }
 0x370   : > { %v2593_v53 = vadd.f32 %v2552_v43, %v2459_v2  ;;  %v2708_v20 = vpop.f32.mrf.mxu3 }
 0x372   : > { %v2749_v16 = vadd.f32 %v2708_v20, %v2593_v53  ;;  %v2423_v59 = vpop.f32.mrf.mxu1 }
 0x373   : > { %v2461_v40 = vadd.f32 %v2423_v59, %v4588_v22 }
 0x374   : > { %v2889_v27 = vadd.f32 %v2848_v24, %v2749_v16 }
 0x376   : > { %2921 = vst.msk [vmem:[%s4620_s26 + $0xd0] sm:$0xff] %vm1320_vm4, %v2889_v27 }
 0x377   : > { %v2554_v39 = vpop.f32.mrf.mxu2  ;;  %v2850_v45 = vpop.f32.mrf.mxu0 }
 0x378   : > { %v2594_v33 = vadd.f32 %v2554_v39, %v2460_v13  ;;  %v2710_v50 = vpop.f32.mrf.mxu3 }
 0x37a   : > { %v2750_v0 = vadd.f32 %v2710_v50, %v2594_v33  ;;  %v2425_v63 = vpop.f32.mrf.mxu1 }
 0x37b   : > { %v2462_v34 = vadd.f32 %v2425_v63, %v4599_v41 }
 0x37c   : > { %v2890_v49 = vadd.f32 %v2850_v45, %v2750_v0 }
 0x37e   : > { %2922 = vst.msk [vmem:[%s4620_s26 + $0xd8] sm:$0xff] %vm1320_vm4, %v2890_v49 }
 0x37f   : > { %v2557_v15 = vpop.f32.mrf.mxu2  ;;  %v2853_v57 = vpop.f32.mrf.mxu0 }
 0x380   : > { %v2595_v29 = vadd.f32 %v2557_v15, %v2461_v40  ;;  %v2713_v21 = vpop.f32.mrf.mxu3 }
 0x382   : > { %v2751_v9 = vadd.f32 %v2713_v21, %v2595_v29  ;;  %v2428_v30 = vpop.f32.mrf.mxu1 }
 0x383   : > { %v2463_v17 = vadd.f32 %v2428_v30, %v4602_v11 }
 0x384   : > { %v2891_v48 = vadd.f32 %v2853_v57, %v2751_v9 }
 0x386   : > { %2923 = vst.msk [vmem:[%s4620_s26 + $0xe0] sm:$0xff] %vm1320_vm4, %v2891_v48 }
 0x387   : > { %v2559_v8 = vpop.f32.mrf.mxu2  ;;  %v2855_v14 = vpop.f32.mrf.mxu0 }
 0x388   : > { %v2596_v3 = vadd.f32 %v2559_v8, %v2462_v34  ;;  %v2715_v62 = vpop.f32.mrf.mxu3 }
 0x38a   : > { %v2752_v22 = vadd.f32 %v2715_v62, %v2596_v3  ;;  %v2430_v1 = vpop.f32.mrf.mxu1 }
 0x38b   : > { %v2464_v42 = vadd.f32 %v2430_v1, %v4613_v36 }
 0x38c   : > { %v2892_v6 = vadd.f32 %v2855_v14, %v2752_v22 }
 0x38e   : > { %2924 = vst.msk [vmem:[%s4620_s26 + $0xe8] sm:$0xff] %vm1320_vm4, %v2892_v6 }
 0x38f   : > { %v2562_v18 = vpop.f32.mrf.mxu2  ;;  %v2858_v7 = vpop.f32.mrf.mxu0 }
 0x390   : > { %v2597_v61 = vadd.f32 %v2562_v18, %v2463_v17  ;;  %v2718_v32 = vpop.f32.mrf.mxu3 }
 0x392   : > { %v2753_v41 = vadd.f32 %v2718_v32, %v2597_v61 }
 0x394   : > { %v2893_v51 = vadd.f32 %v2858_v7, %v2753_v41 }
 0x396   : > { %2925 = vst.msk [vmem:[%s4620_s26 + $0xf0] sm:$0xff] %vm1320_vm4, %v2893_v51 }
 0x397   : > { %v2564_v23 = vpop.f32.mrf.mxu2  ;;  %v2860_v55 = vpop.f32.mrf.mxu0 }
 0x398   : > { %v2598_v44 = vadd.f32 %v2564_v23, %v2464_v42  ;;  %v2720_v46 = vpop.f32.mrf.mxu3 }
 0x39a   : > { %v2754_v25 = vadd.f32 %v2720_v46, %v2598_v44 }
 0x39c   : > { %v2894_v11 = vadd.f32 %v2860_v55, %v2754_v25 }
 0x39e   : > { %2926 = vst.msk [vmem:[%s4620_s26 + $0xf8] sm:$0xff] %vm1320_vm4, %v2894_v11 }
 0x39f PF: > { %s15_s18 = sadd.s32 1, %s3191_s18  }
 0x3a0   : > { %p12_p4 = scmp.ge.s32.totalorder %s15_s18, 4  }
 0x3a2   :  { %14 = sbr.rel (!%p12_p4) target bundleno = 1 (0x1), region = 78 }

</bundles_post_ra>
